<compile_context>
chip_gen: v5e
topology: v5e:2x2
jax: 0.10.0
libtpu: 0.0.40
codegen_flags: <defaults>
</compile_context>

<pallas_src>
import functools
import math

import jax
import jax.numpy as jnp
from jax.experimental import pallas as pl
from jax.experimental.pallas import tpu as pltpu


# ----------------------------- helpers ---------------------------------------
def _round_up(x, m):
    return ((x + m - 1) // m) * m


def fake_quant(t, num_bits=8):
    """Mirror of FakeQuantOp.forward: quantize to 2^bits levels, dequantize."""
    mx = jnp.max(t)
    mn = jnp.min(t)
    scale = (mx - mn) / (2 ** num_bits - 1)
    scale = jnp.where(scale > 0, scale, jnp.float32(1.0))  # guard constants
    return jnp.round(t / scale) * scale


# ------------------------------- Pallas kernels --------------------------------
def _mm_bias_kernel(a_ref, b_ref, bias_ref, o_ref, *, apply_relu):
    # a_ref:    (tm, K_pad)   bf16 im2col patches tile
    # b_ref:    (K_pad, OC_pad) bf16 weight matrix (whole K in one block)
    # bias_ref: (1, OC_pad)   f32
    # o_ref:    (tm, OC_pad)  bf16 (lane-dense: OC_pad % 128 == 0)
    r = jnp.dot(a_ref[...], b_ref[...], preferred_element_type=jnp.float32)
    r = r + bias_ref[...]
    if apply_relu:
        r = jnp.maximum(r, 0.0)
    o_ref[...] = r.astype(o_ref.dtype)


def _mm_bias_ktiled_kernel(a_ref, b_ref, bias_ref, o_ref, acc_ref, *, apply_relu):
    # Fallback for very large K (never hit by SqueezeResNet18 itself).
    @pl.when(pl.program_id(1) == 0)
    def _():
        acc_ref[...] = jnp.zeros_like(acc_ref)

    acc_ref[...] += jnp.dot(a_ref[...], b_ref[...],
                            preferred_element_type=jnp.float32)

    @pl.when(pl.program_id(1) == pl.num_programs(1) - 1)
    def _():
        r = acc_ref[...] + bias_ref[...]
        if apply_relu:
            r = jnp.maximum(r, 0.0)
        o_ref[...] = r.astype(o_ref.dtype)


_MAX_SINGLE_TK = 2048   # every layer of this network has K_pad <= 640
_VMEM_LIMIT = 48 * 1024 * 1024  # budget under v7x's 64 MiB


def matmul_bias_pallas(patches, w_mat, bias_mat, *, apply_relu,
                       true_k, true_oc):
    """patches: (M, K) bf16 (unpadded), w_mat: (K_pad, OC_pad) bf16,
    bias_mat: (1, OC_pad) f32  ->  (M, OC_pad) bf16 (caller slices OC)."""
    M, K = patches.shape
    K_pad, OC_pad = w_mat.shape
    assert K_pad % 128 == 0 and OC_pad % 128 == 0 and K <= K_pad

    # tm: multiple of 16 (bf16 sublane packing), >= 2 M-programs when possible
    # (v7x megacore), capped at 512.
    M16 = _round_up(M, 16)
    tm = min(512, _round_up(max(16, -(-M16 // 2)), 16))
    M_pad = _round_up(M, tm)

    patches_p = jnp.pad(patches, ((0, M_pad - M), (0, K_pad - K)))

    # CostEstimate from unpadded dims (advisory for XLA scheduling).
    flops = 2 * M * true_k * true_oc
    bytes_accessed = (M * true_k * 2 + true_k * true_oc * 2
                      + true_oc * 4 + M * true_oc * 2)
    ce = pl.CostEstimate(flops=flops, transcendentals=0,
                         bytes_accessed=bytes_accessed)

    if K_pad <= _MAX_SINGLE_TK:
        kernel = functools.partial(_mm_bias_kernel, apply_relu=apply_relu)
        out = pl.pallas_call(
            kernel,
            out_shape=jax.ShapeDtypeStruct((M_pad, OC_pad), jnp.bfloat16),
            grid_spec=pltpu.PrefetchScalarGridSpec(
                num_scalar_prefetch=0,
                grid=(M_pad // tm,),
                in_specs=[
                    pl.BlockSpec((tm, K_pad), lambda i: (i, 0)),
                    pl.BlockSpec((K_pad, OC_pad), lambda i: (0, 0)),
                    pl.BlockSpec((1, OC_pad), lambda i: (0, 0)),
                ],
                out_specs=pl.BlockSpec((tm, OC_pad), lambda i: (i, 0)),
            ),
            compiler_params=pltpu.CompilerParams(
                dimension_semantics=("parallel",),
                vmem_limit_bytes=_VMEM_LIMIT,
            ),
            cost_estimate=ce,
        )(patches_p, w_mat, bias_mat)
    else:
        # K-tiled fallback with an f32 VMEM accumulator (bf16 output would lose
        # precision if accumulated in place), reduction axis last.
        tk = 512
        K_pad2 = _round_up(K_pad, tk)
        if K_pad2 != K_pad:
            patches_p = jnp.pad(patches_p, ((0, 0), (0, K_pad2 - K_pad)))
            w_mat = jnp.pad(w_mat, ((0, K_pad2 - K_pad), (0, 0)))
        kernel = functools.partial(_mm_bias_ktiled_kernel, apply_relu=apply_relu)
        out = pl.pallas_call(
            kernel,
            out_shape=jax.ShapeDtypeStruct((M_pad, OC_pad), jnp.bfloat16),
            grid_spec=pltpu.PrefetchScalarGridSpec(
                num_scalar_prefetch=0,
                grid=(M_pad // tm, K_pad2 // tk),
                in_specs=[
                    pl.BlockSpec((tm, tk), lambda i, k: (i, k)),
                    pl.BlockSpec((tk, OC_pad), lambda i, k: (k, 0)),
                    pl.BlockSpec((1, OC_pad), lambda i, k: (0, 0)),
                ],
                out_specs=pl.BlockSpec((tm, OC_pad), lambda i, k: (i, 0)),
                scratch_shapes=[pltpu.VMEM((tm, OC_pad), jnp.float32)],
            ),
            compiler_params=pltpu.CompilerParams(
                dimension_semantics=("parallel", "arbitrary"),
                vmem_limit_bytes=_VMEM_LIMIT,
            ),
            cost_estimate=ce,
        )(patches_p, w_mat, bias_mat)
    return out[:M]


# ------------------------------ conv via im2col -------------------------------
def _im2col(x_nhwc, KH, KW, stride, padding):
    """x: (N,H,W,C) bf16 -> patches (N*OH*OW, C*KH*KW) bf16, K-order (C, kh, kw)."""
    # TODO(synk): im2col is XLA glue inside the jit; an in-kernel shifted-1x1
    # accumulation would avoid materializing the KH*KW-expanded patches in HBM.
    N, H, W, C = x_nhwc.shape
    s, p = stride, padding
    OH = (H + 2 * p - KH) // s + 1
    OW = (W + 2 * p - KW) // s + 1
    if KH == 1 and KW == 1 and p == 0:
        patches = x_nhwc[:, ::s, ::s, :].reshape(N * OH * OW, C)
        return patches, OH, OW
    xp = jnp.pad(x_nhwc, ((0, 0), (p, p), (p, p), (0, 0)))
    cols = [xp[:, i:i + s * OH:s, j:j + s * OW:s, :]
            for i in range(KH) for j in range(KW)]
    patches = jnp.stack(cols, axis=-1)                # (N, OH, OW, C, KH*KW)
    return patches.reshape(N * OH * OW, C * KH * KW), OH, OW


def max_pool_nhwc(x, k=3, s=2, p=1):
    # TODO(synk): MaxPool2d runs as XLA reduce_window glue, not a Pallas kernel.
    return jax.lax.reduce_window(
        x, jnp.array(-jnp.inf, x.dtype), jax.lax.max,
        window_dimensions=(1, k, k, 1), window_strides=(1, s, s, 1),
        padding=((0, 0), (p, p), (p, p), (0, 0)))


# ------------------------------ module wrappers -------------------------------
class ConvBNQuantPallas:
    """JAX/Pallas equivalent of ConvBN_Quant (BN folded into conv + fake quant).
    Folded/quantized/padded bf16 weight matrices are precomputed at __init__."""

    def __init__(self, in_ch, out_ch, kernel_size, stride=1, padding=0,
                 bias=True, num_bits=8, *, key):
        self.in_ch, self.out_ch = in_ch, out_ch
        self.ksize = kernel_size
        self.stride, self.padding, self.num_bits = stride, padding, num_bits
        k1, k2, k3, k4, k5, k6 = jax.random.split(key, 6)
        n = kernel_size * kernel_size * out_ch        # initialize_weight() rule
        self.weight = (jax.random.normal(
            k1, (out_ch, in_ch, kernel_size, kernel_size), jnp.float32)
            * math.sqrt(2.0 / n))
        if bias:
            fan_in = in_ch * kernel_size * kernel_size
            bound = 1.0 / math.sqrt(fan_in)
            self.bias = jax.random.uniform(k2, (out_ch,), minval=-bound,
                                           maxval=bound, dtype=jnp.float32)
        else:
            self.bias = None
        # BatchNorm params (randomized so BN folding is actually exercised).
        self.bn_weight = jax.random.uniform(k3, (out_ch,), minval=0.5, maxval=1.5)
        self.bn_bias = 0.1 * jax.random.normal(k4, (out_ch,), jnp.float32)
        self.running_mean = 0.1 * jax.random.normal(k5, (out_ch,), jnp.float32)
        self.running_var = jax.random.uniform(k6, (out_ch,), minval=0.5, maxval=1.5)
        self.eps = 1e-5

        # ---- precompute folded + fake-quantized + padded matmul operands ----
        w, b = self.folded_params()
        K = in_ch * kernel_size * kernel_size
        K_pad = _round_up(K, 128)
        OC_pad = _round_up(out_ch, 128)
        self.K = K
        self.w_mat = jnp.pad(
            w.reshape(out_ch, K).T,
            ((0, K_pad - K), (0, OC_pad - out_ch))).astype(jnp.bfloat16)
        if b is None:
            b = jnp.zeros((out_ch,), jnp.float32)
        self.bias_mat = jnp.pad(b.astype(jnp.float32),
                                (0, OC_pad - out_ch)).reshape(1, OC_pad)

    def folded_params(self):
        var_sqrt = jnp.sqrt(self.running_var + self.eps)
        w = (self.weight / var_sqrt[:, None, None, None]
             * self.bn_weight[:, None, None, None])
        w = fake_quant(w, self.num_bits)
        if self.bias is not None:
            b = (self.bias - self.running_mean) / var_sqrt * self.bn_weight + self.bn_bias
            b = fake_quant(b, self.num_bits)
        else:
            b = None   # bias=False: BN shift not applied (matches torch ConvBN_Quant)
        return w, b

    def __call__(self, x_nhwc, relu=False):
        N = x_nhwc.shape[0]
        patches, OH, OW = _im2col(x_nhwc, self.ksize, self.ksize,
                                  self.stride, self.padding)
        out = matmul_bias_pallas(patches, self.w_mat, self.bias_mat,
                                 apply_relu=relu,
                                 true_k=self.K, true_oc=self.out_ch)
        return out[:, :self.out_ch].reshape(N, OH, OW, self.out_ch)


class FireModulePallas:
    """Squeeze 1x1 conv, then both expand convs fused into a single matmul:
    the 1x1 expand weights live on the center-tap rows of the 3x3 im2col weight
    matrix, concatenated along OC => one pallas_call emits the concat output.
    TODO(synk): SE branch omitted (SqueezeResNet18 builds FireModule with se=False).
    TODO(synk): full-Fire fusion (squeeze output resident in VMEM) not implemented."""

    def __init__(self, in_channel, out_channel, *, key):
        k1, k2, k3 = jax.random.split(key, 3)
        sq_out = out_channel // 8
        ex_out = out_channel // 2
        self.sq_out, self.ex_out = sq_out, ex_out
        self.conv_bn1 = ConvBNQuantPallas(in_channel, sq_out, 1, 1, 0, key=k1)
        self.expand_conv_bn1 = ConvBNQuantPallas(sq_out, ex_out, 1, 1, 0, key=k2)
        self.expand_conv_bn2 = ConvBNQuantPallas(sq_out, ex_out, 3, 1, 1, key=k3)

        # ---- precompute fused expand weight matrix (K = sq_out*9) ----
        w1, b1 = self.expand_conv_bn1.folded_params()      # (ex_out, sq_out, 1, 1)
        w3, b3 = self.expand_conv_bn2.folded_params()      # (ex_out, sq_out, 3, 3)
        C = sq_out
        K = C * 9
        OC = 2 * ex_out
        # 1x1 weights go on the center-tap (kh=1, kw=1 -> tap index 4) rows.
        w1_rows = jnp.zeros((C, 9, ex_out), jnp.float32).at[:, 4, :].set(
            w1.reshape(ex_out, C).T)
        w_fused = jnp.concatenate(
            [w1_rows.reshape(K, ex_out), w3.reshape(ex_out, K).T], axis=1)
        b_fused = jnp.concatenate([b1, b3]).astype(jnp.float32)
        K_pad = _round_up(K, 128)
        OC_pad = _round_up(OC, 128)
        self.exp_K, self.exp_OC = K, OC
        self.exp_w = jnp.pad(w_fused,
                             ((0, K_pad - K), (0, OC_pad - OC))).astype(jnp.bfloat16)
        self.exp_b = jnp.pad(b_fused, (0, OC_pad - OC)).reshape(1, OC_pad)

    def __call__(self, x):
        x = self.conv_bn1(x)                              # (N,H,W,sq_out) bf16
        N = x.shape[0]
        patches, OH, OW = _im2col(x, 3, 3, 1, 1)
        out = matmul_bias_pallas(patches, self.exp_w, self.exp_b,
                                 apply_relu=False,
                                 true_k=self.exp_K, true_oc=self.exp_OC)
        return out[:, :self.exp_OC].reshape(N, OH, OW, self.exp_OC)


class SqueezeResNet18Pallas:
    def __init__(self, be_backbone=True, *, key):
        keys = jax.random.split(key, 9)
        self.be_backbone = be_backbone
        self.conv_bn1 = ConvBNQuantPallas(3, 64, 7, stride=2, padding=3,
                                          bias=False, key=keys[0])
        self.layer1 = [FireModulePallas(64, 64, key=keys[1]),
                       FireModulePallas(64, 64, key=keys[2])]
        self.layer2 = [FireModulePallas(64, 128, key=keys[3]),
                       FireModulePallas(128, 128, key=keys[4])]
        self.layer3 = [FireModulePallas(128, 256, key=keys[5]),
                       FireModulePallas(256, 256, key=keys[6])]
        self.layer4 = [FireModulePallas(256, 512, key=keys[7]),
                       FireModulePallas(512, 512, key=keys[8])]
        # One jit over the whole forward; weights are already folded/padded.
        self._forward_jit = jax.jit(self._forward)

    def _forward(self, x_nchw):
        outs = []
        x = jnp.transpose(x_nchw, (0, 2, 3, 1)).astype(jnp.bfloat16)  # NHWC bf16
        x = self.conv_bn1(x, relu=True)               # ReLU fused in kernel epilogue
        if self.be_backbone:
            outs.append(x)
        x = max_pool_nhwc(x)
        for fire in self.layer1:
            x = fire(x)
        if self.be_backbone:
            outs.append(x)
        x = max_pool_nhwc(x)
        for fire in self.layer2:
            x = fire(x)
        if self.be_backbone:
            outs.append(x)
        x = max_pool_nhwc(x)
        for fire in self.layer3:
            x = fire(x)
        if self.be_backbone:
            outs.append(x)
        x = max_pool_nhwc(x)
        for fire in self.layer4:
            x = fire(x)
        outs.append(x)
        # (final maxpool result is discarded by the torch forward as well)
        return [jnp.transpose(o, (0, 3, 1, 2)).astype(jnp.float32) for o in outs]

    def __call__(self, x_nchw):
        return self._forward_jit(x_nchw)


# ------------------------------ pure-JAX reference -----------------------------
def _ref_convbn(layer, x_nchw, relu=False):
    w, b = layer.folded_params()
    y = jax.lax.conv_general_dilated(
        x_nchw.astype(jnp.bfloat16), w.astype(jnp.bfloat16),
        window_strides=(layer.stride, layer.stride),
        padding=((layer.padding, layer.padding),) * 2,
        dimension_numbers=("NCHW", "OIHW", "NCHW"),
        preferred_element_type=jnp.float32)
    if b is not None:
        y = y + b.reshape(1, -1, 1, 1)
    if relu:
        y = jnp.maximum(y, 0.0)
    return y.astype(jnp.bfloat16)


def _ref_maxpool_nchw(x):
    return jax.lax.reduce_window(
        x, jnp.array(-jnp.inf, x.dtype), jax.lax.max,
        (1, 1, 3, 3), (1, 1, 2, 2), ((0, 0), (0, 0), (1, 1), (1, 1)))


def _ref_fire(fire, x):
    x = _ref_convbn(fire.conv_bn1, x)
    return jnp.concatenate([_ref_convbn(fire.expand_conv_bn1, x),
                            _ref_convbn(fire.expand_conv_bn2, x)], axis=1)


def reference_forward(model, x_nchw):
    outs = []
    x = _ref_convbn(model.conv_bn1, x_nchw, relu=True)
    if model.be_backbone:
        outs.append(x)
    x = _ref_maxpool_nchw(x)
    for f in model.layer1:
        x = _ref_fire(f, x)
    if model.be_backbone:
        outs.append(x)
    x = _ref_maxpool_nchw(x)
    for f in model.layer2:
        x = _ref_fire(f, x)
    if model.be_backbone:
        outs.append(x)
    x = _ref_maxpool_nchw(x)
    for f in model.layer3:
        x = _ref_fire(f, x)
    if model.be_backbone:
        outs.append(x)
    x = _ref_maxpool_nchw(x)
    for f in model.layer4:
        x = _ref_fire(f, x)
    outs.append(x)
    return [o.astype(jnp.float32) for o in outs]


# ------------------------------------ main ------------------------------------
if __name__ == "__main__":
    key = jax.random.PRNGKey(0)
    xkey, pkey = jax.random.split(key)

    # Small input consistent with the module (3 RGB channels required).
    N, C, H, W = 2, 3, 32, 32
    x = jax.random.normal(xkey, (N, C, H, W), dtype=jnp.float32)

    model = SqueezeResNet18Pallas(be_backbone=True, key=pkey)
    outs = model(x)
    outs = jax.block_until_ready(outs)

    expected = [(N, 64, 16, 16), (N, 64, 8, 8), (N, 128, 4, 4),
                (N, 256, 2, 2), (N, 512, 1, 1)]
    assert [tuple(o.shape) for o in outs] == expected, \
        [tuple(o.shape) for o in outs]

    refs = reference_forward(model, x)
    for o, r in zip(outs, refs):
        assert bool(jnp.all(jnp.isfinite(o)))
        scale = jnp.max(jnp.abs(r)) + 1e-6
        rel_err = float(jnp.max(jnp.abs(o - r)) / scale)
        assert rel_err < 5e-2, rel_err

    print("KERNEL_OK")
</pallas_src>

<mosaic_0001>
module attributes {stable_mosaic.version = 11 : i64} {
  func.func @_mm_bias_kernel(%arg0: i32, %arg1: memref<256x256xbf16, #tpu.memory_space<vmem>>, %arg2: memref<256x128xbf16, #tpu.memory_space<vmem>>, %arg3: memref<1x128xf32, #tpu.memory_space<vmem>>, %arg4: memref<256x128xbf16, #tpu.memory_space<vmem>>) attributes {dimension_semantics = [#tpu.dimension_semantics<parallel>], iteration_bounds = array<i64: 2>, scalar_prefetch = 0 : i64, scratch_operands = 0 : i64, tpu.core_type = #tpu.core_type<tc>, window_params = [{transform_indices = @transform_0, window_bounds = array<i64: 256, 256>}, {pipeline_mode = #tpu.pipeline_mode<synchronous>, transform_indices = @transform_1, window_bounds = array<i64: 256, 128>}, {pipeline_mode = #tpu.pipeline_mode<synchronous>, transform_indices = @transform_2, window_bounds = array<i64: 1, 128>}, {transform_indices = @transform_3, window_bounds = array<i64: 256, 128>}]} {
    %c0 = arith.constant 0 : index
    %c0_0 = arith.constant 0 : index
    %0 = vector.load %arg1[%c0, %c0_0] : memref<256x256xbf16, #tpu.memory_space<vmem>>, vector<256x256xbf16>
    %c0_1 = arith.constant 0 : index
    %c0_2 = arith.constant 0 : index
    %1 = vector.load %arg2[%c0_1, %c0_2] : memref<256x128xbf16, #tpu.memory_space<vmem>>, vector<256x128xbf16>
    %cst = arith.constant dense<0.000000e+00> : vector<256x128xf32>
    %2 = tpu.matmul %0, %1, %cst {dimension_numbers = #tpu.dot_dimension_numbers<[1], [0], [0], [1], [0, 0, 1, 1], [], []>} : vector<256x256xbf16>, vector<256x128xbf16>, vector<256x128xf32> -> vector<256x128xf32>
    %c0_3 = arith.constant 0 : index
    %c0_4 = arith.constant 0 : index
    %3 = vector.load %arg3[%c0_3, %c0_4] : memref<1x128xf32, #tpu.memory_space<vmem>>, vector<1x128xf32>
    %4 = vector.broadcast %3 : vector<1x128xf32> to vector<256x128xf32>
    %5 = arith.addf %2, %4 : vector<256x128xf32>
    %cst_5 = arith.constant 0.000000e+00 : f32
    %6 = vector.broadcast %cst_5 : f32 to vector<256x128xf32>
    %7 = arith.maximumf %5, %6 : vector<256x128xf32>
    %8 = arith.truncf %7 : vector<256x128xf32> to vector<256x128xbf16>
    %c0_6 = arith.constant 0 : index
    %c0_7 = arith.constant 0 : index
    %9 = vector.load %arg4[%c0_6, %c0_7] : memref<256x128xbf16, #tpu.memory_space<vmem>>, vector<256x128xbf16>
    tpu.vector_store %arg4[%c0_6, %c0_7], %8 {strides = array<i32>} : memref<256x128xbf16, #tpu.memory_space<vmem>>, vector<256x128xbf16>,
    return
  }
  func.func @transform_0(%arg0: i32) -> (i32, i32) {
    %c0_i32 = arith.constant 0 : i32
    %c0_i32_0 = arith.constant 0 : i32
    return %arg0, %c0_i32 : i32, i32
  }
  func.func @transform_1(%arg0: i32) -> (i32, i32) {
    %c0_i32 = arith.constant 0 : i32
    %c0_i32_0 = arith.constant 0 : i32
    %c0_i32_1 = arith.constant 0 : i32
    return %c0_i32, %c0_i32_0 : i32, i32
  }
  func.func @transform_2(%arg0: i32) -> (i32, i32) {
    %c0_i32 = arith.constant 0 : i32
    %c0_i32_0 = arith.constant 0 : i32
    %c0_i32_1 = arith.constant 0 : i32
    return %c0_i32, %c0_i32_0 : i32, i32
  }
  func.func @transform_3(%arg0: i32) -> (i32, i32) {
    %c0_i32 = arith.constant 0 : i32
    %c0_i32_0 = arith.constant 0 : i32
    return %arg0, %c0_i32 : i32, i32
  }
}

module attributes {stable_mosaic.version = 11 : i64} {
  func.func @_mm_bias_kernel(%arg0: i32, %arg1: memref<64x128xbf16, #tpu.memory_space<vmem>>, %arg2: memref<128x128xbf16, #tpu.memory_space<vmem>>, %arg3: memref<1x128xf32, #tpu.memory_space<vmem>>, %arg4: memref<64x128xbf16, #tpu.memory_space<vmem>>) attributes {dimension_semantics = [#tpu.dimension_semantics<parallel>], iteration_bounds = array<i64: 2>, scalar_prefetch = 0 : i64, scratch_operands = 0 : i64, tpu.core_type = #tpu.core_type<tc>, window_params = [{transform_indices = @transform_0, window_bounds = array<i64: 64, 128>}, {pipeline_mode = #tpu.pipeline_mode<synchronous>, transform_indices = @transform_1, window_bounds = array<i64: 128, 128>}, {pipeline_mode = #tpu.pipeline_mode<synchronous>, transform_indices = @transform_2, window_bounds = array<i64: 1, 128>}, {transform_indices = @transform_3, window_bounds = array<i64: 64, 128>}]} {
    %c0 = arith.constant 0 : index
    %c0_0 = arith.constant 0 : index
    %0 = vector.load %arg1[%c0, %c0_0] : memref<64x128xbf16, #tpu.memory_space<vmem>>, vector<64x128xbf16>
    %c0_1 = arith.constant 0 : index
    %c0_2 = arith.constant 0 : index
    %1 = vector.load %arg2[%c0_1, %c0_2] : memref<128x128xbf16, #tpu.memory_space<vmem>>, vector<128x128xbf16>
    %cst = arith.constant dense<0.000000e+00> : vector<64x128xf32>
    %2 = tpu.matmul %0, %1, %cst {dimension_numbers = #tpu.dot_dimension_numbers<[1], [0], [0], [1], [0, 0, 1, 1], [], []>} : vector<64x128xbf16>, vector<128x128xbf16>, vector<64x128xf32> -> vector<64x128xf32>
    %c0_3 = arith.constant 0 : index
    %c0_4 = arith.constant 0 : index
    %3 = vector.load %arg3[%c0_3, %c0_4] : memref<1x128xf32, #tpu.memory_space<vmem>>, vector<1x128xf32>
    %4 = vector.broadcast %3 : vector<1x128xf32> to vector<64x128xf32>
    %5 = arith.addf %2, %4 : vector<64x128xf32>
    %6 = arith.truncf %5 : vector<64x128xf32> to vector<64x128xbf16>
    %c0_5 = arith.constant 0 : index
    %c0_6 = arith.constant 0 : index
    %7 = vector.load %arg4[%c0_5, %c0_6] : memref<64x128xbf16, #tpu.memory_space<vmem>>, vector<64x128xbf16>
    tpu.vector_store %arg4[%c0_5, %c0_6], %6 {strides = array<i32>} : memref<64x128xbf16, #tpu.memory_space<vmem>>, vector<64x128xbf16>,
    return
  }
  func.func @transform_0(%arg0: i32) -> (i32, i32) {
    %c0_i32 = arith.constant 0 : i32
    %c0_i32_0 = arith.constant 0 : i32
    return %arg0, %c0_i32 : i32, i32
  }
  func.func @transform_1(%arg0: i32) -> (i32, i32) {
    %c0_i32 = arith.constant 0 : i32
    %c0_i32_0 = arith.constant 0 : i32
    %c0_i32_1 = arith.constant 0 : i32
    return %c0_i32, %c0_i32_0 : i32, i32
  }
  func.func @transform_2(%arg0: i32) -> (i32, i32) {
    %c0_i32 = arith.constant 0 : i32
    %c0_i32_0 = arith.constant 0 : i32
    %c0_i32_1 = arith.constant 0 : i32
    return %c0_i32, %c0_i32_0 : i32, i32
  }
  func.func @transform_3(%arg0: i32) -> (i32, i32) {
    %c0_i32 = arith.constant 0 : i32
    %c0_i32_0 = arith.constant 0 : i32
    return %arg0, %c0_i32 : i32, i32
  }
}

module attributes {stable_mosaic.version = 11 : i64} {
  func.func @_mm_bias_kernel(%arg0: i32, %arg1: memref<64x128xbf16, #tpu.memory_space<vmem>>, %arg2: memref<128x128xbf16, #tpu.memory_space<vmem>>, %arg3: memref<1x128xf32, #tpu.memory_space<vmem>>, %arg4: memref<64x128xbf16, #tpu.memory_space<vmem>>) attributes {dimension_semantics = [#tpu.dimension_semantics<parallel>], iteration_bounds = array<i64: 2>, scalar_prefetch = 0 : i64, scratch_operands = 0 : i64, tpu.core_type = #tpu.core_type<tc>, window_params = [{transform_indices = @transform_0, window_bounds = array<i64: 64, 128>}, {pipeline_mode = #tpu.pipeline_mode<synchronous>, transform_indices = @transform_1, window_bounds = array<i64: 128, 128>}, {pipeline_mode = #tpu.pipeline_mode<synchronous>, transform_indices = @transform_2, window_bounds = array<i64: 1, 128>}, {transform_indices = @transform_3, window_bounds = array<i64: 64, 128>}]} {
    %c0 = arith.constant 0 : index
    %c0_0 = arith.constant 0 : index
    %0 = vector.load %arg1[%c0, %c0_0] : memref<64x128xbf16, #tpu.memory_space<vmem>>, vector<64x128xbf16>
    %c0_1 = arith.constant 0 : index
    %c0_2 = arith.constant 0 : index
    %1 = vector.load %arg2[%c0_1, %c0_2] : memref<128x128xbf16, #tpu.memory_space<vmem>>, vector<128x128xbf16>
    %cst = arith.constant dense<0.000000e+00> : vector<64x128xf32>
    %2 = tpu.matmul %0, %1, %cst {dimension_numbers = #tpu.dot_dimension_numbers<[1], [0], [0], [1], [0, 0, 1, 1], [], []>} : vector<64x128xbf16>, vector<128x128xbf16>, vector<64x128xf32> -> vector<64x128xf32>
    %c0_3 = arith.constant 0 : index
    %c0_4 = arith.constant 0 : index
    %3 = vector.load %arg3[%c0_3, %c0_4] : memref<1x128xf32, #tpu.memory_space<vmem>>, vector<1x128xf32>
    %4 = vector.broadcast %3 : vector<1x128xf32> to vector<64x128xf32>
    %5 = arith.addf %2, %4 : vector<64x128xf32>
    %6 = arith.truncf %5 : vector<64x128xf32> to vector<64x128xbf16>
    %c0_5 = arith.constant 0 : index
    %c0_6 = arith.constant 0 : index
    %7 = vector.load %arg4[%c0_5, %c0_6] : memref<64x128xbf16, #tpu.memory_space<vmem>>, vector<64x128xbf16>
    tpu.vector_store %arg4[%c0_5, %c0_6], %6 {strides = array<i32>} : memref<64x128xbf16, #tpu.memory_space<vmem>>, vector<64x128xbf16>,
    return
  }
  func.func @transform_0(%arg0: i32) -> (i32, i32) {
    %c0_i32 = arith.constant 0 : i32
    %c0_i32_0 = arith.constant 0 : i32
    return %arg0, %c0_i32 : i32, i32
  }
  func.func @transform_1(%arg0: i32) -> (i32, i32) {
    %c0_i32 = arith.constant 0 : i32
    %c0_i32_0 = arith.constant 0 : i32
    %c0_i32_1 = arith.constant 0 : i32
    return %c0_i32, %c0_i32_0 : i32, i32
  }
  func.func @transform_2(%arg0: i32) -> (i32, i32) {
    %c0_i32 = arith.constant 0 : i32
    %c0_i32_0 = arith.constant 0 : i32
    %c0_i32_1 = arith.constant 0 : i32
    return %c0_i32, %c0_i32_0 : i32, i32
  }
  func.func @transform_3(%arg0: i32) -> (i32, i32) {
    %c0_i32 = arith.constant 0 : i32
    %c0_i32_0 = arith.constant 0 : i32
    return %arg0, %c0_i32 : i32, i32
  }
}

module attributes {stable_mosaic.version = 11 : i64} {
  func.func @_mm_bias_kernel(%arg0: i32, %arg1: memref<16x128xbf16, #tpu.memory_space<vmem>>, %arg2: memref<128x128xbf16, #tpu.memory_space<vmem>>, %arg3: memref<1x128xf32, #tpu.memory_space<vmem>>, %arg4: memref<16x128xbf16, #tpu.memory_space<vmem>>) attributes {dimension_semantics = [#tpu.dimension_semantics<parallel>], iteration_bounds = array<i64: 2>, scalar_prefetch = 0 : i64, scratch_operands = 0 : i64, tpu.core_type = #tpu.core_type<tc>, window_params = [{transform_indices = @transform_0, window_bounds = array<i64: 16, 128>}, {pipeline_mode = #tpu.pipeline_mode<synchronous>, transform_indices = @transform_1, window_bounds = array<i64: 128, 128>}, {pipeline_mode = #tpu.pipeline_mode<synchronous>, transform_indices = @transform_2, window_bounds = array<i64: 1, 128>}, {transform_indices = @transform_3, window_bounds = array<i64: 16, 128>}]} {
    %c0 = arith.constant 0 : index
    %c0_0 = arith.constant 0 : index
    %0 = vector.load %arg1[%c0, %c0_0] : memref<16x128xbf16, #tpu.memory_space<vmem>>, vector<16x128xbf16>
    %c0_1 = arith.constant 0 : index
    %c0_2 = arith.constant 0 : index
    %1 = vector.load %arg2[%c0_1, %c0_2] : memref<128x128xbf16, #tpu.memory_space<vmem>>, vector<128x128xbf16>
    %cst = arith.constant dense<0.000000e+00> : vector<16x128xf32>
    %2 = tpu.matmul %0, %1, %cst {dimension_numbers = #tpu.dot_dimension_numbers<[1], [0], [0], [1], [0, 0, 1, 1], [], []>} : vector<16x128xbf16>, vector<128x128xbf16>, vector<16x128xf32> -> vector<16x128xf32>
    %c0_3 = arith.constant 0 : index
    %c0_4 = arith.constant 0 : index
    %3 = vector.load %arg3[%c0_3, %c0_4] : memref<1x128xf32, #tpu.memory_space<vmem>>, vector<1x128xf32>
    %4 = vector.broadcast %3 : vector<1x128xf32> to vector<16x128xf32>
    %5 = arith.addf %2, %4 : vector<16x128xf32>
    %6 = arith.truncf %5 : vector<16x128xf32> to vector<16x128xbf16>
    %c0_5 = arith.constant 0 : index
    %c0_6 = arith.constant 0 : index
    %7 = vector.load %arg4[%c0_5, %c0_6] : memref<16x128xbf16, #tpu.memory_space<vmem>>, vector<16x128xbf16>
    tpu.vector_store %arg4[%c0_5, %c0_6], %6 {strides = array<i32>} : memref<16x128xbf16, #tpu.memory_space<vmem>>, vector<16x128xbf16>,
    return
  }
  func.func @transform_0(%arg0: i32) -> (i32, i32) {
    %c0_i32 = arith.constant 0 : i32
    %c0_i32_0 = arith.constant 0 : i32
    return %arg0, %c0_i32 : i32, i32
  }
  func.func @transform_1(%arg0: i32) -> (i32, i32) {
    %c0_i32 = arith.constant 0 : i32
    %c0_i32_0 = arith.constant 0 : i32
    %c0_i32_1 = arith.constant 0 : i32
    return %c0_i32, %c0_i32_0 : i32, i32
  }
  func.func @transform_2(%arg0: i32) -> (i32, i32) {
    %c0_i32 = arith.constant 0 : i32
    %c0_i32_0 = arith.constant 0 : i32
    %c0_i32_1 = arith.constant 0 : i32
    return %c0_i32, %c0_i32_0 : i32, i32
  }
  func.func @transform_3(%arg0: i32) -> (i32, i32) {
    %c0_i32 = arith.constant 0 : i32
    %c0_i32_0 = arith.constant 0 : i32
    return %arg0, %c0_i32 : i32, i32
  }
}

module attributes {stable_mosaic.version = 11 : i64} {
  func.func @_mm_bias_kernel(%arg0: i32, %arg1: memref<16x256xbf16, #tpu.memory_space<vmem>>, %arg2: memref<256x128xbf16, #tpu.memory_space<vmem>>, %arg3: memref<1x128xf32, #tpu.memory_space<vmem>>, %arg4: memref<16x128xbf16, #tpu.memory_space<vmem>>) attributes {dimension_semantics = [#tpu.dimension_semantics<parallel>], iteration_bounds = array<i64: 2>, scalar_prefetch = 0 : i64, scratch_operands = 0 : i64, tpu.core_type = #tpu.core_type<tc>, window_params = [{transform_indices = @transform_0, window_bounds = array<i64: 16, 256>}, {pipeline_mode = #tpu.pipeline_mode<synchronous>, transform_indices = @transform_1, window_bounds = array<i64: 256, 128>}, {pipeline_mode = #tpu.pipeline_mode<synchronous>, transform_indices = @transform_2, window_bounds = array<i64: 1, 128>}, {transform_indices = @transform_3, window_bounds = array<i64: 16, 128>}]} {
    %c0 = arith.constant 0 : index
    %c0_0 = arith.constant 0 : index
    %0 = vector.load %arg1[%c0, %c0_0] : memref<16x256xbf16, #tpu.memory_space<vmem>>, vector<16x256xbf16>
    %c0_1 = arith.constant 0 : index
    %c0_2 = arith.constant 0 : index
    %1 = vector.load %arg2[%c0_1, %c0_2] : memref<256x128xbf16, #tpu.memory_space<vmem>>, vector<256x128xbf16>
    %cst = arith.constant dense<0.000000e+00> : vector<16x128xf32>
    %2 = tpu.matmul %0, %1, %cst {dimension_numbers = #tpu.dot_dimension_numbers<[1], [0], [0], [1], [0, 0, 1, 1], [], []>} : vector<16x256xbf16>, vector<256x128xbf16>, vector<16x128xf32> -> vector<16x128xf32>
    %c0_3 = arith.constant 0 : index
    %c0_4 = arith.constant 0 : index
    %3 = vector.load %arg3[%c0_3, %c0_4] : memref<1x128xf32, #tpu.memory_space<vmem>>, vector<1x128xf32>
    %4 = vector.broadcast %3 : vector<1x128xf32> to vector<16x128xf32>
    %5 = arith.addf %2, %4 : vector<16x128xf32>
    %6 = arith.truncf %5 : vector<16x128xf32> to vector<16x128xbf16>
    %c0_5 = arith.constant 0 : index
    %c0_6 = arith.constant 0 : index
    %7 = vector.load %arg4[%c0_5, %c0_6] : memref<16x128xbf16, #tpu.memory_space<vmem>>, vector<16x128xbf16>
    tpu.vector_store %arg4[%c0_5, %c0_6], %6 {strides = array<i32>} : memref<16x128xbf16, #tpu.memory_space<vmem>>, vector<16x128xbf16>,
    return
  }
  func.func @transform_0(%arg0: i32) -> (i32, i32) {
    %c0_i32 = arith.constant 0 : i32
    %c0_i32_0 = arith.constant 0 : i32
    return %arg0, %c0_i32 : i32, i32
  }
  func.func @transform_1(%arg0: i32) -> (i32, i32) {
    %c0_i32 = arith.constant 0 : i32
    %c0_i32_0 = arith.constant 0 : i32
    %c0_i32_1 = arith.constant 0 : i32
    return %c0_i32, %c0_i32_0 : i32, i32
  }
  func.func @transform_2(%arg0: i32) -> (i32, i32) {
    %c0_i32 = arith.constant 0 : i32
    %c0_i32_0 = arith.constant 0 : i32
    %c0_i32_1 = arith.constant 0 : i32
    return %c0_i32, %c0_i32_0 : i32, i32
  }
  func.func @transform_3(%arg0: i32) -> (i32, i32) {
    %c0_i32 = arith.constant 0 : i32
    %c0_i32_0 = arith.constant 0 : i32
    return %arg0, %c0_i32 : i32, i32
  }
}

module attributes {stable_mosaic.version = 11 : i64} {
  func.func @_mm_bias_kernel(%arg0: i32, %arg1: memref<16x128xbf16, #tpu.memory_space<vmem>>, %arg2: memref<128x128xbf16, #tpu.memory_space<vmem>>, %arg3: memref<1x128xf32, #tpu.memory_space<vmem>>, %arg4: memref<16x128xbf16, #tpu.memory_space<vmem>>) attributes {dimension_semantics = [#tpu.dimension_semantics<parallel>], iteration_bounds = array<i64: 2>, scalar_prefetch = 0 : i64, scratch_operands = 0 : i64, tpu.core_type = #tpu.core_type<tc>, window_params = [{transform_indices = @transform_0, window_bounds = array<i64: 16, 128>}, {pipeline_mode = #tpu.pipeline_mode<synchronous>, transform_indices = @transform_1, window_bounds = array<i64: 128, 128>}, {pipeline_mode = #tpu.pipeline_mode<synchronous>, transform_indices = @transform_2, window_bounds = array<i64: 1, 128>}, {transform_indices = @transform_3, window_bounds = array<i64: 16, 128>}]} {
    %c0 = arith.constant 0 : index
    %c0_0 = arith.constant 0 : index
    %0 = vector.load %arg1[%c0, %c0_0] : memref<16x128xbf16, #tpu.memory_space<vmem>>, vector<16x128xbf16>
    %c0_1 = arith.constant 0 : index
    %c0_2 = arith.constant 0 : index
    %1 = vector.load %arg2[%c0_1, %c0_2] : memref<128x128xbf16, #tpu.memory_space<vmem>>, vector<128x128xbf16>
    %cst = arith.constant dense<0.000000e+00> : vector<16x128xf32>
    %2 = tpu.matmul %0, %1, %cst {dimension_numbers = #tpu.dot_dimension_numbers<[1], [0], [0], [1], [0, 0, 1, 1], [], []>} : vector<16x128xbf16>, vector<128x128xbf16>, vector<16x128xf32> -> vector<16x128xf32>
    %c0_3 = arith.constant 0 : index
    %c0_4 = arith.constant 0 : index
    %3 = vector.load %arg3[%c0_3, %c0_4] : memref<1x128xf32, #tpu.memory_space<vmem>>, vector<1x128xf32>
    %4 = vector.broadcast %3 : vector<1x128xf32> to vector<16x128xf32>
    %5 = arith.addf %2, %4 : vector<16x128xf32>
    %6 = arith.truncf %5 : vector<16x128xf32> to vector<16x128xbf16>
    %c0_5 = arith.constant 0 : index
    %c0_6 = arith.constant 0 : index
    %7 = vector.load %arg4[%c0_5, %c0_6] : memref<16x128xbf16, #tpu.memory_space<vmem>>, vector<16x128xbf16>
    tpu.vector_store %arg4[%c0_5, %c0_6], %6 {strides = array<i32>} : memref<16x128xbf16, #tpu.memory_space<vmem>>, vector<16x128xbf16>,
    return
  }
  func.func @transform_0(%arg0: i32) -> (i32, i32) {
    %c0_i32 = arith.constant 0 : i32
    %c0_i32_0 = arith.constant 0 : i32
    return %arg0, %c0_i32 : i32, i32
  }
  func.func @transform_1(%arg0: i32) -> (i32, i32) {
    %c0_i32 = arith.constant 0 : i32
    %c0_i32_0 = arith.constant 0 : i32
    %c0_i32_1 = arith.constant 0 : i32
    return %c0_i32, %c0_i32_0 : i32, i32
  }
  func.func @transform_2(%arg0: i32) -> (i32, i32) {
    %c0_i32 = arith.constant 0 : i32
    %c0_i32_0 = arith.constant 0 : i32
    %c0_i32_1 = arith.constant 0 : i32
    return %c0_i32, %c0_i32_0 : i32, i32
  }
  func.func @transform_3(%arg0: i32) -> (i32, i32) {
    %c0_i32 = arith.constant 0 : i32
    %c0_i32_0 = arith.constant 0 : i32
    return %arg0, %c0_i32 : i32, i32
  }
}

module attributes {stable_mosaic.version = 11 : i64} {
  func.func @_mm_bias_kernel(%arg0: i32, %arg1: memref<16x128xbf16, #tpu.memory_space<vmem>>, %arg2: memref<128x128xbf16, #tpu.memory_space<vmem>>, %arg3: memref<1x128xf32, #tpu.memory_space<vmem>>, %arg4: memref<16x128xbf16, #tpu.memory_space<vmem>>) attributes {dimension_semantics = [#tpu.dimension_semantics<parallel>], iteration_bounds = array<i64: 1>, scalar_prefetch = 0 : i64, scratch_operands = 0 : i64, tpu.core_type = #tpu.core_type<tc>, window_params = [{transform_indices = @transform_0, window_bounds = array<i64: 16, 128>}, {pipeline_mode = #tpu.pipeline_mode<synchronous>, transform_indices = @transform_1, window_bounds = array<i64: 128, 128>}, {pipeline_mode = #tpu.pipeline_mode<synchronous>, transform_indices = @transform_2, window_bounds = array<i64: 1, 128>}, {transform_indices = @transform_3, window_bounds = array<i64: 16, 128>}]} {
    %c0 = arith.constant 0 : index
    %c0_0 = arith.constant 0 : index
    %0 = vector.load %arg1[%c0, %c0_0] : memref<16x128xbf16, #tpu.memory_space<vmem>>, vector<16x128xbf16>
    %c0_1 = arith.constant 0 : index
    %c0_2 = arith.constant 0 : index
    %1 = vector.load %arg2[%c0_1, %c0_2] : memref<128x128xbf16, #tpu.memory_space<vmem>>, vector<128x128xbf16>
    %cst = arith.constant dense<0.000000e+00> : vector<16x128xf32>
    %2 = tpu.matmul %0, %1, %cst {dimension_numbers = #tpu.dot_dimension_numbers<[1], [0], [0], [1], [0, 0, 1, 1], [], []>} : vector<16x128xbf16>, vector<128x128xbf16>, vector<16x128xf32> -> vector<16x128xf32>
    %c0_3 = arith.constant 0 : index
    %c0_4 = arith.constant 0 : index
    %3 = vector.load %arg3[%c0_3, %c0_4] : memref<1x128xf32, #tpu.memory_space<vmem>>, vector<1x128xf32>
    %4 = vector.broadcast %3 : vector<1x128xf32> to vector<16x128xf32>
    %5 = arith.addf %2, %4 : vector<16x128xf32>
    %6 = arith.truncf %5 : vector<16x128xf32> to vector<16x128xbf16>
    %c0_5 = arith.constant 0 : index
    %c0_6 = arith.constant 0 : index
    %7 = vector.load %arg4[%c0_5, %c0_6] : memref<16x128xbf16, #tpu.memory_space<vmem>>, vector<16x128xbf16>
    tpu.vector_store %arg4[%c0_5, %c0_6], %6 {strides = array<i32>} : memref<16x128xbf16, #tpu.memory_space<vmem>>, vector<16x128xbf16>,
    return
  }
  func.func @transform_0(%arg0: i32) -> (i32, i32) {
    %c0_i32 = arith.constant 0 : i32
    %c0_i32_0 = arith.constant 0 : i32
    return %arg0, %c0_i32 : i32, i32
  }
  func.func @transform_1(%arg0: i32) -> (i32, i32) {
    %c0_i32 = arith.constant 0 : i32
    %c0_i32_0 = arith.constant 0 : i32
    %c0_i32_1 = arith.constant 0 : i32
    return %c0_i32, %c0_i32_0 : i32, i32
  }
  func.func @transform_2(%arg0: i32) -> (i32, i32) {
    %c0_i32 = arith.constant 0 : i32
    %c0_i32_0 = arith.constant 0 : i32
    %c0_i32_1 = arith.constant 0 : i32
    return %c0_i32, %c0_i32_0 : i32, i32
  }
  func.func @transform_3(%arg0: i32) -> (i32, i32) {
    %c0_i32 = arith.constant 0 : i32
    %c0_i32_0 = arith.constant 0 : i32
    return %arg0, %c0_i32 : i32, i32
  }
}

module attributes {stable_mosaic.version = 11 : i64} {
  func.func @_mm_bias_kernel(%arg0: i32, %arg1: memref<16x256xbf16, #tpu.memory_space<vmem>>, %arg2: memref<256x128xbf16, #tpu.memory_space<vmem>>, %arg3: memref<1x128xf32, #tpu.memory_space<vmem>>, %arg4: memref<16x128xbf16, #tpu.memory_space<vmem>>) attributes {dimension_semantics = [#tpu.dimension_semantics<parallel>], iteration_bounds = array<i64: 1>, scalar_prefetch = 0 : i64, scratch_operands = 0 : i64, tpu.core_type = #tpu.core_type<tc>, window_params = [{transform_indices = @transform_0, window_bounds = array<i64: 16, 256>}, {pipeline_mode = #tpu.pipeline_mode<synchronous>, transform_indices = @transform_1, window_bounds = array<i64: 256, 128>}, {pipeline_mode = #tpu.pipeline_mode<synchronous>, transform_indices = @transform_2, window_bounds = array<i64: 1, 128>}, {transform_indices = @transform_3, window_bounds = array<i64: 16, 128>}]} {
    %c0 = arith.constant 0 : index
    %c0_0 = arith.constant 0 : index
    %0 = vector.load %arg1[%c0, %c0_0] : memref<16x256xbf16, #tpu.memory_space<vmem>>, vector<16x256xbf16>
    %c0_1 = arith.constant 0 : index
    %c0_2 = arith.constant 0 : index
    %1 = vector.load %arg2[%c0_1, %c0_2] : memref<256x128xbf16, #tpu.memory_space<vmem>>, vector<256x128xbf16>
    %cst = arith.constant dense<0.000000e+00> : vector<16x128xf32>
    %2 = tpu.matmul %0, %1, %cst {dimension_numbers = #tpu.dot_dimension_numbers<[1], [0], [0], [1], [0, 0, 1, 1], [], []>} : vector<16x256xbf16>, vector<256x128xbf16>, vector<16x128xf32> -> vector<16x128xf32>
    %c0_3 = arith.constant 0 : index
    %c0_4 = arith.constant 0 : index
    %3 = vector.load %arg3[%c0_3, %c0_4] : memref<1x128xf32, #tpu.memory_space<vmem>>, vector<1x128xf32>
    %4 = vector.broadcast %3 : vector<1x128xf32> to vector<16x128xf32>
    %5 = arith.addf %2, %4 : vector<16x128xf32>
    %6 = arith.truncf %5 : vector<16x128xf32> to vector<16x128xbf16>
    %c0_5 = arith.constant 0 : index
    %c0_6 = arith.constant 0 : index
    %7 = vector.load %arg4[%c0_5, %c0_6] : memref<16x128xbf16, #tpu.memory_space<vmem>>, vector<16x128xbf16>
    tpu.vector_store %arg4[%c0_5, %c0_6], %6 {strides = array<i32>} : memref<16x128xbf16, #tpu.memory_space<vmem>>, vector<16x128xbf16>,
    return
  }
  func.func @transform_0(%arg0: i32) -> (i32, i32) {
    %c0_i32 = arith.constant 0 : i32
    %c0_i32_0 = arith.constant 0 : i32
    return %arg0, %c0_i32 : i32, i32
  }
  func.func @transform_1(%arg0: i32) -> (i32, i32) {
    %c0_i32 = arith.constant 0 : i32
    %c0_i32_0 = arith.constant 0 : i32
    %c0_i32_1 = arith.constant 0 : i32
    return %c0_i32, %c0_i32_0 : i32, i32
  }
  func.func @transform_2(%arg0: i32) -> (i32, i32) {
    %c0_i32 = arith.constant 0 : i32
    %c0_i32_0 = arith.constant 0 : i32
    %c0_i32_1 = arith.constant 0 : i32
    return %c0_i32, %c0_i32_0 : i32, i32
  }
  func.func @transform_3(%arg0: i32) -> (i32, i32) {
    %c0_i32 = arith.constant 0 : i32
    %c0_i32_0 = arith.constant 0 : i32
    return %arg0, %c0_i32 : i32, i32
  }
}

module attributes {stable_mosaic.version = 11 : i64} {
  func.func @_mm_bias_kernel(%arg0: i32, %arg1: memref<16x384xbf16, #tpu.memory_space<vmem>>, %arg2: memref<384x256xbf16, #tpu.memory_space<vmem>>, %arg3: memref<1x256xf32, #tpu.memory_space<vmem>>, %arg4: memref<16x256xbf16, #tpu.memory_space<vmem>>) attributes {dimension_semantics = [#tpu.dimension_semantics<parallel>], iteration_bounds = array<i64: 1>, scalar_prefetch = 0 : i64, scratch_operands = 0 : i64, tpu.core_type = #tpu.core_type<tc>, window_params = [{transform_indices = @transform_0, window_bounds = array<i64: 16, 384>}, {pipeline_mode = #tpu.pipeline_mode<synchronous>, transform_indices = @transform_1, window_bounds = array<i64: 384, 256>}, {pipeline_mode = #tpu.pipeline_mode<synchronous>, transform_indices = @transform_2, window_bounds = array<i64: 1, 256>}, {transform_indices = @transform_3, window_bounds = array<i64: 16, 256>}]} {
    %c0 = arith.constant 0 : index
    %c0_0 = arith.constant 0 : index
    %0 = vector.load %arg1[%c0, %c0_0] : memref<16x384xbf16, #tpu.memory_space<vmem>>, vector<16x384xbf16>
    %c0_1 = arith.constant 0 : index
    %c0_2 = arith.constant 0 : index
    %1 = vector.load %arg2[%c0_1, %c0_2] : memref<384x256xbf16, #tpu.memory_space<vmem>>, vector<384x256xbf16>
    %cst = arith.constant dense<0.000000e+00> : vector<16x256xf32>
    %2 = tpu.matmul %0, %1, %cst {dimension_numbers = #tpu.dot_dimension_numbers<[1], [0], [0], [1], [0, 0, 1, 1], [], []>} : vector<16x384xbf16>, vector<384x256xbf16>, vector<16x256xf32> -> vector<16x256xf32>
    %c0_3 = arith.constant 0 : index
    %c0_4 = arith.constant 0 : index
    %3 = vector.load %arg3[%c0_3, %c0_4] : memref<1x256xf32, #tpu.memory_space<vmem>>, vector<1x256xf32>
    %4 = vector.broadcast %3 : vector<1x256xf32> to vector<16x256xf32>
    %5 = arith.addf %2, %4 : vector<16x256xf32>
    %6 = arith.truncf %5 : vector<16x256xf32> to vector<16x256xbf16>
    %c0_5 = arith.constant 0 : index
    %c0_6 = arith.constant 0 : index
    %7 = vector.load %arg4[%c0_5, %c0_6] : memref<16x256xbf16, #tpu.memory_space<vmem>>, vector<16x256xbf16>
    tpu.vector_store %arg4[%c0_5, %c0_6], %6 {strides = array<i32>} : memref<16x256xbf16, #tpu.memory_space<vmem>>, vector<16x256xbf16>,
    return
  }
  func.func @transform_0(%arg0: i32) -> (i32, i32) {
    %c0_i32 = arith.constant 0 : i32
    %c0_i32_0 = arith.constant 0 : i32
    return %arg0, %c0_i32 : i32, i32
  }
  func.func @transform_1(%arg0: i32) -> (i32, i32) {
    %c0_i32 = arith.constant 0 : i32
    %c0_i32_0 = arith.constant 0 : i32
    %c0_i32_1 = arith.constant 0 : i32
    return %c0_i32, %c0_i32_0 : i32, i32
  }
  func.func @transform_2(%arg0: i32) -> (i32, i32) {
    %c0_i32 = arith.constant 0 : i32
    %c0_i32_0 = arith.constant 0 : i32
    %c0_i32_1 = arith.constant 0 : i32
    return %c0_i32, %c0_i32_0 : i32, i32
  }
  func.func @transform_3(%arg0: i32) -> (i32, i32) {
    %c0_i32 = arith.constant 0 : i32
    %c0_i32_0 = arith.constant 0 : i32
    return %arg0, %c0_i32 : i32, i32
  }
}

module attributes {stable_mosaic.version = 11 : i64} {
  func.func @_mm_bias_kernel(%arg0: i32, %arg1: memref<16x256xbf16, #tpu.memory_space<vmem>>, %arg2: memref<256x128xbf16, #tpu.memory_space<vmem>>, %arg3: memref<1x128xf32, #tpu.memory_space<vmem>>, %arg4: memref<16x128xbf16, #tpu.memory_space<vmem>>) attributes {dimension_semantics = [#tpu.dimension_semantics<parallel>], iteration_bounds = array<i64: 1>, scalar_prefetch = 0 : i64, scratch_operands = 0 : i64, tpu.core_type = #tpu.core_type<tc>, window_params = [{transform_indices = @transform_0, window_bounds = array<i64: 16, 256>}, {pipeline_mode = #tpu.pipeline_mode<synchronous>, transform_indices = @transform_1, window_bounds = array<i64: 256, 128>}, {pipeline_mode = #tpu.pipeline_mode<synchronous>, transform_indices = @transform_2, window_bounds = array<i64: 1, 128>}, {transform_indices = @transform_3, window_bounds = array<i64: 16, 128>}]} {
    %c0 = arith.constant 0 : index
    %c0_0 = arith.constant 0 : index
    %0 = vector.load %arg1[%c0, %c0_0] : memref<16x256xbf16, #tpu.memory_space<vmem>>, vector<16x256xbf16>
    %c0_1 = arith.constant 0 : index
    %c0_2 = arith.constant 0 : index
    %1 = vector.load %arg2[%c0_1, %c0_2] : memref<256x128xbf16, #tpu.memory_space<vmem>>, vector<256x128xbf16>
    %cst = arith.constant dense<0.000000e+00> : vector<16x128xf32>
    %2 = tpu.matmul %0, %1, %cst {dimension_numbers = #tpu.dot_dimension_numbers<[1], [0], [0], [1], [0, 0, 1, 1], [], []>} : vector<16x256xbf16>, vector<256x128xbf16>, vector<16x128xf32> -> vector<16x128xf32>
    %c0_3 = arith.constant 0 : index
    %c0_4 = arith.constant 0 : index
    %3 = vector.load %arg3[%c0_3, %c0_4] : memref<1x128xf32, #tpu.memory_space<vmem>>, vector<1x128xf32>
    %4 = vector.broadcast %3 : vector<1x128xf32> to vector<16x128xf32>
    %5 = arith.addf %2, %4 : vector<16x128xf32>
    %6 = arith.truncf %5 : vector<16x128xf32> to vector<16x128xbf16>
    %c0_5 = arith.constant 0 : index
    %c0_6 = arith.constant 0 : index
    %7 = vector.load %arg4[%c0_5, %c0_6] : memref<16x128xbf16, #tpu.memory_space<vmem>>, vector<16x128xbf16>
    tpu.vector_store %arg4[%c0_5, %c0_6], %6 {strides = array<i32>} : memref<16x128xbf16, #tpu.memory_space<vmem>>, vector<16x128xbf16>,
    return
  }
  func.func @transform_0(%arg0: i32) -> (i32, i32) {
    %c0_i32 = arith.constant 0 : i32
    %c0_i32_0 = arith.constant 0 : i32
    return %arg0, %c0_i32 : i32, i32
  }
  func.func @transform_1(%arg0: i32) -> (i32, i32) {
    %c0_i32 = arith.constant 0 : i32
    %c0_i32_0 = arith.constant 0 : i32
    %c0_i32_1 = arith.constant 0 : i32
    return %c0_i32, %c0_i32_0 : i32, i32
  }
  func.func @transform_2(%arg0: i32) -> (i32, i32) {
    %c0_i32 = arith.constant 0 : i32
    %c0_i32_0 = arith.constant 0 : i32
    %c0_i32_1 = arith.constant 0 : i32
    return %c0_i32, %c0_i32_0 : i32, i32
  }
  func.func @transform_3(%arg0: i32) -> (i32, i32) {
    %c0_i32 = arith.constant 0 : i32
    %c0_i32_0 = arith.constant 0 : i32
    return %arg0, %c0_i32 : i32, i32
  }
}

module attributes {stable_mosaic.version = 11 : i64} {
  func.func @_mm_bias_kernel(%arg0: i32, %arg1: memref<16x512xbf16, #tpu.memory_space<vmem>>, %arg2: memref<512x128xbf16, #tpu.memory_space<vmem>>, %arg3: memref<1x128xf32, #tpu.memory_space<vmem>>, %arg4: memref<16x128xbf16, #tpu.memory_space<vmem>>) attributes {dimension_semantics = [#tpu.dimension_semantics<parallel>], iteration_bounds = array<i64: 1>, scalar_prefetch = 0 : i64, scratch_operands = 0 : i64, tpu.core_type = #tpu.core_type<tc>, window_params = [{transform_indices = @transform_0, window_bounds = array<i64: 16, 512>}, {pipeline_mode = #tpu.pipeline_mode<synchronous>, transform_indices = @transform_1, window_bounds = array<i64: 512, 128>}, {pipeline_mode = #tpu.pipeline_mode<synchronous>, transform_indices = @transform_2, window_bounds = array<i64: 1, 128>}, {transform_indices = @transform_3, window_bounds = array<i64: 16, 128>}]} {
    %c0 = arith.constant 0 : index
    %c0_0 = arith.constant 0 : index
    %0 = vector.load %arg1[%c0, %c0_0] : memref<16x512xbf16, #tpu.memory_space<vmem>>, vector<16x512xbf16>
    %c0_1 = arith.constant 0 : index
    %c0_2 = arith.constant 0 : index
    %1 = vector.load %arg2[%c0_1, %c0_2] : memref<512x128xbf16, #tpu.memory_space<vmem>>, vector<512x128xbf16>
    %cst = arith.constant dense<0.000000e+00> : vector<16x128xf32>
    %2 = tpu.matmul %0, %1, %cst {dimension_numbers = #tpu.dot_dimension_numbers<[1], [0], [0], [1], [0, 0, 1, 1], [], []>} : vector<16x512xbf16>, vector<512x128xbf16>, vector<16x128xf32> -> vector<16x128xf32>
    %c0_3 = arith.constant 0 : index
    %c0_4 = arith.constant 0 : index
    %3 = vector.load %arg3[%c0_3, %c0_4] : memref<1x128xf32, #tpu.memory_space<vmem>>, vector<1x128xf32>
    %4 = vector.broadcast %3 : vector<1x128xf32> to vector<16x128xf32>
    %5 = arith.addf %2, %4 : vector<16x128xf32>
    %6 = arith.truncf %5 : vector<16x128xf32> to vector<16x128xbf16>
    %c0_5 = arith.constant 0 : index
    %c0_6 = arith.constant 0 : index
    %7 = vector.load %arg4[%c0_5, %c0_6] : memref<16x128xbf16, #tpu.memory_space<vmem>>, vector<16x128xbf16>
    tpu.vector_store %arg4[%c0_5, %c0_6], %6 {strides = array<i32>} : memref<16x128xbf16, #tpu.memory_space<vmem>>, vector<16x128xbf16>,
    return
  }
  func.func @transform_0(%arg0: i32) -> (i32, i32) {
    %c0_i32 = arith.constant 0 : i32
    %c0_i32_0 = arith.constant 0 : i32
    return %arg0, %c0_i32 : i32, i32
  }
  func.func @transform_1(%arg0: i32) -> (i32, i32) {
    %c0_i32 = arith.constant 0 : i32
    %c0_i32_0 = arith.constant 0 : i32
    %c0_i32_1 = arith.constant 0 : i32
    return %c0_i32, %c0_i32_0 : i32, i32
  }
  func.func @transform_2(%arg0: i32) -> (i32, i32) {
    %c0_i32 = arith.constant 0 : i32
    %c0_i32_0 = arith.constant 0 : i32
    %c0_i32_1 = arith.constant 0 : i32
    return %c0_i32, %c0_i32_0 : i32, i32
  }
  func.func @transform_3(%arg0: i32) -> (i32, i32) {
    %c0_i32 = arith.constant 0 : i32
    %c0_i32_0 = arith.constant 0 : i32
    return %arg0, %c0_i32 : i32, i32
  }
}

module attributes {stable_mosaic.version = 11 : i64} {
  func.func @_mm_bias_kernel(%arg0: i32, %arg1: memref<16x640xbf16, #tpu.memory_space<vmem>>, %arg2: memref<640x512xbf16, #tpu.memory_space<vmem>>, %arg3: memref<1x512xf32, #tpu.memory_space<vmem>>, %arg4: memref<16x512xbf16, #tpu.memory_space<vmem>>) attributes {dimension_semantics = [#tpu.dimension_semantics<parallel>], iteration_bounds = array<i64: 1>, scalar_prefetch = 0 : i64, scratch_operands = 0 : i64, tpu.core_type = #tpu.core_type<tc>, window_params = [{transform_indices = @transform_0, window_bounds = array<i64: 16, 640>}, {pipeline_mode = #tpu.pipeline_mode<synchronous>, transform_indices = @transform_1, window_bounds = array<i64: 640, 512>}, {pipeline_mode = #tpu.pipeline_mode<synchronous>, transform_indices = @transform_2, window_bounds = array<i64: 1, 512>}, {transform_indices = @transform_3, window_bounds = array<i64: 16, 512>}]} {
    %c0 = arith.constant 0 : index
    %c0_0 = arith.constant 0 : index
    %0 = vector.load %arg1[%c0, %c0_0] : memref<16x640xbf16, #tpu.memory_space<vmem>>, vector<16x640xbf16>
    %c0_1 = arith.constant 0 : index
    %c0_2 = arith.constant 0 : index
    %1 = vector.load %arg2[%c0_1, %c0_2] : memref<640x512xbf16, #tpu.memory_space<vmem>>, vector<640x512xbf16>
    %cst = arith.constant dense<0.000000e+00> : vector<16x512xf32>
    %2 = tpu.matmul %0, %1, %cst {dimension_numbers = #tpu.dot_dimension_numbers<[1], [0], [0], [1], [0, 0, 1, 1], [], []>} : vector<16x640xbf16>, vector<640x512xbf16>, vector<16x512xf32> -> vector<16x512xf32>
    %c0_3 = arith.constant 0 : index
    %c0_4 = arith.constant 0 : index
    %3 = vector.load %arg3[%c0_3, %c0_4] : memref<1x512xf32, #tpu.memory_space<vmem>>, vector<1x512xf32>
    %4 = vector.broadcast %3 : vector<1x512xf32> to vector<16x512xf32>
    %5 = arith.addf %2, %4 : vector<16x512xf32>
    %6 = arith.truncf %5 : vector<16x512xf32> to vector<16x512xbf16>
    %c0_5 = arith.constant 0 : index
    %c0_6 = arith.constant 0 : index
    %7 = vector.load %arg4[%c0_5, %c0_6] : memref<16x512xbf16, #tpu.memory_space<vmem>>, vector<16x512xbf16>
    tpu.vector_store %arg4[%c0_5, %c0_6], %6 {strides = array<i32>} : memref<16x512xbf16, #tpu.memory_space<vmem>>, vector<16x512xbf16>,
    return
  }
  func.func @transform_0(%arg0: i32) -> (i32, i32) {
    %c0_i32 = arith.constant 0 : i32
    %c0_i32_0 = arith.constant 0 : i32
    return %arg0, %c0_i32 : i32, i32
  }
  func.func @transform_1(%arg0: i32) -> (i32, i32) {
    %c0_i32 = arith.constant 0 : i32
    %c0_i32_0 = arith.constant 0 : i32
    %c0_i32_1 = arith.constant 0 : i32
    return %c0_i32, %c0_i32_0 : i32, i32
  }
  func.func @transform_2(%arg0: i32) -> (i32, i32) {
    %c0_i32 = arith.constant 0 : i32
    %c0_i32_0 = arith.constant 0 : i32
    %c0_i32_1 = arith.constant 0 : i32
    return %c0_i32, %c0_i32_0 : i32, i32
  }
  func.func @transform_3(%arg0: i32) -> (i32, i32) {
    %c0_i32 = arith.constant 0 : i32
    %c0_i32_0 = arith.constant 0 : i32
    return %arg0, %c0_i32 : i32, i32
  }
}

</mosaic_0001>

<bundles_post_ra>
// kernel: _forward.17
= control target key start
LH: loop header
LB: loop body
LE: loop exit
PB: predicated region body
PF: predicated region fallthrough
CT: control target
= control target key end

     0   :  { %s1232_s12 = smov 0   ;;  %s1422_s0 = inlined_call_operand.vmem [shape: bf16[512,256], index: 0, kind: input, shape index: {}]   ;;  %s1423_s1 = inlined_call_operand.vmem [shape: bf16[256,128], index: 1, kind: input, shape index: {}]   ;;  %s1424_s2 = inlined_call_operand.vmem [shape: f32[1,128], index: 2, kind: input, shape index: {}]   ;;  %s1425_s3 = inlined_call_operand.vmem [shape: bf16[512,128], index: 3, kind: output, shape index: {}]  }
   0x1 LB: > { %s831_s13 = sadd.s32 4294967295, %s1210_s12   ;;  %p835_p0 = scmp.ge.s32.totalorder %s1210_s12, 1  ;;  %s1210_s12 = sphi %s1232_s12, %s13_s12  }
   0x2   : > { %p139_p1 = scmp.lt.s32.totalorder %s1210_s12, 3 }
   0x4   : > { %p140_p2 = pnand %p835_p0, %p139_p1 }
   0x5   : > { %s836_s26 = sshll.u32 (!%p140_p2), %s831_s13, 5 }
   0x6   : > { %143 = sbr.rel (%p140_p2) target bundleno = 304 (0x130), region = 32  ;;  %p165_p3 = scmp.lt.s32.totalorder (!%p140_p2), %s836_s26, 63 }
   0xb   : > { %v1075_v0 = vld [vmem:[%s1423_s1 + $0x38] sm:$0xff]  ;;  %v1074_v2 = vld [vmem:[%s1423_s1 + $0x30] sm:$0xff]  ;;  %v1073_v4 = vld [vmem:[%s1423_s1 + $0x28] sm:$0xff]  ;;  %s1427_s26 = smov (!%p165_p3, %s836_s26), 63 }
   0xc   : > { %v1083_v1 = vld [vmem:[%s1423_s1 + $0x78] sm:$0xff]  ;;  %501 = vmatpush.bf16.msra.mxu0 %v1075_v0  ;;  %1179 = vmatpush.bf16.msra.mxu2 %v1075_v0  ;;  %v1082_v3 = vld [vmem:[%s1423_s1 + $0x70] sm:$0xff]  ;;  %v1081_v5 = vld [vmem:[%s1423_s1 + $0x68] sm:$0xff]  ;;  %s1035_s13 = sshll.u32 %s1427_s26, 3  ;;  %s840_s28 = sshll.u32 %s1427_s26, 2 }
   0xd   : > { %590 = vmatpush.bf16.msra.mxu1 %v1083_v1  ;;  %1187 = vmatpush.bf16.msra.mxu3 %v1083_v1  ;;  %v1072_v6 = vld [vmem:[%s1423_s1 + $0x20] sm:$0xff]  ;;  %v1071_v8 = vld [vmem:[%s1423_s1 + $0x18] sm:$0xff]  ;;  %v1070_v10 = vld [vmem:[%s1423_s1 + $0x10] sm:$0xff]  ;;  %s1285_s18 = scalar_lea.vmem %s1422_s0, %s1035_s13  ;;  %s1372_s4 = scalar_lea.vmem %s1425_s3, %s840_s28 }
   0xe   : > { %v1080_v7 = vld [vmem:[%s1423_s1 + $0x60] sm:$0xff]  ;;  %v1079_v9 = vld [vmem:[%s1423_s1 + $0x58] sm:$0xff]  ;;  %v1078_v11 = vld [vmem:[%s1423_s1 + $0x50] sm:$0xff] }
   0xf   : > { %v1069_v12 = vld [vmem:[%s1423_s1 + $0x8] sm:$0xff]  ;;  %v1068_v14 = vld [vmem:[%s1423_s1] sm:$0xff]  ;;  %v851_v28 = vld [vmem:[%s1285_s18 + $0x10] sm:$0xf] }
  0x10   : > { %502 = vmatpush.bf16.msra.mxu0 %v1074_v2  ;;  %1180 = vmatpush.bf16.msra.mxu2 %v1074_v2  ;;  %v1077_v13 = vld [vmem:[%s1423_s1 + $0x48] sm:$0xff]  ;;  %v1076_v15 = vld [vmem:[%s1423_s1 + $0x40] sm:$0xff]  ;;  %v1039_v29 = vld [vmem:[%s1285_s18 + $0x14] sm:$0xf0] }
  0x11   : > { %591 = vmatpush.bf16.msra.mxu1 %v1082_v3  ;;  %1188 = vmatpush.bf16.msra.mxu3 %v1082_v3  ;;  %v843_v16 = vld [vmem:[%s1285_s18] sm:$0xf]  ;;  %v1037_v17 = vld [vmem:[%s1285_s18 + $0x4] sm:$0xf0]  ;;  %v1036_v20 = vld [vmem:[%s1285_s18 + $0x4] sm:$0xf]  ;;  %v852_v36 = vor.u32 %v1039_v29, %v851_v28 }
  0x12   : > { %v907_v18 = vld [vmem:[%s1285_s18 + $0x80] sm:$0xf]  ;;  %v1053_v19 = vld [vmem:[%s1285_s18 + $0x84] sm:$0xf0]  ;;  %v845_v21 = vld [vmem:[%s1285_s18 + $0x8] sm:$0xf0]  ;;  %v844_v24 = vor.u32 %v1037_v17, %v843_v16 }
  0x13   : > { %v1052_v22 = vld [vmem:[%s1285_s18 + $0x84] sm:$0xf]  ;;  %v909_v23 = vld [vmem:[%s1285_s18 + $0x88] sm:$0xf0]  ;;  %v908_v25 = vor.u32 %v1053_v19, %v907_v18  ;;  %v848_v26 = vor.u32 %v1036_v20, %v845_v21  ;;  %v915_v30 = vld [vmem:[%s1285_s18 + $0x90] sm:$0xf] }
  0x14   : > { %503 = vmatpush.bf16.msra.mxu0 %v1073_v4  ;;  %1181 = vmatpush.bf16.msra.mxu2 %v1073_v4  ;;  %v912_v27 = vor.u32 %v1052_v22, %v909_v23  ;;  %v1055_v31 = vld [vmem:[%s1285_s18 + $0x94] sm:$0xf0]  ;;  %v1038_v32 = vld [vmem:[%s1285_s18 + $0x14] sm:$0xf]  ;;  %v853_v33 = vld [vmem:[%s1285_s18 + $0x18] sm:$0xf0] }
  0x15   : > { %592 = vmatpush.bf16.msra.mxu1 %v1081_v5  ;;  %1189 = vmatpush.bf16.msra.mxu3 %v1081_v5  ;;  %v1054_v34 = vld [vmem:[%s1285_s18 + $0x94] sm:$0xf]  ;;  %v917_v35 = vld [vmem:[%s1285_s18 + $0x98] sm:$0xf0]  ;;  %v916_v37 = vor.u32 %v1055_v31, %v915_v30  ;;  %v856_v38 = vor.u32 %v1038_v32, %v853_v33  ;;  %v859_v40 = vld [vmem:[%s1285_s18 + $0x20] sm:$0xf] }
  0x16   : > { %v920_v39 = vor.u32 %v1054_v34, %v917_v35  ;;  %v1041_v41 = vld [vmem:[%s1285_s18 + $0x24] sm:$0xf0]  ;;  %v923_v42 = vld [vmem:[%s1285_s18 + $0xa0] sm:$0xf]  ;;  %v1040_v44 = vld [vmem:[%s1285_s18 + $0x24] sm:$0xf] }
  0x17   : > { %v1057_v43 = vld [vmem:[%s1285_s18 + $0xa4] sm:$0xf0]  ;;  %v861_v45 = vld [vmem:[%s1285_s18 + $0x28] sm:$0xf0]  ;;  %v1056_v46 = vld [vmem:[%s1285_s18 + $0xa4] sm:$0xf]  ;;  %v860_v48 = vor.u32 %v1041_v41, %v859_v40 }
  0x18   : > { %504 = vmatpush.bf16.msra.mxu0 %v1072_v6  ;;  %1182 = vmatpush.bf16.msra.mxu2 %v1072_v6  ;;  %v925_v47 = vld [vmem:[%s1285_s18 + $0xa8] sm:$0xf0]  ;;  %v924_v49 = vor.u32 %v1057_v43, %v923_v42  ;;  %v864_v50 = vor.u32 %v1040_v44, %v861_v45  ;;  %v867_v52 = vld [vmem:[%s1285_s18 + $0x30] sm:$0xf]  ;;  %v1043_v53 = vld [vmem:[%s1285_s18 + $0x34] sm:$0xf0] }
  0x19   : > { %593 = vmatpush.bf16.msra.mxu1 %v1080_v7  ;;  %1190 = vmatpush.bf16.msra.mxu3 %v1080_v7  ;;  %v928_v51 = vor.u32 %v1056_v46, %v925_v47  ;;  %v931_v54 = vld [vmem:[%s1285_s18 + $0xb0] sm:$0xf]  ;;  %v1059_v55 = vld [vmem:[%s1285_s18 + $0xb4] sm:$0xf0]  ;;  %v1042_v56 = vld [vmem:[%s1285_s18 + $0x34] sm:$0xf]  ;;  %v868_v60 = vor.u32 %v1043_v53, %v867_v52 }
  0x1a   : > { %v869_v57 = vld [vmem:[%s1285_s18 + $0x38] sm:$0xf0]  ;;  %v1058_v58 = vld [vmem:[%s1285_s18 + $0xb4] sm:$0xf]  ;;  %v932_v61 = vor.u32 %v1059_v55, %v931_v54  ;;  %v875_v0 = vld [vmem:[%s1285_s18 + $0x40] sm:$0xf] }
  0x1b   : > { %v933_v59 = vld [vmem:[%s1285_s18 + $0xb8] sm:$0xf0]  ;;  %v872_v62 = vor.u32 %v1042_v56, %v869_v57  ;;  %v1045_v1 = vld [vmem:[%s1285_s18 + $0x44] sm:$0xf0]  ;;  %v939_v2 = vld [vmem:[%s1285_s18 + $0xc0] sm:$0xf] }
  0x1c   : > { %505 = vmatpush.bf16.msra.mxu0 %v1071_v8  ;;  %1183 = vmatpush.bf16.msra.mxu2 %v1071_v8  ;;  %v936_v63 = vor.u32 %v1058_v58, %v933_v59  ;;  %v1061_v3 = vld [vmem:[%s1285_s18 + $0xc4] sm:$0xf0]  ;;  %v1044_v4 = vld [vmem:[%s1285_s18 + $0x44] sm:$0xf]  ;;  %v877_v5 = vld [vmem:[%s1285_s18 + $0x48] sm:$0xf0]  ;;  %v876_v8 = vor.u32 %v1045_v1, %v875_v0 }
  0x1d   : > { %594 = vmatpush.bf16.msra.mxu1 %v1079_v9  ;;  %1191 = vmatpush.bf16.msra.mxu3 %v1079_v9  ;;  %v1060_v6 = vld [vmem:[%s1285_s18 + $0xc4] sm:$0xf]  ;;  %v941_v7 = vld [vmem:[%s1285_s18 + $0xc8] sm:$0xf0]  ;;  %v940_v9 = vor.u32 %v1061_v3, %v939_v2  ;;  %v1046_v16 = vld [vmem:[%s1285_s18 + $0x54] sm:$0xf] }
  0x1e   : > { %v885_v17 = vld [vmem:[%s1285_s18 + $0x58] sm:$0xf0]  ;;  %v1062_v18 = vld [vmem:[%s1285_s18 + $0xd4] sm:$0xf]  ;;  %v1048_v28 = vld [vmem:[%s1285_s18 + $0x64] sm:$0xf] }
  0x1f   : > { %v949_v19 = vld [vmem:[%s1285_s18 + $0xd8] sm:$0xf0]  ;;  %v888_v22 = vor.u32 %v1046_v16, %v885_v17  ;;  %v893_v29 = vld [vmem:[%s1285_s18 + $0x68] sm:$0xf0]  ;;  %v1064_v30 = vld [vmem:[%s1285_s18 + $0xe4] sm:$0xf] }
  0x20   : > { %506 = vmatpush.bf16.msra.mxu0 %v1070_v10  ;;  %1184 = vmatpush.bf16.msra.mxu2 %v1070_v10  ;;  %v880_v10 = vor.u32 %v1044_v4, %v877_v5  ;;  %v952_v23 = vor.u32 %v1062_v18, %v949_v19  ;;  %v957_v31 = vld [vmem:[%s1285_s18 + $0xe8] sm:$0xf0]  ;;  %v896_v34 = vor.u32 %v1048_v28, %v893_v29  ;;  %v1050_v40 = vld [vmem:[%s1285_s18 + $0x74] sm:$0xf]  ;;  %v901_v41 = vld [vmem:[%s1285_s18 + $0x78] sm:$0xf0] }
  0x21   : > { %595 = vmatpush.bf16.msra.mxu1 %v1078_v11  ;;  %1192 = vmatpush.bf16.msra.mxu3 %v1078_v11  ;;  %v944_v11 = vor.u32 %v1060_v6, %v941_v7  ;;  %v960_v35 = vor.u32 %v1064_v30, %v957_v31  ;;  %v1066_v42 = vld [vmem:[%s1285_s18 + $0xf4] sm:$0xf]  ;;  %v965_v43 = vld [vmem:[%s1285_s18 + $0xf8] sm:$0xf0]  ;;  %v904_v46 = vor.u32 %v1050_v40, %v901_v41 }
  0x22   : > { %v968_v47 = vor.u32 %v1066_v42, %v965_v43 }
  0x24   : > { %507 = vmatpush.bf16.msra.mxu0 %v1069_v12  ;;  %1185 = vmatpush.bf16.msra.mxu2 %v1069_v12  ;;  %v883_v12 = vld [vmem:[%s1285_s18 + $0x50] sm:$0xf] }
  0x25   : > { %596 = vmatpush.bf16.msra.mxu1 %v1077_v13  ;;  %1193 = vmatpush.bf16.msra.mxu3 %v1077_v13  ;;  %v1047_v13 = vld [vmem:[%s1285_s18 + $0x54] sm:$0xf0] }
  0x26   : > { %v884_v20 = vor.u32 %v1047_v13, %v883_v12 }
  0x28   : > { %508 = vmatpush.bf16.msra.mxu0 %v1068_v14  ;;  %1186 = vmatpush.bf16.msra.mxu2 %v1068_v14  ;;  %v947_v14 = vld [vmem:[%s1285_s18 + $0xd0] sm:$0xf] }
  0x29   : > { %597 = vmatpush.bf16.msra.mxu1 %v1076_v15  ;;  %1194 = vmatpush.bf16.msra.mxu3 %v1076_v15  ;;  %v1063_v15 = vld [vmem:[%s1285_s18 + $0xd4] sm:$0xf0] }
  0x2a   : > { %v948_v21 = vor.u32 %v1063_v15, %v947_v14 }
  0x2b   : > { %509 = vmatmul.bf16.vlgmr.msra.gmra.mxu0 %v844_v24  ;;  %549 = vmatmul.bf16.vlgmr.msra.gmra.mxu2 %v908_v25  ;;  %v891_v24 = vld [vmem:[%s1285_s18 + $0x60] sm:$0xf]  ;;  %v1049_v25 = vld [vmem:[%s1285_s18 + $0x64] sm:$0xf0] }
  0x2c   : > { %598 = vmatmul.bf16.vlgmr.msra.gmra.mxu1 %v848_v26  ;;  %638 = vmatmul.bf16.vlgmr.msra.gmra.mxu3 %v912_v27  ;;  %v955_v26 = vld [vmem:[%s1285_s18 + $0xe0] sm:$0xf]  ;;  %v1065_v27 = vld [vmem:[%s1285_s18 + $0xe4] sm:$0xf0]  ;;  %v892_v32 = vor.u32 %v1049_v25, %v891_v24 }
  0x2d   : > { %v956_v33 = vor.u32 %v1065_v27, %v955_v26 }
  0x3b   : > { %514 = vmatmul.bf16.gmra.mxu0 %v852_v36  ;;  %554 = vmatmul.bf16.gmra.mxu2 %v916_v37  ;;  %v899_v36 = vld [vmem:[%s1285_s18 + $0x70] sm:$0xf]  ;;  %v1051_v37 = vld [vmem:[%s1285_s18 + $0x74] sm:$0xf0] }
  0x3c   : > { %603 = vmatmul.bf16.gmra.mxu1 %v856_v38  ;;  %643 = vmatmul.bf16.gmra.mxu3 %v920_v39  ;;  %v963_v38 = vld [vmem:[%s1285_s18 + $0xf0] sm:$0xf]  ;;  %v1067_v39 = vld [vmem:[%s1285_s18 + $0xf4] sm:$0xf0]  ;;  %v900_v44 = vor.u32 %v1051_v37, %v899_v36 }
  0x3d   : > { %v964_v45 = vor.u32 %v1067_v39, %v963_v38 }
  0x4b   : > { %519 = vmatmul.bf16.gmra.mxu0 %v860_v48  ;;  %559 = vmatmul.bf16.gmra.mxu2 %v924_v49  ;;  %v1363_v49 = vld [vmem:[%s1424_s2] ss:$0 sm:$0xff] }
  0x4c   : > { %608 = vmatmul.bf16.gmra.mxu1 %v864_v50  ;;  %648 = vmatmul.bf16.gmra.mxu3 %v928_v51 }
  0x5b   : > { %524 = vmatmul.bf16.gmra.mxu0 %v868_v60  ;;  %564 = vmatmul.bf16.gmra.mxu2 %v932_v61 }
  0x5c   : > { %613 = vmatmul.bf16.gmra.mxu1 %v872_v62  ;;  %653 = vmatmul.bf16.gmra.mxu3 %v936_v63 }
  0x6b   : > { %529 = vmatmul.bf16.gmra.mxu0 %v876_v8  ;;  %569 = vmatmul.bf16.gmra.mxu2 %v940_v9 }
  0x6c   : > { %618 = vmatmul.bf16.gmra.mxu1 %v880_v10  ;;  %658 = vmatmul.bf16.gmra.mxu3 %v944_v11 }
  0x7b   : > { %534 = vmatmul.bf16.gmra.mxu0 %v884_v20  ;;  %574 = vmatmul.bf16.gmra.mxu2 %v948_v21 }
  0x7c   : > { %623 = vmatmul.bf16.gmra.mxu1 %v888_v22  ;;  %663 = vmatmul.bf16.gmra.mxu3 %v952_v23 }
  0x8b   : > { %539 = vmatmul.bf16.gmra.mxu0 %v892_v32  ;;  %579 = vmatmul.bf16.gmra.mxu2 %v956_v33 }
  0x8c   : > { %628 = vmatmul.bf16.gmra.mxu1 %v896_v34  ;;  %668 = vmatmul.bf16.gmra.mxu3 %v960_v35 }
  0x9b   : > { %544 = vmatmul.bf16.gmra.mxu0 %v900_v44  ;;  %584 = vmatmul.bf16.gmra.mxu2 %v964_v45 }
  0x9c   : > { %633 = vmatmul.bf16.gmra.mxu1 %v904_v46  ;;  %673 = vmatmul.bf16.gmra.mxu3 %v968_v47 }
  0xa8   : > { %v510_v48 = vpop.f32.mrf.mxu0 }
  0xa9   : > { %v599_v50 = vpop.f32.mrf.mxu1  ;;  %v511_v51 = vadd.f32 %v1363_v49, %v510_v48 }
  0xab   : > { %v600_v55 = vadd.f32 %v599_v50, %v511_v51 }
  0xad   : > { %v679_v60 = vmax.f32 %v600_v55, 0.0 }
  0xae   : > { %v550_v52 = vpop.f32.mrf.mxu2 }
  0xaf   : > { %v639_v53 = vpop.f32.mrf.mxu3  ;;  %v551_v58 = vadd.f32 %v1363_v49, %v550_v52 }
  0xb0   : > { %v512_v54 = vpop.f32.mrf.mxu0 }
  0xb1   : > { %v513_v56 = vadd.f32 %v1363_v49, %v512_v54  ;;  %v601_v57 = vpop.f32.mrf.mxu1  ;;  %v640_v63 = vadd.f32 %v639_v53, %v551_v58 }
  0xb3   : > { %v602_v59 = vadd.f32 %v601_v57, %v513_v56  ;;  %v695_v6 = vmax.f32 %v640_v63, 0.0 }
  0xb5   : > { %v680_v61 = vmax.f32 %v602_v59, 0.0 }
  0xb6   : > { %v552_v62 = vpop.f32.mrf.mxu2 }
  0xb7   : > { %v1087_v0 = vpack.c.bf16 %v680_v61, %v679_v60  ;;  %v553_v1 = vadd.f32 %v1363_v49, %v552_v62  ;;  %v641_v2 = vpop.f32.mrf.mxu3 }
  0xb8   : > { %v515_v3 = vpop.f32.mrf.mxu0 }
  0xb9   : > { %1088 = vst [vmem:[%s1372_s4] sm:$0xff] %v1087_v0   ;;  %v642_v4 = vadd.f32 %v641_v2, %v553_v1  ;;  %v604_v5 = vpop.f32.mrf.mxu1  ;;  %v516_v9 = vadd.f32 %v1363_v49, %v515_v3 }
  0xbb   : > { %v696_v7 = vmax.f32 %v642_v4, 0.0  ;;  %v605_v13 = vadd.f32 %v604_v5, %v516_v9 }
  0xbd   : > { %v1127_v8 = vpack.c.bf16 %v696_v7, %v695_v6  ;;  %v681_v18 = vmax.f32 %v605_v13, 0.0 }
  0xbe   : > { %v555_v10 = vpop.f32.mrf.mxu2 }
  0xbf   : > { %1171 = vst [vmem:[%s1372_s4 + $0x40] sm:$0xff] %v1127_v8   ;;  %v644_v11 = vpop.f32.mrf.mxu3  ;;  %v556_v16 = vadd.f32 %v1363_v49, %v555_v10 }
  0xc0   : > { %v517_v12 = vpop.f32.mrf.mxu0 }
  0xc1   : > { %v518_v14 = vadd.f32 %v1363_v49, %v517_v12  ;;  %v606_v15 = vpop.f32.mrf.mxu1  ;;  %v645_v21 = vadd.f32 %v644_v11, %v556_v16 }
  0xc3   : > { %v607_v17 = vadd.f32 %v606_v15, %v518_v14  ;;  %v697_v28 = vmax.f32 %v645_v21, 0.0 }
  0xc5   : > { %v682_v19 = vmax.f32 %v607_v17, 0.0 }
  0xc6   : > { %v557_v20 = vpop.f32.mrf.mxu2 }
  0xc7   : > { %v1092_v22 = vpack.c.bf16 %v682_v19, %v681_v18  ;;  %v558_v23 = vadd.f32 %v1363_v49, %v557_v20  ;;  %v646_v24 = vpop.f32.mrf.mxu3 }
  0xc8   : > { %v520_v25 = vpop.f32.mrf.mxu0 }
  0xc9   : > { %1164 = vst [vmem:[%s1372_s4 + $0x8] sm:$0xff] %v1092_v22   ;;  %v647_v26 = vadd.f32 %v646_v24, %v558_v23  ;;  %v609_v27 = vpop.f32.mrf.mxu1  ;;  %v521_v31 = vadd.f32 %v1363_v49, %v520_v25 }
  0xcb   : > { %v698_v29 = vmax.f32 %v647_v26, 0.0  ;;  %v610_v35 = vadd.f32 %v609_v27, %v521_v31 }
  0xcd   : > { %v1132_v30 = vpack.c.bf16 %v698_v29, %v697_v28  ;;  %v683_v40 = vmax.f32 %v610_v35, 0.0 }
  0xce   : > { %v560_v32 = vpop.f32.mrf.mxu2 }
  0xcf   : > { %1172 = vst [vmem:[%s1372_s4 + $0x48] sm:$0xff] %v1132_v30   ;;  %v649_v33 = vpop.f32.mrf.mxu3  ;;  %v561_v38 = vadd.f32 %v1363_v49, %v560_v32 }
  0xd0   : > { %v522_v34 = vpop.f32.mrf.mxu0 }
  0xd1   : > { %v523_v36 = vadd.f32 %v1363_v49, %v522_v34  ;;  %v611_v37 = vpop.f32.mrf.mxu1  ;;  %v650_v43 = vadd.f32 %v649_v33, %v561_v38 }
  0xd3   : > { %v612_v39 = vadd.f32 %v611_v37, %v523_v36  ;;  %v699_v51 = vmax.f32 %v650_v43, 0.0 }
  0xd5   : > { %v684_v41 = vmax.f32 %v612_v39, 0.0 }
  0xd6   : > { %v562_v42 = vpop.f32.mrf.mxu2 }
  0xd7   : > { %v1097_v44 = vpack.c.bf16 %v684_v41, %v683_v40  ;;  %v563_v45 = vadd.f32 %v1363_v49, %v562_v42  ;;  %v651_v46 = vpop.f32.mrf.mxu3 }
  0xd8   : > { %v525_v47 = vpop.f32.mrf.mxu0 }
  0xd9   : > { %1165 = vst [vmem:[%s1372_s4 + $0x10] sm:$0xff] %v1097_v44   ;;  %v652_v48 = vadd.f32 %v651_v46, %v563_v45  ;;  %v614_v50 = vpop.f32.mrf.mxu1  ;;  %v526_v54 = vadd.f32 %v1363_v49, %v525_v47 }
  0xdb   : > { %v700_v52 = vmax.f32 %v652_v48, 0.0  ;;  %v615_v58 = vadd.f32 %v614_v50, %v526_v54 }
  0xdd   : > { %v1137_v53 = vpack.c.bf16 %v700_v52, %v699_v51  ;;  %v685_v63 = vmax.f32 %v615_v58, 0.0 }
  0xde   : > { %v565_v55 = vpop.f32.mrf.mxu2 }
  0xdf   : > { %1173 = vst [vmem:[%s1372_s4 + $0x50] sm:$0xff] %v1137_v53   ;;  %v654_v56 = vpop.f32.mrf.mxu3  ;;  %v566_v61 = vadd.f32 %v1363_v49, %v565_v55 }
  0xe0   : > { %v527_v57 = vpop.f32.mrf.mxu0 }
  0xe1   : > { %v528_v59 = vadd.f32 %v1363_v49, %v527_v57  ;;  %v616_v60 = vpop.f32.mrf.mxu1  ;;  %v655_v2 = vadd.f32 %v654_v56, %v566_v61 }
  0xe3   : > { %v617_v62 = vadd.f32 %v616_v60, %v528_v59  ;;  %v701_v9 = vmax.f32 %v655_v2, 0.0 }
  0xe5   : > { %v686_v0 = vmax.f32 %v617_v62, 0.0 }
  0xe6   : > { %v567_v1 = vpop.f32.mrf.mxu2 }
  0xe7   : > { %v1102_v3 = vpack.c.bf16 %v686_v0, %v685_v63  ;;  %v568_v4 = vadd.f32 %v1363_v49, %v567_v1  ;;  %v656_v5 = vpop.f32.mrf.mxu3 }
  0xe8   : > { %v530_v6 = vpop.f32.mrf.mxu0 }
  0xe9   : > { %1166 = vst [vmem:[%s1372_s4 + $0x18] sm:$0xff] %v1102_v3   ;;  %v657_v7 = vadd.f32 %v656_v5, %v568_v4  ;;  %v619_v8 = vpop.f32.mrf.mxu1  ;;  %v531_v12 = vadd.f32 %v1363_v49, %v530_v6 }
  0xeb   : > { %v702_v10 = vmax.f32 %v657_v7, 0.0  ;;  %v620_v16 = vadd.f32 %v619_v8, %v531_v12 }
  0xed   : > { %v1142_v11 = vpack.c.bf16 %v702_v10, %v701_v9  ;;  %v687_v21 = vmax.f32 %v620_v16, 0.0 }
  0xee   : > { %v570_v13 = vpop.f32.mrf.mxu2 }
  0xef   : > { %1174 = vst [vmem:[%s1372_s4 + $0x58] sm:$0xff] %v1142_v11   ;;  %v659_v14 = vpop.f32.mrf.mxu3  ;;  %v571_v19 = vadd.f32 %v1363_v49, %v570_v13 }
  0xf0   : > { %v532_v15 = vpop.f32.mrf.mxu0 }
  0xf1   : > { %v533_v17 = vadd.f32 %v1363_v49, %v532_v15  ;;  %v621_v18 = vpop.f32.mrf.mxu1  ;;  %v660_v24 = vadd.f32 %v659_v14, %v571_v19 }
  0xf3   : > { %v622_v20 = vadd.f32 %v621_v18, %v533_v17  ;;  %v703_v31 = vmax.f32 %v660_v24, 0.0 }
  0xf5   : > { %v688_v22 = vmax.f32 %v622_v20, 0.0 }
  0xf6   : > { %v572_v23 = vpop.f32.mrf.mxu2 }
  0xf7   : > { %v1107_v25 = vpack.c.bf16 %v688_v22, %v687_v21  ;;  %v573_v26 = vadd.f32 %v1363_v49, %v572_v23  ;;  %v661_v27 = vpop.f32.mrf.mxu3 }
  0xf8   : > { %v535_v28 = vpop.f32.mrf.mxu0 }
  0xf9   : > { %1167 = vst [vmem:[%s1372_s4 + $0x20] sm:$0xff] %v1107_v25   ;;  %v662_v29 = vadd.f32 %v661_v27, %v573_v26  ;;  %v624_v30 = vpop.f32.mrf.mxu1  ;;  %v536_v34 = vadd.f32 %v1363_v49, %v535_v28 }
  0xfb   : > { %v704_v32 = vmax.f32 %v662_v29, 0.0  ;;  %v625_v38 = vadd.f32 %v624_v30, %v536_v34 }
  0xfd   : > { %v1147_v33 = vpack.c.bf16 %v704_v32, %v703_v31  ;;  %v689_v43 = vmax.f32 %v625_v38, 0.0 }
  0xfe   : > { %v575_v35 = vpop.f32.mrf.mxu2 }
  0xff   : > { %1175 = vst [vmem:[%s1372_s4 + $0x60] sm:$0xff] %v1147_v33   ;;  %v664_v36 = vpop.f32.mrf.mxu3  ;;  %v576_v41 = vadd.f32 %v1363_v49, %v575_v35 }
 0x100   : > { %v537_v37 = vpop.f32.mrf.mxu0 }
 0x101   : > { %v538_v39 = vadd.f32 %v1363_v49, %v537_v37  ;;  %v626_v40 = vpop.f32.mrf.mxu1  ;;  %v665_v46 = vadd.f32 %v664_v36, %v576_v41 }
 0x103   : > { %v627_v42 = vadd.f32 %v626_v40, %v538_v39  ;;  %v705_v54 = vmax.f32 %v665_v46, 0.0 }
 0x105   : > { %v690_v44 = vmax.f32 %v627_v42, 0.0 }
 0x106   : > { %v577_v45 = vpop.f32.mrf.mxu2 }
 0x107   : > { %v1112_v47 = vpack.c.bf16 %v690_v44, %v689_v43  ;;  %v578_v48 = vadd.f32 %v1363_v49, %v577_v45  ;;  %v666_v50 = vpop.f32.mrf.mxu3 }
 0x108   : > { %v540_v51 = vpop.f32.mrf.mxu0 }
 0x109   : > { %1168 = vst [vmem:[%s1372_s4 + $0x28] sm:$0xff] %v1112_v47   ;;  %v667_v52 = vadd.f32 %v666_v50, %v578_v48  ;;  %v629_v53 = vpop.f32.mrf.mxu1  ;;  %v541_v57 = vadd.f32 %v1363_v49, %v540_v51 }
 0x10b   : > { %v706_v55 = vmax.f32 %v667_v52, 0.0  ;;  %v630_v61 = vadd.f32 %v629_v53, %v541_v57 }
 0x10d   : > { %v1152_v56 = vpack.c.bf16 %v706_v55, %v705_v54  ;;  %v691_v2 = vmax.f32 %v630_v61, 0.0 }
 0x10e   : > { %v580_v58 = vpop.f32.mrf.mxu2 }
 0x10f   : > { %1176 = vst [vmem:[%s1372_s4 + $0x68] sm:$0xff] %v1152_v56   ;;  %v669_v59 = vpop.f32.mrf.mxu3  ;;  %v581_v0 = vadd.f32 %v1363_v49, %v580_v58 }
 0x110   : > { %v542_v60 = vpop.f32.mrf.mxu0 }
 0x111   : > { %v543_v62 = vadd.f32 %v1363_v49, %v542_v60  ;;  %v631_v63 = vpop.f32.mrf.mxu1  ;;  %v670_v5 = vadd.f32 %v669_v59, %v581_v0 }
 0x113   : > { %v632_v1 = vadd.f32 %v631_v63, %v543_v62  ;;  %v707_v12 = vmax.f32 %v670_v5, 0.0 }
 0x115   : > { %v692_v3 = vmax.f32 %v632_v1, 0.0 }
 0x116   : > { %v582_v4 = vpop.f32.mrf.mxu2 }
 0x117   : > { %v1117_v6 = vpack.c.bf16 %v692_v3, %v691_v2  ;;  %v583_v7 = vadd.f32 %v1363_v49, %v582_v4  ;;  %v671_v8 = vpop.f32.mrf.mxu3 }
 0x118   : > { %v545_v9 = vpop.f32.mrf.mxu0 }
 0x119   : > { %1169 = vst [vmem:[%s1372_s4 + $0x30] sm:$0xff] %v1117_v6   ;;  %v672_v10 = vadd.f32 %v671_v8, %v583_v7  ;;  %v634_v11 = vpop.f32.mrf.mxu1  ;;  %v546_v15 = vadd.f32 %v1363_v49, %v545_v9 }
 0x11b   : > { %v708_v13 = vmax.f32 %v672_v10, 0.0  ;;  %v635_v19 = vadd.f32 %v634_v11, %v546_v15 }
 0x11d   : > { %v1157_v14 = vpack.c.bf16 %v708_v13, %v707_v12  ;;  %v693_v24 = vmax.f32 %v635_v19, 0.0 }
 0x11e   : > { %v585_v16 = vpop.f32.mrf.mxu2 }
 0x11f   : > { %1177 = vst [vmem:[%s1372_s4 + $0x70] sm:$0xff] %v1157_v14   ;;  %v674_v17 = vpop.f32.mrf.mxu3  ;;  %v586_v22 = vadd.f32 %v1363_v49, %v585_v16 }
 0x120   : > { %v547_v18 = vpop.f32.mrf.mxu0 }
 0x121   : > { %v548_v20 = vadd.f32 %v1363_v49, %v547_v18  ;;  %v636_v21 = vpop.f32.mrf.mxu1  ;;  %v675_v27 = vadd.f32 %v674_v17, %v586_v22 }
 0x123   : > { %v637_v23 = vadd.f32 %v636_v21, %v548_v20  ;;  %v709_v32 = vmax.f32 %v675_v27, 0.0 }
 0x125   : > { %v694_v25 = vmax.f32 %v637_v23, 0.0 }
 0x126   : > { %v587_v26 = vpop.f32.mrf.mxu2 }
 0x127   : > { %v1122_v28 = vpack.c.bf16 %v694_v25, %v693_v24  ;;  %v588_v29 = vadd.f32 %v1363_v49, %v587_v26  ;;  %v676_v30 = vpop.f32.mrf.mxu3 }
 0x129   : > { %1170 = vst [vmem:[%s1372_s4 + $0x38] sm:$0xff] %v1122_v28   ;;  %v677_v31 = vadd.f32 %v676_v30, %v588_v29 }
 0x12b   : > { %v710_v33 = vmax.f32 %v677_v31, 0.0 }
 0x12d   : > { %v1162_v34 = vpack.c.bf16 %v710_v33, %v709_v32 }
 0x12f   : > { %1178 = vst [vmem:[%s1372_s4 + $0x78] sm:$0xff] %v1162_v34  }
 0x130 PF: > { %s13_s12 = sadd.s32 1, %s1210_s12  }
 0x131   : > { %p10_p4 = scmp.ge.s32.totalorder %s13_s12, 4  }
 0x133   :  { %12 = sbr.rel (!%p10_p4) target bundleno = 1 (0x1), region = 62 }

// kernel: _forward.18
= control target key start
LH: loop header
LB: loop body
LE: loop exit
PB: predicated region body
PF: predicated region fallthrough
CT: control target
= control target key end

     0   :  { %s530_s12 = smov 0   ;;  %s581_s0 = inlined_call_operand.vmem [shape: bf16[128,128], index: 0, kind: input, shape index: {}]   ;;  %s582_s1 = inlined_call_operand.vmem [shape: bf16[128,128], index: 1, kind: input, shape index: {}]   ;;  %s583_s2 = inlined_call_operand.vmem [shape: f32[1,128], index: 2, kind: input, shape index: {}]   ;;  %s584_s3 = inlined_call_operand.vmem [shape: bf16[128,128], index: 3, kind: output, shape index: {}]  }
   0x1 LB: > { %s375_s13 = sadd.s32 4294967295, %s508_s12   ;;  %p379_p0 = scmp.ge.s32.totalorder %s508_s12, 1  ;;  %s508_s12 = sphi %s530_s12, %s13_s12  }
   0x2   : > { %p138_p1 = scmp.lt.s32.totalorder %s508_s12, 3 }
   0x4   : > { %p139_p2 = pnand %p379_p0, %p138_p1 }
   0x5   : > { %s380_s22 = sshll.u32 (!%p139_p2), %s375_s13, 3 }
   0x6   : > { %142 = sbr.rel (%p139_p2) target bundleno = 190 (0xbe), region = 32  ;;  %p163_p3 = scmp.lt.s32.totalorder (!%p139_p2), %s380_s22, 15 }
   0xb   : > { %v445_v0 = vld [vmem:[%s582_s1 + $0x38] sm:$0xff]  ;;  %v444_v1 = vld [vmem:[%s582_s1 + $0x30] sm:$0xff]  ;;  %v443_v2 = vld [vmem:[%s582_s1 + $0x28] sm:$0xff]  ;;  %s586_s22 = smov (!%p163_p3, %s380_s22), 15 }
   0xc   : > { %274 = vmatpush.bf16.msra.mxu0 %v445_v0  ;;  %469 = vmatpush.bf16.msra.mxu1 %v445_v0  ;;  %v442_v3 = vld [vmem:[%s582_s1 + $0x20] sm:$0xff]  ;;  %v441_v4 = vld [vmem:[%s582_s1 + $0x18] sm:$0xff]  ;;  %v440_v5 = vld [vmem:[%s582_s1 + $0x10] sm:$0xff]  ;;  %s381_s29 = sshll.u32 %s586_s22, 2 }
   0xd   : > { %470 = vmatpush.bf16.msra.mxu2 %v445_v0  ;;  %471 = vmatpush.bf16.msra.mxu3 %v445_v0  ;;  %v439_v6 = vld [vmem:[%s582_s1 + $0x8] sm:$0xff]  ;;  %v438_v7 = vld [vmem:[%s582_s1] sm:$0xff]  ;;  %s166_s7 = scalar_lea.vmem %s581_s0, %s381_s29  ;;  %s172_s13 = scalar_lea.vmem %s584_s3, %s381_s29 }
   0xe   : > { %v434_v8 = vld [vmem:[%s166_s7] sm:$0xff]  ;;  %v435_v9 = vld [vmem:[%s166_s7 + $0x8] sm:$0xff]  ;;  %v436_v10 = vld [vmem:[%s166_s7 + $0x10] sm:$0xff] }
   0xf   : > { %v437_v11 = vld [vmem:[%s166_s7 + $0x18] sm:$0xff]  ;;  %v501_v14 = vld [vmem:[%s583_s2] ss:$0 sm:$0xff] }
  0x10   : > { %275 = vmatpush.bf16.msra.mxu0 %v444_v1  ;;  %472 = vmatpush.bf16.msra.mxu1 %v444_v1 }
  0x11   : > { %473 = vmatpush.bf16.msra.mxu2 %v444_v1  ;;  %474 = vmatpush.bf16.msra.mxu3 %v444_v1 }
  0x14   : > { %276 = vmatpush.bf16.msra.mxu0 %v443_v2  ;;  %475 = vmatpush.bf16.msra.mxu1 %v443_v2 }
  0x15   : > { %476 = vmatpush.bf16.msra.mxu2 %v443_v2  ;;  %477 = vmatpush.bf16.msra.mxu3 %v443_v2 }
  0x18   : > { %277 = vmatpush.bf16.msra.mxu0 %v442_v3  ;;  %478 = vmatpush.bf16.msra.mxu1 %v442_v3 }
  0x19   : > { %479 = vmatpush.bf16.msra.mxu2 %v442_v3  ;;  %480 = vmatpush.bf16.msra.mxu3 %v442_v3 }
  0x1c   : > { %278 = vmatpush.bf16.msra.mxu0 %v441_v4  ;;  %481 = vmatpush.bf16.msra.mxu1 %v441_v4 }
  0x1d   : > { %482 = vmatpush.bf16.msra.mxu2 %v441_v4  ;;  %483 = vmatpush.bf16.msra.mxu3 %v441_v4 }
  0x20   : > { %279 = vmatpush.bf16.msra.mxu0 %v440_v5  ;;  %484 = vmatpush.bf16.msra.mxu1 %v440_v5 }
  0x21   : > { %485 = vmatpush.bf16.msra.mxu2 %v440_v5  ;;  %486 = vmatpush.bf16.msra.mxu3 %v440_v5 }
  0x24   : > { %280 = vmatpush.bf16.msra.mxu0 %v439_v6  ;;  %487 = vmatpush.bf16.msra.mxu1 %v439_v6 }
  0x25   : > { %488 = vmatpush.bf16.msra.mxu2 %v439_v6  ;;  %489 = vmatpush.bf16.msra.mxu3 %v439_v6 }
  0x28   : > { %281 = vmatpush.bf16.msra.mxu0 %v438_v7  ;;  %490 = vmatpush.bf16.msra.mxu1 %v438_v7 }
  0x29   : > { %491 = vmatpush.bf16.msra.mxu2 %v438_v7  ;;  %492 = vmatpush.bf16.msra.mxu3 %v438_v7 }
  0x2b   : > { %282 = vmatmul.bf16.vlgmr.msra.gmra.mxu0 %v434_v8  ;;  %287 = vmatmul.bf16.vlgmr.msra.gmra.mxu1 %v435_v9 }
  0x2c   : > { %292 = vmatmul.bf16.vlgmr.msra.gmra.mxu2 %v436_v10  ;;  %297 = vmatmul.bf16.vlgmr.msra.gmra.mxu3 %v437_v11 }
  0xa8   : > { %v283_v12 = vpop.f32.mrf.mxu0  ;;  %v288_v13 = vpop.f32.mrf.mxu1 }
  0xa9   : > { %v284_v19 = vadd.f32 %v501_v14, %v283_v12  ;;  %v289_v20 = vadd.f32 %v501_v14, %v288_v13 }
  0xaf   : > { %v293_v15 = vpop.f32.mrf.mxu2  ;;  %v298_v16 = vpop.f32.mrf.mxu3 }
  0xb0   : > { %v285_v17 = vpop.f32.mrf.mxu0  ;;  %v290_v18 = vpop.f32.mrf.mxu1  ;;  %v294_v27 = vadd.f32 %v501_v14, %v293_v15  ;;  %v299_v28 = vadd.f32 %v501_v14, %v298_v16 }
  0xb1   : > { %v286_v21 = vadd.f32 %v501_v14, %v285_v17  ;;  %v291_v22 = vadd.f32 %v501_v14, %v290_v18 }
  0xb3   : > { %v449_v23 = vpack.c.bf16 %v286_v21, %v284_v19  ;;  %v454_v24 = vpack.c.bf16 %v291_v22, %v289_v20 }
  0xb5   : > { %450 = vst [vmem:[%s172_s13] sm:$0xff] %v449_v23  }
  0xb6   : > { %466 = vst [vmem:[%s172_s13 + $0x8] sm:$0xff] %v454_v24  }
  0xb7   : > { %v295_v25 = vpop.f32.mrf.mxu2  ;;  %v300_v26 = vpop.f32.mrf.mxu3 }
  0xb8   : > { %v296_v29 = vadd.f32 %v501_v14, %v295_v25  ;;  %v301_v30 = vadd.f32 %v501_v14, %v300_v26 }
  0xba   : > { %v459_v31 = vpack.c.bf16 %v296_v29, %v294_v27  ;;  %v464_v32 = vpack.c.bf16 %v301_v30, %v299_v28 }
  0xbc   : > { %467 = vst [vmem:[%s172_s13 + $0x10] sm:$0xff] %v459_v31  }
  0xbd   : > { %468 = vst [vmem:[%s172_s13 + $0x18] sm:$0xff] %v464_v32  }
  0xbe PF: > { %s13_s12 = sadd.s32 1, %s508_s12  }
  0xbf   : > { %p10_p4 = scmp.ge.s32.totalorder %s13_s12, 4  }
  0xc1   :  { %12 = sbr.rel (!%p10_p4) target bundleno = 1 (0x1), region = 62 }

// kernel: _forward.19
= control target key start
LH: loop header
LB: loop body
LE: loop exit
PB: predicated region body
PF: predicated region fallthrough
CT: control target
= control target key end

     0   :  { %s530_s12 = smov 0   ;;  %s581_s0 = inlined_call_operand.vmem [shape: bf16[128,128], index: 0, kind: input, shape index: {}]   ;;  %s582_s1 = inlined_call_operand.vmem [shape: bf16[128,128], index: 1, kind: input, shape index: {}]   ;;  %s583_s2 = inlined_call_operand.vmem [shape: f32[1,128], index: 2, kind: input, shape index: {}]   ;;  %s584_s3 = inlined_call_operand.vmem [shape: bf16[128,128], index: 3, kind: output, shape index: {}]  }
   0x1 LB: > { %s375_s13 = sadd.s32 4294967295, %s508_s12   ;;  %p379_p0 = scmp.ge.s32.totalorder %s508_s12, 1  ;;  %s508_s12 = sphi %s530_s12, %s13_s12  }
   0x2   : > { %p138_p1 = scmp.lt.s32.totalorder %s508_s12, 3 }
   0x4   : > { %p139_p2 = pnand %p379_p0, %p138_p1 }
   0x5   : > { %s380_s22 = sshll.u32 (!%p139_p2), %s375_s13, 3 }
   0x6   : > { %142 = sbr.rel (%p139_p2) target bundleno = 190 (0xbe), region = 32  ;;  %p163_p3 = scmp.lt.s32.totalorder (!%p139_p2), %s380_s22, 15 }
   0xb   : > { %v445_v0 = vld [vmem:[%s582_s1 + $0x38] sm:$0xff]  ;;  %v444_v1 = vld [vmem:[%s582_s1 + $0x30] sm:$0xff]  ;;  %v443_v2 = vld [vmem:[%s582_s1 + $0x28] sm:$0xff]  ;;  %s586_s22 = smov (!%p163_p3, %s380_s22), 15 }
   0xc   : > { %274 = vmatpush.bf16.msra.mxu0 %v445_v0  ;;  %469 = vmatpush.bf16.msra.mxu1 %v445_v0  ;;  %v442_v3 = vld [vmem:[%s582_s1 + $0x20] sm:$0xff]  ;;  %v441_v4 = vld [vmem:[%s582_s1 + $0x18] sm:$0xff]  ;;  %v440_v5 = vld [vmem:[%s582_s1 + $0x10] sm:$0xff]  ;;  %s381_s29 = sshll.u32 %s586_s22, 2 }
   0xd   : > { %470 = vmatpush.bf16.msra.mxu2 %v445_v0  ;;  %471 = vmatpush.bf16.msra.mxu3 %v445_v0  ;;  %v439_v6 = vld [vmem:[%s582_s1 + $0x8] sm:$0xff]  ;;  %v438_v7 = vld [vmem:[%s582_s1] sm:$0xff]  ;;  %s166_s7 = scalar_lea.vmem %s581_s0, %s381_s29  ;;  %s172_s13 = scalar_lea.vmem %s584_s3, %s381_s29 }
   0xe   : > { %v434_v8 = vld [vmem:[%s166_s7] sm:$0xff]  ;;  %v435_v9 = vld [vmem:[%s166_s7 + $0x8] sm:$0xff]  ;;  %v436_v10 = vld [vmem:[%s166_s7 + $0x10] sm:$0xff] }
   0xf   : > { %v437_v11 = vld [vmem:[%s166_s7 + $0x18] sm:$0xff]  ;;  %v501_v14 = vld [vmem:[%s583_s2] ss:$0 sm:$0xff] }
  0x10   : > { %275 = vmatpush.bf16.msra.mxu0 %v444_v1  ;;  %472 = vmatpush.bf16.msra.mxu1 %v444_v1 }
  0x11   : > { %473 = vmatpush.bf16.msra.mxu2 %v444_v1  ;;  %474 = vmatpush.bf16.msra.mxu3 %v444_v1 }
  0x14   : > { %276 = vmatpush.bf16.msra.mxu0 %v443_v2  ;;  %475 = vmatpush.bf16.msra.mxu1 %v443_v2 }
  0x15   : > { %476 = vmatpush.bf16.msra.mxu2 %v443_v2  ;;  %477 = vmatpush.bf16.msra.mxu3 %v443_v2 }
  0x18   : > { %277 = vmatpush.bf16.msra.mxu0 %v442_v3  ;;  %478 = vmatpush.bf16.msra.mxu1 %v442_v3 }
  0x19   : > { %479 = vmatpush.bf16.msra.mxu2 %v442_v3  ;;  %480 = vmatpush.bf16.msra.mxu3 %v442_v3 }
  0x1c   : > { %278 = vmatpush.bf16.msra.mxu0 %v441_v4  ;;  %481 = vmatpush.bf16.msra.mxu1 %v441_v4 }
  0x1d   : > { %482 = vmatpush.bf16.msra.mxu2 %v441_v4  ;;  %483 = vmatpush.bf16.msra.mxu3 %v441_v4 }
  0x20   : > { %279 = vmatpush.bf16.msra.mxu0 %v440_v5  ;;  %484 = vmatpush.bf16.msra.mxu1 %v440_v5 }
  0x21   : > { %485 = vmatpush.bf16.msra.mxu2 %v440_v5  ;;  %486 = vmatpush.bf16.msra.mxu3 %v440_v5 }
  0x24   : > { %280 = vmatpush.bf16.msra.mxu0 %v439_v6  ;;  %487 = vmatpush.bf16.msra.mxu1 %v439_v6 }
  0x25   : > { %488 = vmatpush.bf16.msra.mxu2 %v439_v6  ;;  %489 = vmatpush.bf16.msra.mxu3 %v439_v6 }
  0x28   : > { %281 = vmatpush.bf16.msra.mxu0 %v438_v7  ;;  %490 = vmatpush.bf16.msra.mxu1 %v438_v7 }
  0x29   : > { %491 = vmatpush.bf16.msra.mxu2 %v438_v7  ;;  %492 = vmatpush.bf16.msra.mxu3 %v438_v7 }
  0x2b   : > { %282 = vmatmul.bf16.vlgmr.msra.gmra.mxu0 %v434_v8  ;;  %287 = vmatmul.bf16.vlgmr.msra.gmra.mxu1 %v435_v9 }
  0x2c   : > { %292 = vmatmul.bf16.vlgmr.msra.gmra.mxu2 %v436_v10  ;;  %297 = vmatmul.bf16.vlgmr.msra.gmra.mxu3 %v437_v11 }
  0xa8   : > { %v283_v12 = vpop.f32.mrf.mxu0  ;;  %v288_v13 = vpop.f32.mrf.mxu1 }
  0xa9   : > { %v284_v19 = vadd.f32 %v501_v14, %v283_v12  ;;  %v289_v20 = vadd.f32 %v501_v14, %v288_v13 }
  0xaf   : > { %v293_v15 = vpop.f32.mrf.mxu2  ;;  %v298_v16 = vpop.f32.mrf.mxu3 }
  0xb0   : > { %v285_v17 = vpop.f32.mrf.mxu0  ;;  %v290_v18 = vpop.f32.mrf.mxu1  ;;  %v294_v27 = vadd.f32 %v501_v14, %v293_v15  ;;  %v299_v28 = vadd.f32 %v501_v14, %v298_v16 }
  0xb1   : > { %v286_v21 = vadd.f32 %v501_v14, %v285_v17  ;;  %v291_v22 = vadd.f32 %v501_v14, %v290_v18 }
  0xb3   : > { %v449_v23 = vpack.c.bf16 %v286_v21, %v284_v19  ;;  %v454_v24 = vpack.c.bf16 %v291_v22, %v289_v20 }
  0xb5   : > { %450 = vst [vmem:[%s172_s13] sm:$0xff] %v449_v23  }
  0xb6   : > { %466 = vst [vmem:[%s172_s13 + $0x8] sm:$0xff] %v454_v24  }
  0xb7   : > { %v295_v25 = vpop.f32.mrf.mxu2  ;;  %v300_v26 = vpop.f32.mrf.mxu3 }
  0xb8   : > { %v296_v29 = vadd.f32 %v501_v14, %v295_v25  ;;  %v301_v30 = vadd.f32 %v501_v14, %v300_v26 }
  0xba   : > { %v459_v31 = vpack.c.bf16 %v296_v29, %v294_v27  ;;  %v464_v32 = vpack.c.bf16 %v301_v30, %v299_v28 }
  0xbc   : > { %467 = vst [vmem:[%s172_s13 + $0x10] sm:$0xff] %v459_v31  }
  0xbd   : > { %468 = vst [vmem:[%s172_s13 + $0x18] sm:$0xff] %v464_v32  }
  0xbe PF: > { %s13_s12 = sadd.s32 1, %s508_s12  }
  0xbf   : > { %p10_p4 = scmp.ge.s32.totalorder %s13_s12, 4  }
  0xc1   :  { %12 = sbr.rel (!%p10_p4) target bundleno = 1 (0x1), region = 62 }

// kernel: _forward.22
= control target key start
LH: loop header
LB: loop body
LE: loop exit
PB: predicated region body
PF: predicated region fallthrough
CT: control target
= control target key end

     0   :  { %s422_s12 = smov 0   ;;  %s466_s0 = inlined_call_operand.vmem [shape: bf16[32,128], index: 0, kind: input, shape index: {}]   ;;  %s467_s1 = inlined_call_operand.vmem [shape: bf16[128,128], index: 1, kind: input, shape index: {}]   ;;  %s468_s2 = inlined_call_operand.vmem [shape: f32[1,128], index: 2, kind: input, shape index: {}]   ;;  %s469_s3 = inlined_call_operand.vmem [shape: bf16[32,128], index: 3, kind: output, shape index: {}]  }
   0x1 LB: > { %s324_s13 = sadd.s32 4294967295, %s400_s12   ;;  %p328_p0 = scmp.ge.s32.totalorder %s400_s12, 1  ;;  %s400_s12 = sphi %s422_s12, %s13_s12  }
   0x2   : > { %p138_p1 = scmp.lt.s32.totalorder %s400_s12, 3 }
   0x4   : > { %p139_p2 = pnand %p328_p0, %p138_p1 }
   0x5   : > { %s329_s22 = sshll.u32 (!%p139_p2), %s324_s13, 1 }
   0x6   : > { %142 = sbr.rel (%p139_p2) target bundleno = 182 (0xb6), region = 32  ;;  %p163_p3 = scmp.lt.s32.totalorder (!%p139_p2), %s329_s22, 3 }
   0xb   : > { %v379_v0 = vld [vmem:[%s467_s1 + $0x38] sm:$0xff]  ;;  %v378_v1 = vld [vmem:[%s467_s1 + $0x30] sm:$0xff]  ;;  %v377_v2 = vld [vmem:[%s467_s1 + $0x28] sm:$0xff]  ;;  %s471_s22 = smov (!%p163_p3, %s329_s22), 3 }
   0xc   : > { %250 = vmatpush.bf16.msra.mxu0 %v379_v0  ;;  %v376_v3 = vld [vmem:[%s467_s1 + $0x20] sm:$0xff]  ;;  %v375_v4 = vld [vmem:[%s467_s1 + $0x18] sm:$0xff]  ;;  %v374_v5 = vld [vmem:[%s467_s1 + $0x10] sm:$0xff]  ;;  %s330_s29 = sshll.u32 %s471_s22, 2 }
   0xd   : > { %v373_v6 = vld [vmem:[%s467_s1 + $0x8] sm:$0xff]  ;;  %v372_v7 = vld [vmem:[%s467_s1] sm:$0xff]  ;;  %s166_s7 = scalar_lea.vmem %s466_s0, %s330_s29  ;;  %s172_s13 = scalar_lea.vmem %s469_s3, %s330_s29 }
   0xe   : > { %v371_v8 = vld [vmem:[%s166_s7] sm:$0xff] }
   0xf   : > { %v393_v10 = vld [vmem:[%s468_s2] ss:$0 sm:$0xff] }
  0x10   : > { %251 = vmatpush.bf16.msra.mxu0 %v378_v1 }
  0x14   : > { %252 = vmatpush.bf16.msra.mxu0 %v377_v2 }
  0x18   : > { %253 = vmatpush.bf16.msra.mxu0 %v376_v3 }
  0x1c   : > { %254 = vmatpush.bf16.msra.mxu0 %v375_v4 }
  0x20   : > { %255 = vmatpush.bf16.msra.mxu0 %v374_v5 }
  0x24   : > { %256 = vmatpush.bf16.msra.mxu0 %v373_v6 }
  0x28   : > { %257 = vmatpush.bf16.msra.mxu0 %v372_v7 }
  0x2b   : > { %258 = vmatmul.bf16.vlgmr.msra.gmra.mxu0 %v371_v8 }
  0xa8   : > { %v259_v9 = vpop.f32.mrf.mxu0 }
  0xa9   : > { %v260_v12 = vadd.f32 %v393_v10, %v259_v9 }
  0xb0   : > { %v261_v11 = vpop.f32.mrf.mxu0 }
  0xb1   : > { %v262_v13 = vadd.f32 %v393_v10, %v261_v11 }
  0xb3   : > { %v383_v14 = vpack.c.bf16 %v262_v13, %v260_v12 }
  0xb5   : > { %384 = vst [vmem:[%s172_s13] sm:$0xff] %v383_v14  }
  0xb6 PF: > { %s13_s12 = sadd.s32 1, %s400_s12  }
  0xb7   : > { %p10_p4 = scmp.ge.s32.totalorder %s13_s12, 4  }
  0xb9   :  { %12 = sbr.rel (!%p10_p4) target bundleno = 1 (0x1), region = 62 }

// kernel: _forward.24
= control target key start
LH: loop header
LB: loop body
LE: loop exit
PB: predicated region body
PF: predicated region fallthrough
CT: control target
= control target key end

     0   :  { %s422_s12 = smov 0   ;;  %s466_s0 = inlined_call_operand.vmem [shape: bf16[32,128], index: 0, kind: input, shape index: {}]   ;;  %s467_s1 = inlined_call_operand.vmem [shape: bf16[128,128], index: 1, kind: input, shape index: {}]   ;;  %s468_s2 = inlined_call_operand.vmem [shape: f32[1,128], index: 2, kind: input, shape index: {}]   ;;  %s469_s3 = inlined_call_operand.vmem [shape: bf16[32,128], index: 3, kind: output, shape index: {}]  }
   0x1 LB: > { %s324_s13 = sadd.s32 4294967295, %s400_s12   ;;  %p328_p0 = scmp.ge.s32.totalorder %s400_s12, 1  ;;  %s400_s12 = sphi %s422_s12, %s13_s12  }
   0x2   : > { %p138_p1 = scmp.lt.s32.totalorder %s400_s12, 3 }
   0x4   : > { %p139_p2 = pnand %p328_p0, %p138_p1 }
   0x5   : > { %s329_s22 = sshll.u32 (!%p139_p2), %s324_s13, 1 }
   0x6   : > { %142 = sbr.rel (%p139_p2) target bundleno = 182 (0xb6), region = 32  ;;  %p163_p3 = scmp.lt.s32.totalorder (!%p139_p2), %s329_s22, 3 }
   0xb   : > { %v379_v0 = vld [vmem:[%s467_s1 + $0x38] sm:$0xff]  ;;  %v378_v1 = vld [vmem:[%s467_s1 + $0x30] sm:$0xff]  ;;  %v377_v2 = vld [vmem:[%s467_s1 + $0x28] sm:$0xff]  ;;  %s471_s22 = smov (!%p163_p3, %s329_s22), 3 }
   0xc   : > { %250 = vmatpush.bf16.msra.mxu0 %v379_v0  ;;  %v376_v3 = vld [vmem:[%s467_s1 + $0x20] sm:$0xff]  ;;  %v375_v4 = vld [vmem:[%s467_s1 + $0x18] sm:$0xff]  ;;  %v374_v5 = vld [vmem:[%s467_s1 + $0x10] sm:$0xff]  ;;  %s330_s29 = sshll.u32 %s471_s22, 2 }
   0xd   : > { %v373_v6 = vld [vmem:[%s467_s1 + $0x8] sm:$0xff]  ;;  %v372_v7 = vld [vmem:[%s467_s1] sm:$0xff]  ;;  %s166_s7 = scalar_lea.vmem %s466_s0, %s330_s29  ;;  %s172_s13 = scalar_lea.vmem %s469_s3, %s330_s29 }
   0xe   : > { %v371_v8 = vld [vmem:[%s166_s7] sm:$0xff] }
   0xf   : > { %v393_v10 = vld [vmem:[%s468_s2] ss:$0 sm:$0xff] }
  0x10   : > { %251 = vmatpush.bf16.msra.mxu0 %v378_v1 }
  0x14   : > { %252 = vmatpush.bf16.msra.mxu0 %v377_v2 }
  0x18   : > { %253 = vmatpush.bf16.msra.mxu0 %v376_v3 }
  0x1c   : > { %254 = vmatpush.bf16.msra.mxu0 %v375_v4 }
  0x20   : > { %255 = vmatpush.bf16.msra.mxu0 %v374_v5 }
  0x24   : > { %256 = vmatpush.bf16.msra.mxu0 %v373_v6 }
  0x28   : > { %257 = vmatpush.bf16.msra.mxu0 %v372_v7 }
  0x2b   : > { %258 = vmatmul.bf16.vlgmr.msra.gmra.mxu0 %v371_v8 }
  0xa8   : > { %v259_v9 = vpop.f32.mrf.mxu0 }
  0xa9   : > { %v260_v12 = vadd.f32 %v393_v10, %v259_v9 }
  0xb0   : > { %v261_v11 = vpop.f32.mrf.mxu0 }
  0xb1   : > { %v262_v13 = vadd.f32 %v393_v10, %v261_v11 }
  0xb3   : > { %v383_v14 = vpack.c.bf16 %v262_v13, %v260_v12 }
  0xb5   : > { %384 = vst [vmem:[%s172_s13] sm:$0xff] %v383_v14  }
  0xb6 PF: > { %s13_s12 = sadd.s32 1, %s400_s12  }
  0xb7   : > { %p10_p4 = scmp.ge.s32.totalorder %s13_s12, 4  }
  0xb9   :  { %12 = sbr.rel (!%p10_p4) target bundleno = 1 (0x1), region = 62 }

// kernel: _forward.23
= control target key start
LH: loop header
LB: loop body
LE: loop exit
PB: predicated region body
PF: predicated region fallthrough
CT: control target
= control target key end

     0   :  { %s554_s12 = smov 0   ;;  %s626_s0 = inlined_call_operand.vmem [shape: bf16[32,256], index: 0, kind: input, shape index: {}]   ;;  %s627_s1 = inlined_call_operand.vmem [shape: bf16[256,128], index: 1, kind: input, shape index: {}]   ;;  %s628_s2 = inlined_call_operand.vmem [shape: f32[1,128], index: 2, kind: input, shape index: {}]   ;;  %s629_s3 = inlined_call_operand.vmem [shape: bf16[32,128], index: 3, kind: output, shape index: {}]  }
   0x1 LB: > { %s409_s13 = sadd.s32 4294967295, %s532_s12   ;;  %p413_p0 = scmp.ge.s32.totalorder %s532_s12, 1  ;;  %s532_s12 = sphi %s554_s12, %s13_s12  }
   0x2   : > { %p139_p1 = scmp.lt.s32.totalorder %s532_s12, 3 }
   0x4   : > { %p140_p2 = pnand %p413_p0, %p139_p1 }
   0x5   : > { %s414_s26 = sshll.u32 (!%p140_p2), %s409_s13, 1 }
   0x6   : > { %143 = sbr.rel (%p140_p2) target bundleno = 184 (0xb8), region = 32  ;;  %p165_p3 = scmp.lt.s32.totalorder (!%p140_p2), %s414_s26, 3 }
   0xb   : > { %v503_v0 = vld [vmem:[%s627_s1 + $0x38] sm:$0xff]  ;;  %v502_v2 = vld [vmem:[%s627_s1 + $0x30] sm:$0xff]  ;;  %v501_v4 = vld [vmem:[%s627_s1 + $0x28] sm:$0xff]  ;;  %s631_s26 = smov (!%p165_p3, %s414_s26), 3 }
   0xc   : > { %v511_v1 = vld [vmem:[%s627_s1 + $0x78] sm:$0xff]  ;;  %321 = vmatpush.bf16.msra.mxu0 %v503_v0  ;;  %v510_v3 = vld [vmem:[%s627_s1 + $0x70] sm:$0xff]  ;;  %v509_v5 = vld [vmem:[%s627_s1 + $0x68] sm:$0xff]  ;;  %s493_s13 = sshll.u32 %s631_s26, 3  ;;  %s418_s28 = sshll.u32 %s631_s26, 2 }
   0xd   : > { %335 = vmatpush.bf16.msra.mxu1 %v511_v1  ;;  %v500_v6 = vld [vmem:[%s627_s1 + $0x20] sm:$0xff]  ;;  %v499_v8 = vld [vmem:[%s627_s1 + $0x18] sm:$0xff]  ;;  %v498_v10 = vld [vmem:[%s627_s1 + $0x10] sm:$0xff]  ;;  %s169_s20 = scalar_lea.vmem %s626_s0, %s493_s13  ;;  %s175_s4 = scalar_lea.vmem %s629_s3, %s418_s28 }
   0xe   : > { %v508_v7 = vld [vmem:[%s627_s1 + $0x60] sm:$0xff]  ;;  %v507_v9 = vld [vmem:[%s627_s1 + $0x58] sm:$0xff]  ;;  %v506_v11 = vld [vmem:[%s627_s1 + $0x50] sm:$0xff] }
   0xf   : > { %v497_v12 = vld [vmem:[%s627_s1 + $0x8] sm:$0xff]  ;;  %v496_v14 = vld [vmem:[%s627_s1] sm:$0xff] }
  0x10   : > { %322 = vmatpush.bf16.msra.mxu0 %v502_v2  ;;  %v505_v13 = vld [vmem:[%s627_s1 + $0x48] sm:$0xff]  ;;  %v504_v15 = vld [vmem:[%s627_s1 + $0x40] sm:$0xff] }
  0x11   : > { %336 = vmatpush.bf16.msra.mxu1 %v510_v3  ;;  %v421_v16 = vld [vmem:[%s169_s20] sm:$0xf]  ;;  %v495_v17 = vld [vmem:[%s169_s20 + $0x4] sm:$0xf0]  ;;  %v494_v18 = vld [vmem:[%s169_s20 + $0x4] sm:$0xf] }
  0x12   : > { %v423_v19 = vld [vmem:[%s169_s20 + $0x8] sm:$0xf0]  ;;  %v422_v20 = vor.u32 %v495_v17, %v421_v16  ;;  %v525_v24 = vld [vmem:[%s628_s2] ss:$0 sm:$0xff] }
  0x13   : > { %v426_v21 = vor.u32 %v494_v18, %v423_v19 }
  0x14   : > { %323 = vmatpush.bf16.msra.mxu0 %v501_v4 }
  0x15   : > { %337 = vmatpush.bf16.msra.mxu1 %v509_v5 }
  0x18   : > { %324 = vmatpush.bf16.msra.mxu0 %v500_v6 }
  0x19   : > { %338 = vmatpush.bf16.msra.mxu1 %v508_v7 }
  0x1c   : > { %325 = vmatpush.bf16.msra.mxu0 %v499_v8 }
  0x1d   : > { %339 = vmatpush.bf16.msra.mxu1 %v507_v9 }
  0x20   : > { %326 = vmatpush.bf16.msra.mxu0 %v498_v10 }
  0x21   : > { %340 = vmatpush.bf16.msra.mxu1 %v506_v11 }
  0x24   : > { %327 = vmatpush.bf16.msra.mxu0 %v497_v12 }
  0x25   : > { %341 = vmatpush.bf16.msra.mxu1 %v505_v13 }
  0x28   : > { %328 = vmatpush.bf16.msra.mxu0 %v496_v14 }
  0x29   : > { %342 = vmatpush.bf16.msra.mxu1 %v504_v15 }
  0x2b   : > { %329 = vmatmul.bf16.vlgmr.msra.gmra.mxu0 %v422_v20 }
  0x2c   : > { %343 = vmatmul.bf16.vlgmr.msra.gmra.mxu1 %v426_v21 }
  0xa8   : > { %v330_v22 = vpop.f32.mrf.mxu0 }
  0xa9   : > { %v344_v23 = vpop.f32.mrf.mxu1  ;;  %v331_v25 = vadd.f32 %v525_v24, %v330_v22 }
  0xab   : > { %v345_v29 = vadd.f32 %v344_v23, %v331_v25 }
  0xb0   : > { %v332_v26 = vpop.f32.mrf.mxu0 }
  0xb1   : > { %v333_v27 = vadd.f32 %v525_v24, %v332_v26  ;;  %v346_v28 = vpop.f32.mrf.mxu1 }
  0xb3   : > { %v347_v30 = vadd.f32 %v346_v28, %v333_v27 }
  0xb5   : > { %v515_v31 = vpack.c.bf16 %v347_v30, %v345_v29 }
  0xb7   : > { %516 = vst [vmem:[%s175_s4] sm:$0xff] %v515_v31  }
  0xb8 PF: > { %s13_s12 = sadd.s32 1, %s532_s12  }
  0xb9   : > { %p10_p4 = scmp.ge.s32.totalorder %s13_s12, 4  }
  0xbb   :  { %12 = sbr.rel (!%p10_p4) target bundleno = 1 (0x1), region = 62 }

// kernel: _forward.26
= control target key start
LH: loop header
LB: loop body
LE: loop exit
PB: predicated region body
PF: predicated region fallthrough
CT: control target
= control target key end

     0   :  { %s216_s1 = inlined_call_operand.vmem [shape: bf16[128,128], index: 1, kind: input, shape index: {}]   ;;  %s217_s2 = inlined_call_operand.vmem [shape: f32[1,128], index: 2, kind: input, shape index: {}]   ;;  %s218_s0 = inlined_call_operand.vmem [shape: bf16[16,128], index: 0, kind: input, shape index: {}]   ;;  %s219_s3 = inlined_call_operand.vmem [shape: bf16[16,128], index: 3, kind: output, shape index: {}]  }
   0x1   :  { %v156_v0 = vld [vmem:[%s216_s1 + $0x38] sm:$0xff]  ;;  %v155_v1 = vld [vmem:[%s216_s1 + $0x30] sm:$0xff]  ;;  %v154_v2 = vld [vmem:[%s216_s1 + $0x28] sm:$0xff] }
   0x2   :  { %90 = vmatpush.bf16.msra.mxu0 %v156_v0  ;;  %v153_v3 = vld [vmem:[%s216_s1 + $0x20] sm:$0xff]  ;;  %v152_v4 = vld [vmem:[%s216_s1 + $0x18] sm:$0xff]  ;;  %v151_v5 = vld [vmem:[%s216_s1 + $0x10] sm:$0xff] }
   0x3   :  { %v150_v6 = vld [vmem:[%s216_s1 + $0x8] sm:$0xff]  ;;  %v149_v7 = vld [vmem:[%s216_s1] sm:$0xff] }
   0x4   :  { %v148_v8 = vld [vmem:[%s218_s0] sm:$0xff] }
   0x5   :  { %v162_v10 = vld [vmem:[%s217_s2] ss:$0 sm:$0xff] }
   0x6   :  { %91 = vmatpush.bf16.msra.mxu0 %v155_v1 }
   0xa   :  { %92 = vmatpush.bf16.msra.mxu0 %v154_v2 }
   0xe   :  { %93 = vmatpush.bf16.msra.mxu0 %v153_v3 }
  0x12   :  { %94 = vmatpush.bf16.msra.mxu0 %v152_v4 }
  0x16   :  { %95 = vmatpush.bf16.msra.mxu0 %v151_v5 }
  0x1a   :  { %96 = vmatpush.bf16.msra.mxu0 %v150_v6 }
  0x1e   :  { %97 = vmatpush.bf16.msra.mxu0 %v149_v7 }
  0x21   :  { %98 = vmatmul.bf16.vlgmr.msra.gmra.mxu0 %v148_v8 }
  0x9e   :  { %v99_v9 = vpop.f32.mrf.mxu0 }
  0x9f   :  { %v100_v12 = vadd.f32 %v162_v10, %v99_v9 }
  0xa6   :  { %v101_v11 = vpop.f32.mrf.mxu0 }
  0xa7   :  { %v102_v13 = vadd.f32 %v162_v10, %v101_v11 }
  0xa9   :  { %v160_v14 = vpack.c.bf16 %v102_v13, %v100_v12 }
  0xab   :  { %161 = vst [vmem:[%s219_s3] sm:$0xff] %v160_v14  }

// kernel: _forward.28
= control target key start
LH: loop header
LB: loop body
LE: loop exit
PB: predicated region body
PF: predicated region fallthrough
CT: control target
= control target key end

     0   :  { %s376_s1 = inlined_call_operand.vmem [shape: bf16[256,128], index: 1, kind: input, shape index: {}]   ;;  %s377_s2 = inlined_call_operand.vmem [shape: f32[1,128], index: 2, kind: input, shape index: {}]   ;;  %s378_s0 = inlined_call_operand.vmem [shape: bf16[16,256], index: 0, kind: input, shape index: {}]   ;;  %s379_s3 = inlined_call_operand.vmem [shape: bf16[16,128], index: 3, kind: output, shape index: {}]  }
   0x1   :  { %v275_v0 = vld [vmem:[%s376_s1 + $0x38] sm:$0xff]  ;;  %v274_v2 = vld [vmem:[%s376_s1 + $0x30] sm:$0xff]  ;;  %v273_v4 = vld [vmem:[%s376_s1 + $0x28] sm:$0xff] }
   0x2   :  { %v283_v1 = vld [vmem:[%s376_s1 + $0x78] sm:$0xff]  ;;  %158 = vmatpush.bf16.msra.mxu0 %v275_v0  ;;  %v282_v3 = vld [vmem:[%s376_s1 + $0x70] sm:$0xff]  ;;  %v281_v5 = vld [vmem:[%s376_s1 + $0x68] sm:$0xff] }
   0x3   :  { %172 = vmatpush.bf16.msra.mxu1 %v283_v1  ;;  %v272_v6 = vld [vmem:[%s376_s1 + $0x20] sm:$0xff]  ;;  %v271_v8 = vld [vmem:[%s376_s1 + $0x18] sm:$0xff]  ;;  %v270_v10 = vld [vmem:[%s376_s1 + $0x10] sm:$0xff] }
   0x4   :  { %v280_v7 = vld [vmem:[%s376_s1 + $0x60] sm:$0xff]  ;;  %v279_v9 = vld [vmem:[%s376_s1 + $0x58] sm:$0xff]  ;;  %v278_v11 = vld [vmem:[%s376_s1 + $0x50] sm:$0xff] }
   0x5   :  { %v269_v12 = vld [vmem:[%s376_s1 + $0x8] sm:$0xff]  ;;  %v268_v14 = vld [vmem:[%s376_s1] sm:$0xff] }
   0x6   :  { %159 = vmatpush.bf16.msra.mxu0 %v274_v2  ;;  %v277_v13 = vld [vmem:[%s376_s1 + $0x48] sm:$0xff]  ;;  %v276_v15 = vld [vmem:[%s376_s1 + $0x40] sm:$0xff] }
   0x7   :  { %173 = vmatpush.bf16.msra.mxu1 %v282_v3  ;;  %v196_v16 = vld [vmem:[%s378_s0] sm:$0xf]  ;;  %v267_v17 = vld [vmem:[%s378_s0 + $0x4] sm:$0xf0]  ;;  %v266_v18 = vld [vmem:[%s378_s0 + $0x4] sm:$0xf] }
   0x8   :  { %v198_v19 = vld [vmem:[%s378_s0 + $0x8] sm:$0xf0]  ;;  %v197_v20 = vor.u32 %v267_v17, %v196_v16  ;;  %v289_v24 = vld [vmem:[%s377_s2] ss:$0 sm:$0xff] }
   0x9   :  { %v201_v21 = vor.u32 %v266_v18, %v198_v19 }
   0xa   :  { %160 = vmatpush.bf16.msra.mxu0 %v273_v4 }
   0xb   :  { %174 = vmatpush.bf16.msra.mxu1 %v281_v5 }
   0xe   :  { %161 = vmatpush.bf16.msra.mxu0 %v272_v6 }
   0xf   :  { %175 = vmatpush.bf16.msra.mxu1 %v280_v7 }
  0x12   :  { %162 = vmatpush.bf16.msra.mxu0 %v271_v8 }
  0x13   :  { %176 = vmatpush.bf16.msra.mxu1 %v279_v9 }
  0x16   :  { %163 = vmatpush.bf16.msra.mxu0 %v270_v10 }
  0x17   :  { %177 = vmatpush.bf16.msra.mxu1 %v278_v11 }
  0x1a   :  { %164 = vmatpush.bf16.msra.mxu0 %v269_v12 }
  0x1b   :  { %178 = vmatpush.bf16.msra.mxu1 %v277_v13 }
  0x1e   :  { %165 = vmatpush.bf16.msra.mxu0 %v268_v14 }
  0x1f   :  { %179 = vmatpush.bf16.msra.mxu1 %v276_v15 }
  0x21   :  { %166 = vmatmul.bf16.vlgmr.msra.gmra.mxu0 %v197_v20 }
  0x22   :  { %180 = vmatmul.bf16.vlgmr.msra.gmra.mxu1 %v201_v21 }
  0x9e   :  { %v167_v22 = vpop.f32.mrf.mxu0 }
  0x9f   :  { %v181_v23 = vpop.f32.mrf.mxu1  ;;  %v168_v25 = vadd.f32 %v289_v24, %v167_v22 }
  0xa1   :  { %v182_v29 = vadd.f32 %v181_v23, %v168_v25 }
  0xa6   :  { %v169_v26 = vpop.f32.mrf.mxu0 }
  0xa7   :  { %v170_v27 = vadd.f32 %v289_v24, %v169_v26  ;;  %v183_v28 = vpop.f32.mrf.mxu1 }
  0xa9   :  { %v184_v30 = vadd.f32 %v183_v28, %v170_v27 }
  0xab   :  { %v287_v31 = vpack.c.bf16 %v184_v30, %v182_v29 }
  0xad   :  { %288 = vst [vmem:[%s379_s3] sm:$0xff] %v287_v31  }

// kernel: _forward.27
= control target key start
LH: loop header
LB: loop body
LE: loop exit
PB: predicated region body
PF: predicated region fallthrough
CT: control target
= control target key end

     0   :  { %s1014_s1 = inlined_call_operand.vmem [shape: bf16[384,256], index: 1, kind: input, shape index: {}]   ;;  %s1015_s0 = inlined_call_operand.vmem [shape: bf16[16,384], index: 0, kind: input, shape index: {}]   ;;  %s1016_s2 = inlined_call_operand.vmem [shape: f32[1,256], index: 2, kind: input, shape index: {}]   ;;  %s1017_s3 = inlined_call_operand.vmem [shape: bf16[16,256], index: 3, kind: output, shape index: {}]  }
   0x1   :  { %v490_v0 = vld [vmem:[%s1014_s1 + $0x70] sm:$0xf]  ;;  %v642_v1 = vld [vmem:[%s1014_s1 + $0x74] sm:$0xf0]  ;;  %v482_v9 = vld [vmem:[%s1014_s1 + $0x60] sm:$0xf] }
   0x2   :  { %v554_v2 = vld [vmem:[%s1014_s1 + $0xf0] sm:$0xf]  ;;  %v491_v3 = vor.u32 %v642_v1, %v490_v0  ;;  %v658_v4 = vld [vmem:[%s1014_s1 + $0xf4] sm:$0xf0]  ;;  %v640_v10 = vld [vmem:[%s1014_s1 + $0x64] sm:$0xf0] }
   0x3   :  { %v618_v5 = vld [vmem:[%s1014_s1 + $0x170] sm:$0xf]  ;;  %v674_v6 = vld [vmem:[%s1014_s1 + $0x174] sm:$0xf0]  ;;  %v555_v7 = vor.u32 %v658_v4, %v554_v2  ;;  %v546_v11 = vld [vmem:[%s1014_s1 + $0xe0] sm:$0xf]  ;;  %v483_v12 = vor.u32 %v640_v10, %v482_v9 }
   0x4   :  { %v619_v8 = vor.u32 %v674_v6, %v618_v5  ;;  %328 = vmatpush.bf16.msra.mxu0 %v491_v3  ;;  %v656_v13 = vld [vmem:[%s1014_s1 + $0xe4] sm:$0xf0]  ;;  %v610_v14 = vld [vmem:[%s1014_s1 + $0x160] sm:$0xf]  ;;  %v474_v18 = vld [vmem:[%s1014_s1 + $0x50] sm:$0xf] }
   0x5   :  { %v672_v15 = vld [vmem:[%s1014_s1 + $0x164] sm:$0xf0]  ;;  %342 = vmatpush.bf16.msra.mxu1 %v555_v7  ;;  %v547_v16 = vor.u32 %v656_v13, %v546_v11  ;;  %v638_v19 = vld [vmem:[%s1014_s1 + $0x54] sm:$0xf0]  ;;  %v538_v20 = vld [vmem:[%s1014_s1 + $0xd0] sm:$0xf] }
   0x6   :  { %356 = vmatpush.bf16.msra.mxu2 %v619_v8  ;;  %v611_v17 = vor.u32 %v672_v15, %v610_v14  ;;  %v654_v21 = vld [vmem:[%s1014_s1 + $0xd4] sm:$0xf0]  ;;  %v602_v22 = vld [vmem:[%s1014_s1 + $0x150] sm:$0xf]  ;;  %v475_v24 = vor.u32 %v638_v19, %v474_v18  ;;  %v641_v25 = vld [vmem:[%s1014_s1 + $0x74] sm:$0xf] }
   0x7   :  { %v670_v23 = vld [vmem:[%s1014_s1 + $0x154] sm:$0xf0]  ;;  %v492_v26 = vld [vmem:[%s1014_s1 + $0x78] sm:$0xf0]  ;;  %v539_v27 = vor.u32 %v654_v21, %v538_v20  ;;  %v466_v29 = vld [vmem:[%s1014_s1 + $0x40] sm:$0xf] }
   0x8   :  { %329 = vmatpush.bf16.msra.mxu0 %v483_v12  ;;  %v603_v28 = vor.u32 %v670_v23, %v602_v22  ;;  %v636_v30 = vld [vmem:[%s1014_s1 + $0x44] sm:$0xf0]  ;;  %v530_v31 = vld [vmem:[%s1014_s1 + $0xc0] sm:$0xf]  ;;  %v495_v32 = vor.u32 %v641_v25, %v492_v26  ;;  %v639_v36 = vld [vmem:[%s1014_s1 + $0x64] sm:$0xf] }
   0x9   :  { %343 = vmatpush.bf16.msra.mxu1 %v547_v16  ;;  %v652_v33 = vld [vmem:[%s1014_s1 + $0xc4] sm:$0xf0]  ;;  %v594_v34 = vld [vmem:[%s1014_s1 + $0x140] sm:$0xf]  ;;  %v484_v37 = vld [vmem:[%s1014_s1 + $0x68] sm:$0xf0]  ;;  %v467_v38 = vor.u32 %v636_v30, %v466_v29 }
   0xa   :  { %357 = vmatpush.bf16.msra.mxu2 %v611_v17  ;;  %v668_v35 = vld [vmem:[%s1014_s1 + $0x144] sm:$0xf0]  ;;  %370 = vmatpush.bf16.msra.mxu3 %v495_v32  ;;  %v458_v39 = vld [vmem:[%s1014_s1 + $0x30] sm:$0xf]  ;;  %v634_v40 = vld [vmem:[%s1014_s1 + $0x34] sm:$0xf0]  ;;  %v487_v41 = vor.u32 %v639_v36, %v484_v37  ;;  %v531_v42 = vor.u32 %v652_v33, %v530_v31 }
   0xb   :  { %v595_v43 = vor.u32 %v668_v35, %v594_v34  ;;  %v522_v44 = vld [vmem:[%s1014_s1 + $0xb0] sm:$0xf]  ;;  %v650_v45 = vld [vmem:[%s1014_s1 + $0xb4] sm:$0xf0]  ;;  %v637_v46 = vld [vmem:[%s1014_s1 + $0x54] sm:$0xf]  ;;  %v459_v51 = vor.u32 %v634_v40, %v458_v39 }
   0xc   :  { %330 = vmatpush.bf16.msra.mxu0 %v475_v24  ;;  %v586_v47 = vld [vmem:[%s1014_s1 + $0x130] sm:$0xf]  ;;  %v666_v48 = vld [vmem:[%s1014_s1 + $0x134] sm:$0xf0]  ;;  %v476_v49 = vld [vmem:[%s1014_s1 + $0x58] sm:$0xf0]  ;;  %v523_v54 = vor.u32 %v650_v45, %v522_v44 }
   0xd   :  { %344 = vmatpush.bf16.msra.mxu1 %v539_v27  ;;  %v479_v50 = vor.u32 %v637_v46, %v476_v49  ;;  %v635_v52 = vld [vmem:[%s1014_s1 + $0x44] sm:$0xf]  ;;  %v468_v53 = vld [vmem:[%s1014_s1 + $0x48] sm:$0xf0]  ;;  %v587_v55 = vor.u32 %v666_v48, %v586_v47  ;;  %v450_v56 = vld [vmem:[%s1014_s1 + $0x20] sm:$0xf] }
   0xe   :  { %358 = vmatpush.bf16.msra.mxu2 %v603_v28  ;;  %371 = vmatpush.bf16.msra.mxu3 %v487_v41  ;;  %v632_v57 = vld [vmem:[%s1014_s1 + $0x24] sm:$0xf0]  ;;  %v514_v58 = vld [vmem:[%s1014_s1 + $0xa0] sm:$0xf]  ;;  %v471_v62 = vor.u32 %v635_v52, %v468_v53  ;;  %v633_v0 = vld [vmem:[%s1014_s1 + $0x34] sm:$0xf] }
   0xf   :  { %v648_v59 = vld [vmem:[%s1014_s1 + $0xa4] sm:$0xf0]  ;;  %v578_v60 = vld [vmem:[%s1014_s1 + $0x120] sm:$0xf]  ;;  %v451_v63 = vor.u32 %v632_v57, %v450_v56  ;;  %v460_v1 = vld [vmem:[%s1014_s1 + $0x38] sm:$0xf0] }
  0x10   :  { %331 = vmatpush.bf16.msra.mxu0 %v467_v38  ;;  %v664_v61 = vld [vmem:[%s1014_s1 + $0x124] sm:$0xf0]  ;;  %v515_v2 = vor.u32 %v648_v59, %v514_v58  ;;  %v442_v4 = vld [vmem:[%s1014_s1 + $0x10] sm:$0xf]  ;;  %v630_v5 = vld [vmem:[%s1014_s1 + $0x14] sm:$0xf0]  ;;  %v463_v11 = vor.u32 %v633_v0, %v460_v1 }
  0x11   :  { %345 = vmatpush.bf16.msra.mxu1 %v531_v42  ;;  %v579_v3 = vor.u32 %v664_v61, %v578_v60  ;;  %v506_v6 = vld [vmem:[%s1014_s1 + $0x90] sm:$0xf]  ;;  %v646_v7 = vld [vmem:[%s1014_s1 + $0x94] sm:$0xf0]  ;;  %v434_v10 = vld [vmem:[%s1014_s1] sm:$0xf]  ;;  %v443_v12 = vor.u32 %v630_v5, %v442_v4 }
  0x12   :  { %359 = vmatpush.bf16.msra.mxu2 %v595_v43  ;;  %372 = vmatpush.bf16.msra.mxu3 %v479_v50  ;;  %v570_v8 = vld [vmem:[%s1014_s1 + $0x110] sm:$0xf]  ;;  %v662_v9 = vld [vmem:[%s1014_s1 + $0x114] sm:$0xf0]  ;;  %v628_v13 = vld [vmem:[%s1014_s1 + $0x4] sm:$0xf0]  ;;  %v507_v16 = vor.u32 %v646_v7, %v506_v6 }
  0x13   :  { %v631_v14 = vld [vmem:[%s1014_s1 + $0x24] sm:$0xf]  ;;  %v452_v15 = vld [vmem:[%s1014_s1 + $0x28] sm:$0xf0]  ;;  %v571_v17 = vor.u32 %v662_v9, %v570_v8  ;;  %v498_v18 = vld [vmem:[%s1014_s1 + $0x80] sm:$0xf]  ;;  %v435_v28 = vor.u32 %v628_v13, %v434_v10 }
  0x14   :  { %332 = vmatpush.bf16.msra.mxu0 %v459_v51  ;;  %v644_v19 = vld [vmem:[%s1014_s1 + $0x84] sm:$0xf0]  ;;  %v657_v20 = vld [vmem:[%s1014_s1 + $0xf4] sm:$0xf]  ;;  %v556_v21 = vld [vmem:[%s1014_s1 + $0xf8] sm:$0xf0]  ;;  %v455_v26 = vor.u32 %v631_v14, %v452_v15 }
  0x15   :  { %346 = vmatpush.bf16.msra.mxu1 %v523_v54  ;;  %v673_v22 = vld [vmem:[%s1014_s1 + $0x174] sm:$0xf]  ;;  %v620_v23 = vld [vmem:[%s1014_s1 + $0x178] sm:$0xf0]  ;;  %v562_v24 = vld [vmem:[%s1014_s1 + $0x100] sm:$0xf]  ;;  %v499_v32 = vor.u32 %v644_v19, %v498_v18  ;;  %v559_v33 = vor.u32 %v657_v20, %v556_v21 }
  0x16   :  { %360 = vmatpush.bf16.msra.mxu2 %v587_v55  ;;  %373 = vmatpush.bf16.msra.mxu3 %v471_v62  ;;  %v660_v25 = vld [vmem:[%s1014_s1 + $0x104] sm:$0xf0]  ;;  %v422_v27 = vld [vmem:[%s1015_s0] sm:$0xf]  ;;  %v625_v29 = vld [vmem:[%s1015_s0 + $0x8] sm:$0xf0]  ;;  %v623_v37 = vor.u32 %v673_v22, %v620_v23 }
  0x17   :  { %v629_v30 = vld [vmem:[%s1014_s1 + $0x14] sm:$0xf]  ;;  %v444_v31 = vld [vmem:[%s1014_s1 + $0x18] sm:$0xf0]  ;;  %v655_v34 = vld [vmem:[%s1014_s1 + $0xe4] sm:$0xf]  ;;  %v563_v38 = vor.u32 %v660_v25, %v562_v24  ;;  %v423_v44 = vor.u32 %v625_v29, %v422_v27 }
  0x18   :  { %333 = vmatpush.bf16.msra.mxu0 %v451_v63  ;;  %v624_v35 = vld [vmem:[%s1015_s0 + $0x4] sm:$0xf]  ;;  %v424_v36 = vld [vmem:[%s1015_s0 + $0xc] sm:$0xf0]  ;;  %v548_v39 = vld [vmem:[%s1014_s1 + $0xe8] sm:$0xf0]  ;;  %v447_v45 = vor.u32 %v629_v30, %v444_v31 }
  0x19   :  { %347 = vmatpush.bf16.msra.mxu1 %v515_v2  ;;  %v430_v40 = vld [vmem:[%s1015_s0 + $0x8] sm:$0xf]  ;;  %v626_v41 = vld [vmem:[%s1015_s0 + $0x10] sm:$0xf0]  ;;  %v671_v42 = vld [vmem:[%s1014_s1 + $0x164] sm:$0xf]  ;;  %v923_v46 = vor.u32 %v624_v35, %v424_v36  ;;  %v551_v49 = vor.u32 %v655_v34, %v548_v39 }
  0x1a   :  { %361 = vmatpush.bf16.msra.mxu2 %v579_v3  ;;  %374 = vmatpush.bf16.msra.mxu3 %v463_v11  ;;  %v612_v43 = vld [vmem:[%s1014_s1 + $0x168] sm:$0xf0]  ;;  %v627_v47 = vld [vmem:[%s1014_s1 + $0x4] sm:$0xf]  ;;  %v431_v50 = vor.u32 %v626_v41, %v430_v40  ;;  %v653_v52 = vld [vmem:[%s1014_s1 + $0xd4] sm:$0xf] }
  0x1b   :  { %v436_v48 = vld [vmem:[%s1014_s1 + $0x8] sm:$0xf0]  ;;  %v615_v51 = vor.u32 %v671_v42, %v612_v43  ;;  %v540_v53 = vld [vmem:[%s1014_s1 + $0xd8] sm:$0xf0]  ;;  %v669_v54 = vld [vmem:[%s1014_s1 + $0x154] sm:$0xf] }
  0x1c   :  { %334 = vmatpush.bf16.msra.mxu0 %v443_v12  ;;  %v604_v55 = vld [vmem:[%s1014_s1 + $0x158] sm:$0xf0]  ;;  %v439_v56 = vor.u32 %v627_v47, %v436_v48  ;;  %v543_v57 = vor.u32 %v653_v52, %v540_v53  ;;  %v651_v59 = vld [vmem:[%s1014_s1 + $0xc4] sm:$0xf]  ;;  %v532_v60 = vld [vmem:[%s1014_s1 + $0xc8] sm:$0xf0] }
  0x1d   :  { %348 = vmatpush.bf16.msra.mxu1 %v507_v16  ;;  %v607_v58 = vor.u32 %v669_v54, %v604_v55  ;;  %v667_v61 = vld [vmem:[%s1014_s1 + $0x144] sm:$0xf]  ;;  %v596_v62 = vld [vmem:[%s1014_s1 + $0x148] sm:$0xf0]  ;;  %v535_v63 = vor.u32 %v651_v59, %v532_v60  ;;  %v649_v1 = vld [vmem:[%s1014_s1 + $0xb4] sm:$0xf] }
  0x1e   :  { %362 = vmatpush.bf16.msra.mxu2 %v571_v17  ;;  %375 = vmatpush.bf16.msra.mxu3 %v455_v26  ;;  %v599_v0 = vor.u32 %v667_v61, %v596_v62  ;;  %v524_v2 = vld [vmem:[%s1014_s1 + $0xb8] sm:$0xf0]  ;;  %v665_v3 = vld [vmem:[%s1014_s1 + $0x134] sm:$0xf]  ;;  %v647_v7 = vld [vmem:[%s1014_s1 + $0xa4] sm:$0xf] }
  0x1f   :  { %v588_v4 = vld [vmem:[%s1014_s1 + $0x138] sm:$0xf0]  ;;  %v527_v5 = vor.u32 %v649_v1, %v524_v2  ;;  %v516_v8 = vld [vmem:[%s1014_s1 + $0xa8] sm:$0xf0]  ;;  %v663_v9 = vld [vmem:[%s1014_s1 + $0x124] sm:$0xf] }
  0x20   :  { %335 = vmatpush.bf16.msra.mxu0 %v435_v28  ;;  %v591_v6 = vor.u32 %v665_v3, %v588_v4  ;;  %v580_v10 = vld [vmem:[%s1014_s1 + $0x128] sm:$0xf0]  ;;  %v519_v11 = vor.u32 %v647_v7, %v516_v8  ;;  %v645_v13 = vld [vmem:[%s1014_s1 + $0x94] sm:$0xf]  ;;  %v508_v14 = vld [vmem:[%s1014_s1 + $0x98] sm:$0xf0] }
  0x21   :  { %349 = vmatpush.bf16.msra.mxu1 %v499_v32  ;;  %v583_v12 = vor.u32 %v663_v9, %v580_v10  ;;  %v661_v15 = vld [vmem:[%s1014_s1 + $0x114] sm:$0xf]  ;;  %v572_v16 = vld [vmem:[%s1014_s1 + $0x118] sm:$0xf0]  ;;  %v511_v17 = vor.u32 %v645_v13, %v508_v14  ;;  %v643_v19 = vld [vmem:[%s1014_s1 + $0x84] sm:$0xf] }
  0x22   :  { %363 = vmatpush.bf16.msra.mxu2 %v563_v38  ;;  %376 = vmatpush.bf16.msra.mxu3 %v447_v45  ;;  %v575_v18 = vor.u32 %v661_v15, %v572_v16  ;;  %v500_v20 = vld [vmem:[%s1014_s1 + $0x88] sm:$0xf0]  ;;  %v659_v21 = vld [vmem:[%s1014_s1 + $0x104] sm:$0xf]  ;;  %v66_v27 = vld [vmem:[%s1016_s2] sm:$0x3] }
  0x23   :  { %336 = vmatmul.bf16.vlgmr.msra.gmra.mxu0 %v423_v44  ;;  %v564_v22 = vld [vmem:[%s1014_s1 + $0x108] sm:$0xf0]  ;;  %v503_v23 = vor.u32 %v643_v19, %v500_v20  ;;  %v68_v28 = vperm.slane %v66_v27, 0  ;;  %v69_v31 = vperm.slane %v66_v27, 1 }
  0x24   :  { %384 = vmatpush.bf16.msrb.mxu0 %v559_v33  ;;  %350 = vmatmul.bf16.vlgmr.msra.gmra.mxu1 %v923_v46  ;;  %v567_v24 = vor.u32 %v659_v21, %v564_v22 }
  0x25   :  { %398 = vmatpush.bf16.msrb.mxu1 %v623_v37  ;;  %364 = vmatmul.bf16.vlgmr.msra.gmra.mxu2 %v431_v50 }
  0x26   :  { %377 = vmatpush.bf16.msra.mxu3 %v439_v56 }
  0x28   :  { %385 = vmatpush.bf16.msrb.mxu0 %v551_v49 }
  0x29   :  { %399 = vmatpush.bf16.msrb.mxu1 %v615_v51  ;;  %378 = vmatmul.bf16.vlgmr.msra.gmra.mxu3 %v423_v44 }
  0x2c   :  { %386 = vmatpush.bf16.msrb.mxu0 %v543_v57 }
  0x2d   :  { %400 = vmatpush.bf16.msrb.mxu1 %v607_v58 }
  0x30   :  { %387 = vmatpush.bf16.msrb.mxu0 %v535_v63 }
  0x31   :  { %401 = vmatpush.bf16.msrb.mxu1 %v599_v0 }
  0x34   :  { %388 = vmatpush.bf16.msrb.mxu0 %v527_v5 }
  0x35   :  { %402 = vmatpush.bf16.msrb.mxu1 %v591_v6 }
  0x38   :  { %389 = vmatpush.bf16.msrb.mxu0 %v519_v11 }
  0x39   :  { %403 = vmatpush.bf16.msrb.mxu1 %v583_v12 }
  0x3c   :  { %390 = vmatpush.bf16.msrb.mxu0 %v511_v17 }
  0x3d   :  { %404 = vmatpush.bf16.msrb.mxu1 %v575_v18 }
  0x40   :  { %391 = vmatpush.bf16.msrb.mxu0 %v503_v23 }
  0x41   :  { %405 = vmatpush.bf16.msrb.mxu1 %v567_v24 }
  0x43   :  { %392 = vmatmul.bf16.vlgmr.msrb.gmra.mxu0 %v923_v46 }
  0x44   :  { %406 = vmatmul.bf16.vlgmr.msrb.gmra.mxu1 %v431_v50 }
  0xa0   :  { %v337_v25 = vpop.f32.mrf.mxu0 }
  0xa1   :  { %v351_v26 = vpop.f32.mrf.mxu1  ;;  %v338_v33 = vadd.f32 %v337_v25, %v68_v28 }
  0xa3   :  { %v352_v36 = vadd.f32 %v351_v26, %v338_v33 }
  0xa8   :  { %v339_v29 = vpop.f32.mrf.mxu0  ;;  %v365_v35 = vpop.f32.mrf.mxu2 }
  0xa9   :  { %v353_v30 = vpop.f32.mrf.mxu1  ;;  %v366_v40 = vadd.f32 %v365_v35, %v352_v36  ;;  %v340_v41 = vadd.f32 %v339_v29, %v68_v28 }
  0xab   :  { %v354_v45 = vadd.f32 %v353_v30, %v340_v41 }
  0xac   :  { %v379_v32 = vpop.f32.mrf.mxu3 }
  0xad   :  { %v380_v34 = vadd.f32 %v379_v32, %v69_v31 }
  0xb0   :  { %v367_v47 = vpop.f32.mrf.mxu2 }
  0xb1   :  { %v368_v51 = vadd.f32 %v367_v47, %v354_v45 }
  0xb4   :  { %v381_v43 = vpop.f32.mrf.mxu3 }
  0xb5   :  { %v382_v46 = vadd.f32 %v381_v43, %v69_v31 }
  0xc0   :  { %v393_v37 = vpop.f32.mrf.mxu0 }
  0xc1   :  { %v394_v38 = vadd.f32 %v393_v37, %v380_v34  ;;  %v407_v39 = vpop.f32.mrf.mxu1 }
  0xc3   :  { %v408_v42 = vadd.f32 %v407_v39, %v394_v38 }
  0xc5   :  { %v412_v44 = vpack.c.bf16 %v408_v42, %v366_v40 }
  0xc7   :  { %414 = vst [vmem:[%s1017_s3] sm:$0xff] %v412_v44 }
  0xc8   :  { %v395_v48 = vpop.f32.mrf.mxu0 }
  0xc9   :  { %v396_v49 = vadd.f32 %v395_v48, %v382_v46  ;;  %v409_v50 = vpop.f32.mrf.mxu1 }
  0xcb   :  { %v410_v52 = vadd.f32 %v409_v50, %v396_v49 }
  0xcd   :  { %v413_v53 = vpack.c.bf16 %v410_v52, %v368_v51 }
  0xcf   :  { %415 = vst [vmem:[%s1017_s3 + $0x8] sm:$0xff] %v413_v53 }

// kernel: _forward.30
= control target key start
LH: loop header
LB: loop body
LE: loop exit
PB: predicated region body
PF: predicated region fallthrough
CT: control target
= control target key end

     0   :  { %s376_s1 = inlined_call_operand.vmem [shape: bf16[256,128], index: 1, kind: input, shape index: {}]   ;;  %s377_s2 = inlined_call_operand.vmem [shape: f32[1,128], index: 2, kind: input, shape index: {}]   ;;  %s378_s0 = inlined_call_operand.vmem [shape: bf16[16,256], index: 0, kind: input, shape index: {}]   ;;  %s379_s3 = inlined_call_operand.vmem [shape: bf16[16,128], index: 3, kind: output, shape index: {}]  }
   0x1   :  { %v275_v0 = vld [vmem:[%s376_s1 + $0x38] sm:$0xff]  ;;  %v274_v2 = vld [vmem:[%s376_s1 + $0x30] sm:$0xff]  ;;  %v273_v4 = vld [vmem:[%s376_s1 + $0x28] sm:$0xff] }
   0x2   :  { %v283_v1 = vld [vmem:[%s376_s1 + $0x78] sm:$0xff]  ;;  %158 = vmatpush.bf16.msra.mxu0 %v275_v0  ;;  %v282_v3 = vld [vmem:[%s376_s1 + $0x70] sm:$0xff]  ;;  %v281_v5 = vld [vmem:[%s376_s1 + $0x68] sm:$0xff] }
   0x3   :  { %172 = vmatpush.bf16.msra.mxu1 %v283_v1  ;;  %v272_v6 = vld [vmem:[%s376_s1 + $0x20] sm:$0xff]  ;;  %v271_v8 = vld [vmem:[%s376_s1 + $0x18] sm:$0xff]  ;;  %v270_v10 = vld [vmem:[%s376_s1 + $0x10] sm:$0xff] }
   0x4   :  { %v280_v7 = vld [vmem:[%s376_s1 + $0x60] sm:$0xff]  ;;  %v279_v9 = vld [vmem:[%s376_s1 + $0x58] sm:$0xff]  ;;  %v278_v11 = vld [vmem:[%s376_s1 + $0x50] sm:$0xff] }
   0x5   :  { %v269_v12 = vld [vmem:[%s376_s1 + $0x8] sm:$0xff]  ;;  %v268_v14 = vld [vmem:[%s376_s1] sm:$0xff] }
   0x6   :  { %159 = vmatpush.bf16.msra.mxu0 %v274_v2  ;;  %v277_v13 = vld [vmem:[%s376_s1 + $0x48] sm:$0xff]  ;;  %v276_v15 = vld [vmem:[%s376_s1 + $0x40] sm:$0xff] }
   0x7   :  { %173 = vmatpush.bf16.msra.mxu1 %v282_v3  ;;  %v196_v16 = vld [vmem:[%s378_s0] sm:$0xf]  ;;  %v267_v17 = vld [vmem:[%s378_s0 + $0x4] sm:$0xf0]  ;;  %v266_v18 = vld [vmem:[%s378_s0 + $0x4] sm:$0xf] }
   0x8   :  { %v198_v19 = vld [vmem:[%s378_s0 + $0x8] sm:$0xf0]  ;;  %v197_v20 = vor.u32 %v267_v17, %v196_v16  ;;  %v289_v24 = vld [vmem:[%s377_s2] ss:$0 sm:$0xff] }
   0x9   :  { %v201_v21 = vor.u32 %v266_v18, %v198_v19 }
   0xa   :  { %160 = vmatpush.bf16.msra.mxu0 %v273_v4 }
   0xb   :  { %174 = vmatpush.bf16.msra.mxu1 %v281_v5 }
   0xe   :  { %161 = vmatpush.bf16.msra.mxu0 %v272_v6 }
   0xf   :  { %175 = vmatpush.bf16.msra.mxu1 %v280_v7 }
  0x12   :  { %162 = vmatpush.bf16.msra.mxu0 %v271_v8 }
  0x13   :  { %176 = vmatpush.bf16.msra.mxu1 %v279_v9 }
  0x16   :  { %163 = vmatpush.bf16.msra.mxu0 %v270_v10 }
  0x17   :  { %177 = vmatpush.bf16.msra.mxu1 %v278_v11 }
  0x1a   :  { %164 = vmatpush.bf16.msra.mxu0 %v269_v12 }
  0x1b   :  { %178 = vmatpush.bf16.msra.mxu1 %v277_v13 }
  0x1e   :  { %165 = vmatpush.bf16.msra.mxu0 %v268_v14 }
  0x1f   :  { %179 = vmatpush.bf16.msra.mxu1 %v276_v15 }
  0x21   :  { %166 = vmatmul.bf16.vlgmr.msra.gmra.mxu0 %v197_v20 }
  0x22   :  { %180 = vmatmul.bf16.vlgmr.msra.gmra.mxu1 %v201_v21 }
  0x9e   :  { %v167_v22 = vpop.f32.mrf.mxu0 }
  0x9f   :  { %v181_v23 = vpop.f32.mrf.mxu1  ;;  %v168_v25 = vadd.f32 %v289_v24, %v167_v22 }
  0xa1   :  { %v182_v29 = vadd.f32 %v181_v23, %v168_v25 }
  0xa6   :  { %v169_v26 = vpop.f32.mrf.mxu0 }
  0xa7   :  { %v170_v27 = vadd.f32 %v289_v24, %v169_v26  ;;  %v183_v28 = vpop.f32.mrf.mxu1 }
  0xa9   :  { %v184_v30 = vadd.f32 %v183_v28, %v170_v27 }
  0xab   :  { %v287_v31 = vpack.c.bf16 %v184_v30, %v182_v29 }
  0xad   :  { %288 = vst [vmem:[%s379_s3] sm:$0xff] %v287_v31  }

// kernel: _forward.32
= control target key start
LH: loop header
LB: loop body
LE: loop exit
PB: predicated region body
PF: predicated region fallthrough
CT: control target
= control target key end

     0   :  { %s694_s1 = inlined_call_operand.vmem [shape: bf16[512,128], index: 1, kind: input, shape index: {}]   ;;  %s695_s2 = inlined_call_operand.vmem [shape: f32[1,128], index: 2, kind: input, shape index: {}]   ;;  %s696_s0 = inlined_call_operand.vmem [shape: bf16[16,512], index: 0, kind: input, shape index: {}]   ;;  %s697_s3 = inlined_call_operand.vmem [shape: bf16[16,128], index: 3, kind: output, shape index: {}]  }
   0x1   :  { %v517_v0 = vld [vmem:[%s694_s1 + $0x38] sm:$0xff]  ;;  %v516_v4 = vld [vmem:[%s694_s1 + $0x30] sm:$0xff]  ;;  %v515_v8 = vld [vmem:[%s694_s1 + $0x28] sm:$0xff] }
   0x2   :  { %v525_v1 = vld [vmem:[%s694_s1 + $0x78] sm:$0xff]  ;;  %298 = vmatpush.bf16.msra.mxu0 %v517_v0  ;;  %v524_v5 = vld [vmem:[%s694_s1 + $0x70] sm:$0xff]  ;;  %v523_v9 = vld [vmem:[%s694_s1 + $0x68] sm:$0xff] }
   0x3   :  { %v533_v2 = vld [vmem:[%s694_s1 + $0xb8] sm:$0xff]  ;;  %312 = vmatpush.bf16.msra.mxu1 %v525_v1  ;;  %v532_v6 = vld [vmem:[%s694_s1 + $0xb0] sm:$0xff]  ;;  %v531_v10 = vld [vmem:[%s694_s1 + $0xa8] sm:$0xff] }
   0x4   :  { %v541_v3 = vld [vmem:[%s694_s1 + $0xf8] sm:$0xff]  ;;  %326 = vmatpush.bf16.msra.mxu2 %v533_v2  ;;  %v540_v7 = vld [vmem:[%s694_s1 + $0xf0] sm:$0xff]  ;;  %v539_v11 = vld [vmem:[%s694_s1 + $0xe8] sm:$0xff] }
   0x5   :  { %340 = vmatpush.bf16.msra.mxu3 %v541_v3  ;;  %v514_v12 = vld [vmem:[%s694_s1 + $0x20] sm:$0xff]  ;;  %v513_v16 = vld [vmem:[%s694_s1 + $0x18] sm:$0xff]  ;;  %v512_v20 = vld [vmem:[%s694_s1 + $0x10] sm:$0xff] }
   0x6   :  { %299 = vmatpush.bf16.msra.mxu0 %v516_v4  ;;  %v522_v13 = vld [vmem:[%s694_s1 + $0x60] sm:$0xff]  ;;  %v521_v17 = vld [vmem:[%s694_s1 + $0x58] sm:$0xff]  ;;  %v520_v21 = vld [vmem:[%s694_s1 + $0x50] sm:$0xff] }
   0x7   :  { %313 = vmatpush.bf16.msra.mxu1 %v524_v5  ;;  %v530_v14 = vld [vmem:[%s694_s1 + $0xa0] sm:$0xff]  ;;  %v529_v18 = vld [vmem:[%s694_s1 + $0x98] sm:$0xff]  ;;  %v528_v22 = vld [vmem:[%s694_s1 + $0x90] sm:$0xff] }
   0x8   :  { %327 = vmatpush.bf16.msra.mxu2 %v532_v6  ;;  %v538_v15 = vld [vmem:[%s694_s1 + $0xe0] sm:$0xff]  ;;  %v537_v19 = vld [vmem:[%s694_s1 + $0xd8] sm:$0xff]  ;;  %v536_v23 = vld [vmem:[%s694_s1 + $0xd0] sm:$0xff] }
   0x9   :  { %341 = vmatpush.bf16.msra.mxu3 %v540_v7  ;;  %v511_v24 = vld [vmem:[%s694_s1 + $0x8] sm:$0xff]  ;;  %v510_v28 = vld [vmem:[%s694_s1] sm:$0xff]  ;;  %v508_v33 = vld [vmem:[%s696_s0 + $0xc] sm:$0xf0] }
   0xa   :  { %300 = vmatpush.bf16.msra.mxu0 %v515_v8  ;;  %v519_v25 = vld [vmem:[%s694_s1 + $0x48] sm:$0xff]  ;;  %v518_v29 = vld [vmem:[%s694_s1 + $0x40] sm:$0xff]  ;;  %v366_v35 = vld [vmem:[%s696_s0 + $0x10] sm:$0xf0] }
   0xb   :  { %314 = vmatpush.bf16.msra.mxu1 %v523_v9  ;;  %v527_v26 = vld [vmem:[%s694_s1 + $0x88] sm:$0xff]  ;;  %v526_v30 = vld [vmem:[%s694_s1 + $0x80] sm:$0xff]  ;;  %v509_v37 = vld [vmem:[%s696_s0 + $0x14] sm:$0xf0] }
   0xc   :  { %328 = vmatpush.bf16.msra.mxu2 %v531_v10  ;;  %v535_v27 = vld [vmem:[%s694_s1 + $0xc8] sm:$0xff]  ;;  %v534_v31 = vld [vmem:[%s694_s1 + $0xc0] sm:$0xff]  ;;  %v374_v39 = vld [vmem:[%s696_s0 + $0x18] sm:$0xf0] }
   0xd   :  { %342 = vmatpush.bf16.msra.mxu3 %v539_v11  ;;  %v364_v32 = vld [vmem:[%s696_s0] sm:$0xf]  ;;  %v506_v34 = vld [vmem:[%s696_s0 + $0x4] sm:$0xf]  ;;  %v372_v36 = vld [vmem:[%s696_s0 + $0x8] sm:$0xf] }
   0xe   :  { %301 = vmatpush.bf16.msra.mxu0 %v514_v12  ;;  %v507_v38 = vld [vmem:[%s696_s0 + $0xc] sm:$0xf]  ;;  %v365_v40 = vor.u32 %v508_v33, %v364_v32  ;;  %v369_v41 = vor.u32 %v506_v34, %v366_v35  ;;  %v373_v42 = vor.u32 %v509_v37, %v372_v36  ;;  %v547_v45 = vld [vmem:[%s695_s2] ss:$0 sm:$0xff] }
   0xf   :  { %315 = vmatpush.bf16.msra.mxu1 %v522_v13  ;;  %v377_v43 = vor.u32 %v507_v38, %v374_v39 }
  0x10   :  { %329 = vmatpush.bf16.msra.mxu2 %v530_v14 }
  0x11   :  { %343 = vmatpush.bf16.msra.mxu3 %v538_v15 }
  0x12   :  { %302 = vmatpush.bf16.msra.mxu0 %v513_v16 }
  0x13   :  { %316 = vmatpush.bf16.msra.mxu1 %v521_v17 }
  0x14   :  { %330 = vmatpush.bf16.msra.mxu2 %v529_v18 }
  0x15   :  { %344 = vmatpush.bf16.msra.mxu3 %v537_v19 }
  0x16   :  { %303 = vmatpush.bf16.msra.mxu0 %v512_v20 }
  0x17   :  { %317 = vmatpush.bf16.msra.mxu1 %v520_v21 }
  0x18   :  { %331 = vmatpush.bf16.msra.mxu2 %v528_v22 }
  0x19   :  { %345 = vmatpush.bf16.msra.mxu3 %v536_v23 }
  0x1a   :  { %304 = vmatpush.bf16.msra.mxu0 %v511_v24 }
  0x1b   :  { %318 = vmatpush.bf16.msra.mxu1 %v519_v25 }
  0x1c   :  { %332 = vmatpush.bf16.msra.mxu2 %v527_v26 }
  0x1d   :  { %346 = vmatpush.bf16.msra.mxu3 %v535_v27 }
  0x1e   :  { %305 = vmatpush.bf16.msra.mxu0 %v510_v28 }
  0x1f   :  { %319 = vmatpush.bf16.msra.mxu1 %v518_v29 }
  0x20   :  { %333 = vmatpush.bf16.msra.mxu2 %v526_v30 }
  0x21   :  { %347 = vmatpush.bf16.msra.mxu3 %v534_v31  ;;  %306 = vmatmul.bf16.vlgmr.msra.gmra.mxu0 %v365_v40 }
  0x22   :  { %320 = vmatmul.bf16.vlgmr.msra.gmra.mxu1 %v369_v41 }
  0x23   :  { %334 = vmatmul.bf16.vlgmr.msra.gmra.mxu2 %v373_v42 }
  0x24   :  { %348 = vmatmul.bf16.vlgmr.msra.gmra.mxu3 %v377_v43 }
  0x9e   :  { %v307_v44 = vpop.f32.mrf.mxu0 }
  0x9f   :  { %v321_v46 = vpop.f32.mrf.mxu1  ;;  %v308_v47 = vadd.f32 %v547_v45, %v307_v44 }
  0xa1   :  { %v322_v51 = vadd.f32 %v321_v46, %v308_v47 }
  0xa6   :  { %v335_v48 = vpop.f32.mrf.mxu2  ;;  %v309_v50 = vpop.f32.mrf.mxu0 }
  0xa7   :  { %v349_v49 = vpop.f32.mrf.mxu3  ;;  %v310_v52 = vadd.f32 %v547_v45, %v309_v50  ;;  %v323_v53 = vpop.f32.mrf.mxu1  ;;  %v336_v54 = vadd.f32 %v335_v48, %v322_v51 }
  0xa9   :  { %v324_v55 = vadd.f32 %v323_v53, %v310_v52  ;;  %v350_v59 = vadd.f32 %v349_v49, %v336_v54 }
  0xae   :  { %v337_v56 = vpop.f32.mrf.mxu2 }
  0xaf   :  { %v338_v57 = vadd.f32 %v337_v56, %v324_v55  ;;  %v351_v58 = vpop.f32.mrf.mxu3 }
  0xb1   :  { %v352_v60 = vadd.f32 %v351_v58, %v338_v57 }
  0xb3   :  { %v545_v61 = vpack.c.bf16 %v352_v60, %v350_v59 }
  0xb5   :  { %546 = vst [vmem:[%s697_s3] sm:$0xff] %v545_v61  }

// kernel: _forward.31
= control target key start
LH: loop header
LB: loop body
LE: loop exit
PB: predicated region body
PF: predicated region fallthrough
CT: control target
= control target key end

     0   :  { %s3194_s1 = inlined_call_operand.vmem [shape: bf16[640,512], index: 1, kind: input, shape index: {}]   ;;  %s3195_s0 = inlined_call_operand.vmem [shape: bf16[16,640], index: 0, kind: input, shape index: {}]   ;;  %s3196_s2 = inlined_call_operand.vmem [shape: f32[1,512], index: 2, kind: input, shape index: {}]   ;;  %s3197_s3 = inlined_call_operand.vmem [shape: bf16[16,512], index: 3, kind: output, shape index: {}]  }
   0x1   :  { %v1442_v0 = vld [vmem:[%s3194_s1 + $0xe0] sm:$0xf]  ;;  %v2003_v1 = vld [vmem:[%s3194_s1 + $0xec] sm:$0xf0] }
   0x2   :  { %v1570_v2 = vld [vmem:[%s3194_s1 + $0x1e0] sm:$0xf]  ;;  %v1443_v3 = vor.u32 %v2003_v1, %v1442_v0  ;;  %v2035_v4 = vld [vmem:[%s3194_s1 + $0x1ec] sm:$0xf0] }
   0x3   :  { %v1698_v5 = vld [vmem:[%s3194_s1 + $0x2e0] sm:$0xf]  ;;  %v2067_v6 = vld [vmem:[%s3194_s1 + $0x2ec] sm:$0xf0]  ;;  %v1571_v7 = vor.u32 %v2035_v4, %v1570_v2 }
   0x4   :  { %v1699_v8 = vor.u32 %v2067_v6, %v1698_v5  ;;  %v1826_v9 = vld [vmem:[%s3194_s1 + $0x3e0] sm:$0xf]  ;;  %v2099_v10 = vld [vmem:[%s3194_s1 + $0x3ec] sm:$0xf0]  ;;  %1016 = vmatpush.bf16.msra.mxu0 %v1443_v3 }
   0x5   :  { %v1426_v11 = vld [vmem:[%s3194_s1 + $0xc0] sm:$0xf]  ;;  %v1827_v12 = vor.u32 %v2099_v10, %v1826_v9  ;;  %v1999_v13 = vld [vmem:[%s3194_s1 + $0xcc] sm:$0xf0]  ;;  %1030 = vmatpush.bf16.msra.mxu1 %v1571_v7 }
   0x6   :  { %v1554_v14 = vld [vmem:[%s3194_s1 + $0x1c0] sm:$0xf]  ;;  %v2031_v15 = vld [vmem:[%s3194_s1 + $0x1cc] sm:$0xf0]  ;;  %1044 = vmatpush.bf16.msra.mxu2 %v1699_v8  ;;  %v1427_v16 = vor.u32 %v1999_v13, %v1426_v11 }
   0x7   :  { %v1555_v17 = vor.u32 %v2031_v15, %v1554_v14  ;;  %v1682_v18 = vld [vmem:[%s3194_s1 + $0x2c0] sm:$0xf]  ;;  %v2063_v19 = vld [vmem:[%s3194_s1 + $0x2cc] sm:$0xf0]  ;;  %1058 = vmatpush.bf16.msra.mxu3 %v1827_v12 }
   0x8   :  { %v1810_v20 = vld [vmem:[%s3194_s1 + $0x3c0] sm:$0xf]  ;;  %v1683_v21 = vor.u32 %v2063_v19, %v1682_v18  ;;  %v2095_v22 = vld [vmem:[%s3194_s1 + $0x3cc] sm:$0xf0]  ;;  %1017 = vmatpush.bf16.msra.mxu0 %v1427_v16 }
   0x9   :  { %v1410_v23 = vld [vmem:[%s3194_s1 + $0xa0] sm:$0xf]  ;;  %v1995_v24 = vld [vmem:[%s3194_s1 + $0xac] sm:$0xf0]  ;;  %v1811_v25 = vor.u32 %v2095_v22, %v1810_v20  ;;  %1031 = vmatpush.bf16.msra.mxu1 %v1555_v17 }
   0xa   :  { %v1538_v26 = vld [vmem:[%s3194_s1 + $0x1a0] sm:$0xf]  ;;  %v2027_v27 = vld [vmem:[%s3194_s1 + $0x1ac] sm:$0xf0]  ;;  %v1411_v29 = vor.u32 %v1995_v24, %v1410_v23  ;;  %1045 = vmatpush.bf16.msra.mxu2 %v1683_v21 }
   0xb   :  { %v1666_v28 = vld [vmem:[%s3194_s1 + $0x2a0] sm:$0xf]  ;;  %v2059_v30 = vld [vmem:[%s3194_s1 + $0x2ac] sm:$0xf0]  ;;  %v1539_v33 = vor.u32 %v2027_v27, %v1538_v26  ;;  %1059 = vmatpush.bf16.msra.mxu3 %v1811_v25 }
   0xc   :  { %v1794_v31 = vld [vmem:[%s3194_s1 + $0x3a0] sm:$0xf]  ;;  %v2091_v32 = vld [vmem:[%s3194_s1 + $0x3ac] sm:$0xf0]  ;;  %v1667_v34 = vor.u32 %v2059_v30, %v1666_v28  ;;  %1018 = vmatpush.bf16.msra.mxu0 %v1411_v29  ;;  %v2001_v30 = vld [vmem:[%s3194_s1 + $0xe4] sm:$0xf] }
   0xd   :  { %v1394_v35 = vld [vmem:[%s3194_s1 + $0x80] sm:$0xf]  ;;  %v1991_v36 = vld [vmem:[%s3194_s1 + $0x8c] sm:$0xf0]  ;;  %v1795_v38 = vor.u32 %v2091_v32, %v1794_v31  ;;  %1032 = vmatpush.bf16.msra.mxu1 %v1539_v33  ;;  %v1444_v32 = vld [vmem:[%s3194_s1 + $0xf0] sm:$0xf0] }
   0xe   :  { %v1522_v37 = vld [vmem:[%s3194_s1 + $0x180] sm:$0xf]  ;;  %v2023_v39 = vld [vmem:[%s3194_s1 + $0x18c] sm:$0xf0]  ;;  %v1395_v44 = vor.u32 %v1991_v36, %v1394_v35  ;;  %1046 = vmatpush.bf16.msra.mxu2 %v1667_v34  ;;  %v2033_v33 = vld [vmem:[%s3194_s1 + $0x1e4] sm:$0xf] }
   0xf   :  { %v1650_v40 = vld [vmem:[%s3194_s1 + $0x280] sm:$0xf]  ;;  %v2055_v41 = vld [vmem:[%s3194_s1 + $0x28c] sm:$0xf0]  ;;  %v1523_v45 = vor.u32 %v2023_v39, %v1522_v37  ;;  %1060 = vmatpush.bf16.msra.mxu3 %v1795_v38  ;;  %v1572_v34 = vld [vmem:[%s3194_s1 + $0x1f0] sm:$0xf0] }
  0x10   :  { %v1778_v42 = vld [vmem:[%s3194_s1 + $0x380] sm:$0xf]  ;;  %v2087_v43 = vld [vmem:[%s3194_s1 + $0x38c] sm:$0xf0]  ;;  %v1651_v46 = vor.u32 %v2055_v41, %v1650_v40  ;;  %1019 = vmatpush.bf16.msra.mxu0 %v1395_v44  ;;  %v2065_v37 = vld [vmem:[%s3194_s1 + $0x2e4] sm:$0xf] }
  0x11   :  { %v1378_v47 = vld [vmem:[%s3194_s1 + $0x60] sm:$0xf]  ;;  %v1987_v48 = vld [vmem:[%s3194_s1 + $0x6c] sm:$0xf0]  ;;  %v1779_v50 = vor.u32 %v2087_v43, %v1778_v42  ;;  %1033 = vmatpush.bf16.msra.mxu1 %v1523_v45  ;;  %v1700_v38 = vld [vmem:[%s3194_s1 + $0x2f0] sm:$0xf0]  ;;  %v1447_v42 = vor.u32 %v2001_v30, %v1444_v32  ;;  %v1575_v43 = vor.u32 %v2033_v33, %v1572_v34 }
  0x12   :  { %v1506_v49 = vld [vmem:[%s3194_s1 + $0x160] sm:$0xf]  ;;  %v2019_v51 = vld [vmem:[%s3194_s1 + $0x16c] sm:$0xf0]  ;;  %v1379_v56 = vor.u32 %v1987_v48, %v1378_v47  ;;  %1047 = vmatpush.bf16.msra.mxu2 %v1651_v46  ;;  %v1997_v45 = vld [vmem:[%s3194_s1 + $0xc4] sm:$0xf]  ;;  %v1703_v47 = vor.u32 %v2065_v37, %v1700_v38 }
  0x13   :  { %v1634_v52 = vld [vmem:[%s3194_s1 + $0x260] sm:$0xf]  ;;  %v2051_v53 = vld [vmem:[%s3194_s1 + $0x26c] sm:$0xf0]  ;;  %v1507_v57 = vor.u32 %v2019_v51, %v1506_v49  ;;  %1061 = vmatpush.bf16.msra.mxu3 %v1779_v50  ;;  %v1428_v46 = vld [vmem:[%s3194_s1 + $0xd0] sm:$0xf0] }
  0x14   :  { %v1762_v54 = vld [vmem:[%s3194_s1 + $0x360] sm:$0xf]  ;;  %v2083_v55 = vld [vmem:[%s3194_s1 + $0x36c] sm:$0xf0]  ;;  %v1635_v58 = vor.u32 %v2051_v53, %v1634_v52  ;;  %1020 = vmatpush.bf16.msra.mxu0 %v1379_v56  ;;  %v2029_v48 = vld [vmem:[%s3194_s1 + $0x1c4] sm:$0xf]  ;;  %v1431_v56 = vor.u32 %v1997_v45, %v1428_v46 }
  0x15   :  { %v1362_v59 = vld [vmem:[%s3194_s1 + $0x40] sm:$0xf]  ;;  %v1983_v60 = vld [vmem:[%s3194_s1 + $0x4c] sm:$0xf0]  ;;  %v1763_v62 = vor.u32 %v2083_v55, %v1762_v54  ;;  %1034 = vmatpush.bf16.msra.mxu1 %v1507_v57  ;;  %v1556_v49 = vld [vmem:[%s3194_s1 + $0x1d0] sm:$0xf0] }
  0x16   :  { %v1490_v61 = vld [vmem:[%s3194_s1 + $0x140] sm:$0xf]  ;;  %v2015_v63 = vld [vmem:[%s3194_s1 + $0x14c] sm:$0xf0]  ;;  %v1363_v4 = vor.u32 %v1983_v60, %v1362_v59  ;;  %1048 = vmatpush.bf16.msra.mxu2 %v1635_v58  ;;  %v2061_v50 = vld [vmem:[%s3194_s1 + $0x2c4] sm:$0xf]  ;;  %v1559_v57 = vor.u32 %v2029_v48, %v1556_v49 }
  0x17   :  { %v1618_v0 = vld [vmem:[%s3194_s1 + $0x240] sm:$0xf]  ;;  %v2047_v1 = vld [vmem:[%s3194_s1 + $0x24c] sm:$0xf0]  ;;  %v1491_v5 = vor.u32 %v2015_v63, %v1490_v61  ;;  %1062 = vmatpush.bf16.msra.mxu3 %v1763_v62  ;;  %v1684_v51 = vld [vmem:[%s3194_s1 + $0x2d0] sm:$0xf0] }
  0x18   :  { %v1746_v2 = vld [vmem:[%s3194_s1 + $0x340] sm:$0xf]  ;;  %v2079_v3 = vld [vmem:[%s3194_s1 + $0x34c] sm:$0xf0]  ;;  %v1619_v6 = vor.u32 %v2047_v1, %v1618_v0  ;;  %1021 = vmatpush.bf16.msra.mxu0 %v1363_v4  ;;  %v1970_v53 = vld [vmem:[%s3195_s0 + $0x10] sm:$0xf0]  ;;  %v1687_v61 = vor.u32 %v2061_v50, %v1684_v51 }
  0x19   :  { %v1346_v7 = vld [vmem:[%s3194_s1 + $0x20] sm:$0xf]  ;;  %v1979_v8 = vld [vmem:[%s3194_s1 + $0x2c] sm:$0xf0]  ;;  %v1747_v10 = vor.u32 %v2079_v3, %v1746_v2  ;;  %1035 = vmatpush.bf16.msra.mxu1 %v1491_v5  ;;  %v1993_v60 = vld [vmem:[%s3194_s1 + $0xa4] sm:$0xf] }
  0x1a   :  { %v1474_v9 = vld [vmem:[%s3194_s1 + $0x120] sm:$0xf]  ;;  %v2011_v11 = vld [vmem:[%s3194_s1 + $0x12c] sm:$0xf0]  ;;  %v1347_v16 = vor.u32 %v1979_v8, %v1346_v7  ;;  %1049 = vmatpush.bf16.msra.mxu2 %v1619_v6  ;;  %v1412_v62 = vld [vmem:[%s3194_s1 + $0xb0] sm:$0xf0] }
  0x1b   :  { %v1602_v12 = vld [vmem:[%s3194_s1 + $0x220] sm:$0xf]  ;;  %v2043_v13 = vld [vmem:[%s3194_s1 + $0x22c] sm:$0xf0]  ;;  %v1475_v19 = vor.u32 %v2011_v11, %v1474_v9  ;;  %1063 = vmatpush.bf16.msra.mxu3 %v1747_v10  ;;  %v2025_v63 = vld [vmem:[%s3194_s1 + $0x1a4] sm:$0xf]  ;;  %v1415_v8 = vor.u32 %v1993_v60, %v1412_v62 }
  0x1c   :  { %v1730_v14 = vld [vmem:[%s3194_s1 + $0x320] sm:$0xf]  ;;  %v2075_v15 = vld [vmem:[%s3194_s1 + $0x32c] sm:$0xf0]  ;;  %v1603_v20 = vor.u32 %v2043_v13, %v1602_v12  ;;  %1022 = vmatpush.bf16.msra.mxu0 %v1347_v16  ;;  %v1540_v0 = vld [vmem:[%s3194_s1 + $0x1b0] sm:$0xf0] }
  0x1d   :  { %v1330_v17 = vld [vmem:[%s3194_s1] sm:$0xf]  ;;  %v1975_v18 = vld [vmem:[%s3194_s1 + $0xc] sm:$0xf0]  ;;  %v1731_v24 = vor.u32 %v2075_v15, %v1730_v14  ;;  %1036 = vmatpush.bf16.msra.mxu1 %v1475_v19  ;;  %v2057_v1 = vld [vmem:[%s3194_s1 + $0x2a4] sm:$0xf]  ;;  %v1543_v9 = vor.u32 %v2025_v63, %v1540_v0 }
  0x1e   :  { %v1458_v21 = vld [vmem:[%s3194_s1 + $0x100] sm:$0xf]  ;;  %v2007_v22 = vld [vmem:[%s3194_s1 + $0x10c] sm:$0xf0]  ;;  %v1331_v31 = vor.u32 %v1975_v18, %v1330_v17  ;;  %1050 = vmatpush.bf16.msra.mxu2 %v1603_v20  ;;  %v1668_v2 = vld [vmem:[%s3194_s1 + $0x2b0] sm:$0xf0] }
  0x1f   :  { %v1586_v23 = vld [vmem:[%s3194_s1 + $0x200] sm:$0xf]  ;;  %v2039_v25 = vld [vmem:[%s3194_s1 + $0x20c] sm:$0xf0]  ;;  %v1459_v35 = vor.u32 %v2007_v22, %v1458_v21  ;;  %1064 = vmatpush.bf16.msra.mxu3 %v1731_v24  ;;  %v1989_v6 = vld [vmem:[%s3194_s1 + $0x84] sm:$0xf]  ;;  %v1671_v13 = vor.u32 %v2057_v1, %v1668_v2 }
  0x20   :  { %v1714_v26 = vld [vmem:[%s3194_s1 + $0x300] sm:$0xf]  ;;  %v2071_v27 = vld [vmem:[%s3194_s1 + $0x30c] sm:$0xf0]  ;;  %v1587_v36 = vor.u32 %v2039_v25, %v1586_v23  ;;  %1023 = vmatpush.bf16.msra.mxu0 %v1331_v31  ;;  %v1396_v7 = vld [vmem:[%s3194_s1 + $0x90] sm:$0xf0] }
  0x21   :  { %v1954_v28 = vld [vmem:[%s3194_s1 + $0x4e0] sm:$0xf]  ;;  %v2131_v29 = vld [vmem:[%s3194_s1 + $0x4ec] sm:$0xf0]  ;;  %v1715_v39 = vor.u32 %v2071_v27, %v1714_v26  ;;  %1037 = vmatpush.bf16.msra.mxu1 %v1459_v35  ;;  %v1318_v10 = vld [vmem:[%s3195_s0 + $0x8] sm:$0xf]  ;;  %v1399_v24 = vor.u32 %v1989_v6, %v1396_v7 }
  0x22   :  { %v1955_v40 = vor.u32 %v2131_v29, %v1954_v28  ;;  %v1938_v41 = vld [vmem:[%s3194_s1 + $0x4c0] sm:$0xf]  ;;  %v2127_v44 = vld [vmem:[%s3194_s1 + $0x4cc] sm:$0xf0]  ;;  %1051 = vmatpush.bf16.msra.mxu2 %v1587_v36  ;;  %v1971_v11 = vld [vmem:[%s3195_s0 + $0x18] sm:$0xf0] }
  0x23   :  { %v1310_v52 = vld [vmem:[%s3195_s0] sm:$0xf]  ;;  %1065 = vmatpush.bf16.msra.mxu3 %v1715_v39  ;;  %v1939_v54 = vor.u32 %v2127_v44, %v1938_v41  ;;  %v2123_v59 = vld [vmem:[%s3194_s1 + $0x4ac] sm:$0xf0]  ;;  %v1969_v12 = vld [vmem:[%s3195_s0 + $0xc] sm:$0xf]  ;;  %v2453_v16 = vor.u32 %v1971_v11, %v1318_v10 }
  0x24   :  { %1072 = vmatpush.bf16.msrb.mxu0 %v1955_v40  ;;  %v2399_v55 = vor.u32 %v1970_v53, %v1310_v52  ;;  %v1922_v58 = vld [vmem:[%s3194_s1 + $0x4a0] sm:$0xf]  ;;  %v2119_v5 = vld [vmem:[%s3194_s1 + $0x48c] sm:$0xf0]  ;;  %v2021_v14 = vld [vmem:[%s3194_s1 + $0x184] sm:$0xf] }
  0x25   :  { %1086 = vmatpush.bf16.msrb.mxu1 %v1447_v42  ;;  %v1906_v3 = vld [vmem:[%s3194_s1 + $0x480] sm:$0xf]  ;;  %v1923_v4 = vor.u32 %v2123_v59, %v1922_v58  ;;  %v1524_v15 = vld [vmem:[%s3194_s1 + $0x190] sm:$0xf0]  ;;  %v2053_v18 = vld [vmem:[%s3194_s1 + $0x284] sm:$0xf]  ;;  %1052 = vmatmul.bf16.vlgmr.msra.gmra.mxu2 %v2453_v16 }
  0x26   :  { %1100 = vmatpush.bf16.msrb.mxu2 %v1575_v43  ;;  %1024 = vmatmul.bf16.vlgmr.msra.gmra.mxu0 %v2399_v55  ;;  %v1320_v17 = vld [vmem:[%s3195_s0 + $0x1c] sm:$0xf0]  ;;  %v1652_v19 = vld [vmem:[%s3194_s1 + $0x290] sm:$0xf0]  ;;  %v1907_v21 = vor.u32 %v2119_v5, %v1906_v3  ;;  %v2115_v23 = vld [vmem:[%s3194_s1 + $0x46c] sm:$0xf0]  ;;  %v1527_v25 = vor.u32 %v2021_v14, %v1524_v15 }
  0x27   :  { %1114 = vmatpush.bf16.msrb.mxu3 %v1703_v47  ;;  %v2464_v20 = vor.u32 %v1969_v12, %v1320_v17  ;;  %v1890_v22 = vld [vmem:[%s3194_s1 + $0x460] sm:$0xf]  ;;  %v1985_v26 = vld [vmem:[%s3194_s1 + $0x64] sm:$0xf]  ;;  %v1312_v28 = vld [vmem:[%s3195_s0 + $0x14] sm:$0xf0]  ;;  %v1655_v29 = vor.u32 %v2053_v18, %v1652_v19 }
  0x28   :  { %1073 = vmatpush.bf16.msrb.mxu0 %v1939_v54  ;;  %v1968_v27 = vld [vmem:[%s3195_s0 + $0x4] sm:$0xf]  ;;  %v1380_v30 = vld [vmem:[%s3194_s1 + $0x70] sm:$0xf0]  ;;  %v1891_v36 = vor.u32 %v2115_v23, %v1890_v22  ;;  %v1874_v39 = vld [vmem:[%s3194_s1 + $0x440] sm:$0xf] }
  0x29   :  { %1087 = vmatpush.bf16.msrb.mxu1 %v1431_v56  ;;  %v2017_v31 = vld [vmem:[%s3194_s1 + $0x164] sm:$0xf]  ;;  %v1508_v32 = vld [vmem:[%s3194_s1 + $0x170] sm:$0xf0]  ;;  %v2491_v33 = vor.u32 %v1968_v27, %v1312_v28  ;;  %1066 = vmatmul.bf16.vlgmr.msra.gmra.mxu3 %v2464_v20  ;;  %v1383_v37 = vor.u32 %v1985_v26, %v1380_v30  ;;  %v2111_v40 = vld [vmem:[%s3194_s1 + $0x44c] sm:$0xf0] }
  0x2a   :  { %1101 = vmatpush.bf16.msrb.mxu2 %v1559_v57  ;;  %v2049_v34 = vld [vmem:[%s3194_s1 + $0x264] sm:$0xf]  ;;  %v1636_v35 = vld [vmem:[%s3194_s1 + $0x270] sm:$0xf0]  ;;  %v1511_v38 = vor.u32 %v2017_v31, %v1508_v32  ;;  %v1875_v48 = vor.u32 %v2111_v40, %v1874_v39  ;;  %v1858_v51 = vld [vmem:[%s3194_s1 + $0x420] sm:$0xf] }
  0x2b   :  { %1115 = vmatpush.bf16.msrb.mxu3 %v1687_v61  ;;  %1038 = vmatmul.bf16.vlgmr.msra.gmra.mxu1 %v2491_v33  ;;  %v1981_v41 = vld [vmem:[%s3194_s1 + $0x44] sm:$0xf]  ;;  %v1639_v42 = vor.u32 %v2049_v34, %v1636_v35  ;;  %v1364_v43 = vld [vmem:[%s3194_s1 + $0x50] sm:$0xf0]  ;;  %v2107_v52 = vld [vmem:[%s3194_s1 + $0x42c] sm:$0xf0] }
  0x2c   :  { %1074 = vmatpush.bf16.msrb.mxu0 %v1923_v4  ;;  %v2013_v44 = vld [vmem:[%s3194_s1 + $0x144] sm:$0xf]  ;;  %v1492_v45 = vld [vmem:[%s3194_s1 + $0x150] sm:$0xf0]  ;;  %v1367_v49 = vor.u32 %v1981_v41, %v1364_v43  ;;  %v1859_v61 = vor.u32 %v2107_v52, %v1858_v51  ;;  %v1842_v62 = vld [vmem:[%s3194_s1 + $0x400] sm:$0xf] }
  0x2d   :  { %1088 = vmatpush.bf16.msrb.mxu1 %v1415_v8  ;;  %v2045_v46 = vld [vmem:[%s3194_s1 + $0x244] sm:$0xf]  ;;  %v1620_v47 = vld [vmem:[%s3194_s1 + $0x250] sm:$0xf0]  ;;  %v1495_v50 = vor.u32 %v2013_v44, %v1492_v45  ;;  %v2103_v63 = vld [vmem:[%s3194_s1 + $0x40c] sm:$0xf0] }
  0x2e   :  { %1102 = vmatpush.bf16.msrb.mxu2 %v1543_v9  ;;  %v1977_v53 = vld [vmem:[%s3194_s1 + $0x24] sm:$0xf]  ;;  %v1623_v54 = vor.u32 %v2045_v46, %v1620_v47  ;;  %v1348_v56 = vld [vmem:[%s3194_s1 + $0x30] sm:$0xf0]  ;;  %v1450_v14 = vld [vmem:[%s3194_s1 + $0xe8] sm:$0xf] }
  0x2f   :  { %1116 = vmatpush.bf16.msrb.mxu3 %v1671_v13  ;;  %v2009_v57 = vld [vmem:[%s3194_s1 + $0x124] sm:$0xf]  ;;  %v1476_v58 = vld [vmem:[%s3194_s1 + $0x130] sm:$0xf0]  ;;  %v1351_v1 = vor.u32 %v1977_v53, %v1348_v56  ;;  %v1843_v13 = vor.u32 %v2103_v63, %v1842_v62  ;;  %v2004_v15 = vld [vmem:[%s3194_s1 + $0xf4] sm:$0xf0] }
  0x30   :  { %1075 = vmatpush.bf16.msrb.mxu0 %v1907_v21  ;;  %v2041_v59 = vld [vmem:[%s3194_s1 + $0x224] sm:$0xf]  ;;  %v1604_v60 = vld [vmem:[%s3194_s1 + $0x230] sm:$0xf0]  ;;  %v1479_v2 = vor.u32 %v2009_v57, %v1476_v58  ;;  %v1578_v17 = vld [vmem:[%s3194_s1 + $0x1e8] sm:$0xf]  ;;  %v1451_v27 = vor.u32 %v2004_v15, %v1450_v14 }
  0x31   :  { %1089 = vmatpush.bf16.msrb.mxu1 %v1399_v24  ;;  %v1973_v0 = vld [vmem:[%s3194_s1 + $0x4] sm:$0xf]  ;;  %v1332_v3 = vld [vmem:[%s3194_s1 + $0x10] sm:$0xf0]  ;;  %v1607_v6 = vor.u32 %v2041_v59, %v1604_v60  ;;  %v2036_v21 = vld [vmem:[%s3194_s1 + $0x1f4] sm:$0xf0] }
  0x32   :  { %1103 = vmatpush.bf16.msrb.mxu2 %v1527_v25  ;;  %v2005_v4 = vld [vmem:[%s3194_s1 + $0x104] sm:$0xf]  ;;  %v1460_v5 = vld [vmem:[%s3194_s1 + $0x110] sm:$0xf0]  ;;  %v1335_v18 = vor.u32 %v1973_v0, %v1332_v3  ;;  %v1326_v22 = vld [vmem:[%s3195_s0 + $0x10] sm:$0xf]  ;;  %v1579_v31 = vor.u32 %v2036_v21, %v1578_v17 }
  0x33   :  { %1117 = vmatpush.bf16.msrb.mxu3 %v1655_v29  ;;  %v2037_v7 = vld [vmem:[%s3194_s1 + $0x204] sm:$0xf]  ;;  %v1588_v8 = vld [vmem:[%s3194_s1 + $0x210] sm:$0xf0]  ;;  %v1463_v19 = vor.u32 %v2005_v4, %v1460_v5  ;;  %v1434_v35 = vld [vmem:[%s3194_s1 + $0xc8] sm:$0xf] }
  0x34   :  { %1076 = vmatpush.bf16.msrb.mxu0 %v1891_v36  ;;  %v2097_v9 = vld [vmem:[%s3194_s1 + $0x3e4] sm:$0xf]  ;;  %v1828_v10 = vld [vmem:[%s3194_s1 + $0x3f0] sm:$0xf0]  ;;  %v1591_v24 = vor.u32 %v2037_v7, %v1588_v8  ;;  %v2000_v36 = vld [vmem:[%s3194_s1 + $0xd4] sm:$0xf0] }
  0x35   :  { %1090 = vmatpush.bf16.msrb.mxu1 %v1383_v37  ;;  %v2129_v11 = vld [vmem:[%s3194_s1 + $0x4e4] sm:$0xf]  ;;  %v1956_v12 = vld [vmem:[%s3194_s1 + $0x4f0] sm:$0xf0]  ;;  %v1831_v25 = vor.u32 %v2097_v9, %v1828_v10  ;;  %v1562_v37 = vld [vmem:[%s3194_s1 + $0x1c8] sm:$0xf]  ;;  %v1435_v41 = vor.u32 %v2000_v36, %v1434_v35 }
  0x36   :  { %1104 = vmatpush.bf16.msrb.mxu2 %v1511_v38  ;;  %v1972_v23 = vld [vmem:[%s3195_s0 + $0x20] sm:$0xf0]  ;;  %v1959_v26 = vor.u32 %v2129_v11, %v1956_v12  ;;  %v1812_v29 = vld [vmem:[%s3194_s1 + $0x3d0] sm:$0xf0]  ;;  %v2032_v38 = vld [vmem:[%s3194_s1 + $0x1d4] sm:$0xf0] }
  0x37   :  { %1118 = vmatpush.bf16.msrb.mxu3 %v1639_v42  ;;  %v2093_v28 = vld [vmem:[%s3194_s1 + $0x3c4] sm:$0xf]  ;;  %v2612_v32 = vor.u32 %v1972_v23, %v1326_v22  ;;  %v1940_v34 = vld [vmem:[%s3194_s1 + $0x4d0] sm:$0xf0]  ;;  %v1563_v45 = vor.u32 %v2032_v38, %v1562_v37  ;;  %v1418_v47 = vld [vmem:[%s3194_s1 + $0xa8] sm:$0xf] }
  0x38   :  { %1077 = vmatpush.bf16.msrb.mxu0 %v1875_v48  ;;  %v2125_v30 = vld [vmem:[%s3194_s1 + $0x4c4] sm:$0xf]  ;;  %v1815_v39 = vor.u32 %v2093_v28, %v1812_v29  ;;  %v1796_v43 = vld [vmem:[%s3194_s1 + $0x3b0] sm:$0xf0]  ;;  %v1996_v48 = vld [vmem:[%s3194_s1 + $0xb4] sm:$0xf0] }
  0x39   :  { %1091 = vmatpush.bf16.msrb.mxu1 %v1367_v49  ;;  %v1943_v40 = vor.u32 %v2125_v30, %v1940_v34  ;;  %v2089_v42 = vld [vmem:[%s3194_s1 + $0x3a4] sm:$0xf]  ;;  %v1924_v46 = vld [vmem:[%s3194_s1 + $0x4b0] sm:$0xf0]  ;;  %v1546_v49 = vld [vmem:[%s3194_s1 + $0x1a8] sm:$0xf]  ;;  %v1419_v53 = vor.u32 %v1996_v48, %v1418_v47 }
  0x3a   :  { %1105 = vmatpush.bf16.msrb.mxu2 %v1495_v50  ;;  %v2121_v44 = vld [vmem:[%s3194_s1 + $0x4a4] sm:$0xf]  ;;  %v2028_v50 = vld [vmem:[%s3194_s1 + $0x1b4] sm:$0xf0]  ;;  %v1799_v51 = vor.u32 %v2089_v42, %v1796_v43  ;;  %v1780_v56 = vld [vmem:[%s3194_s1 + $0x390] sm:$0xf0] }
  0x3b   :  { %1119 = vmatpush.bf16.msrb.mxu3 %v1623_v54  ;;  %v1927_v52 = vor.u32 %v2121_v44, %v1924_v46  ;;  %v2085_v54 = vld [vmem:[%s3194_s1 + $0x384] sm:$0xf]  ;;  %v1547_v58 = vor.u32 %v2028_v50, %v1546_v49  ;;  %v1908_v59 = vld [vmem:[%s3194_s1 + $0x490] sm:$0xf0]  ;;  %v1402_v60 = vld [vmem:[%s3194_s1 + $0x88] sm:$0xf] }
  0x3c   :  { %1078 = vmatpush.bf16.msrb.mxu0 %v1859_v61  ;;  %v2117_v57 = vld [vmem:[%s3194_s1 + $0x484] sm:$0xf]  ;;  %v1992_v61 = vld [vmem:[%s3194_s1 + $0x94] sm:$0xf0]  ;;  %v1530_v62 = vld [vmem:[%s3194_s1 + $0x188] sm:$0xf]  ;;  %v1783_v0 = vor.u32 %v2085_v54, %v1780_v56 }
  0x3d   :  { %1092 = vmatpush.bf16.msrb.mxu1 %v1351_v1  ;;  %v2024_v63 = vld [vmem:[%s3194_s1 + $0x194] sm:$0xf0]  ;;  %v1911_v1 = vor.u32 %v2117_v57, %v1908_v59  ;;  %v2081_v3 = vld [vmem:[%s3194_s1 + $0x364] sm:$0xf]  ;;  %v1764_v4 = vld [vmem:[%s3194_s1 + $0x370] sm:$0xf0] }
  0x3e   :  { %1106 = vmatpush.bf16.msrb.mxu2 %v1479_v2  ;;  %v1403_v2 = vor.u32 %v1992_v61, %v1402_v60  ;;  %v2113_v5 = vld [vmem:[%s3194_s1 + $0x464] sm:$0xf]  ;;  %v1892_v7 = vld [vmem:[%s3194_s1 + $0x470] sm:$0xf0]  ;;  %v1386_v8 = vld [vmem:[%s3194_s1 + $0x68] sm:$0xf]  ;;  %v1767_v12 = vor.u32 %v2081_v3, %v1764_v4 }
  0x3f   :  { %1120 = vmatpush.bf16.msrb.mxu3 %v1607_v6  ;;  %v1531_v6 = vor.u32 %v2024_v63, %v1530_v62  ;;  %v1988_v9 = vld [vmem:[%s3194_s1 + $0x74] sm:$0xf0]  ;;  %v1514_v10 = vld [vmem:[%s3194_s1 + $0x168] sm:$0xf]  ;;  %v2077_v15 = vld [vmem:[%s3194_s1 + $0x344] sm:$0xf] }
  0x40   :  { %1079 = vmatpush.bf16.msrb.mxu0 %v1843_v13  ;;  %v2020_v11 = vld [vmem:[%s3194_s1 + $0x174] sm:$0xf0]  ;;  %v1895_v13 = vor.u32 %v2113_v5, %v1892_v7  ;;  %v1387_v14 = vor.u32 %v1988_v9, %v1386_v8  ;;  %v1748_v17 = vld [vmem:[%s3194_s1 + $0x350] sm:$0xf0]  ;;  %v1370_v22 = vld [vmem:[%s3194_s1 + $0x48] sm:$0xf] }
  0x41   :  { %1093 = vmatpush.bf16.msrb.mxu1 %v1335_v18  ;;  %v2109_v18 = vld [vmem:[%s3194_s1 + $0x444] sm:$0xf]  ;;  %v1876_v21 = vld [vmem:[%s3194_s1 + $0x450] sm:$0xf0]  ;;  %v1984_v23 = vld [vmem:[%s3194_s1 + $0x54] sm:$0xf0] }
  0x42   :  { %1107 = vmatpush.bf16.msrb.mxu2 %v1463_v19  ;;  %v1515_v19 = vor.u32 %v2020_v11, %v1514_v10  ;;  %v1371_v28 = vor.u32 %v1984_v23, %v1370_v22  ;;  %v2073_v29 = vld [vmem:[%s3194_s1 + $0x324] sm:$0xf]  ;;  %v1732_v30 = vld [vmem:[%s3194_s1 + $0x330] sm:$0xf0]  ;;  %v1354_v36 = vld [vmem:[%s3194_s1 + $0x28] sm:$0xf] }
  0x43   :  { %1121 = vmatpush.bf16.msrb.mxu3 %v1591_v24  ;;  %1080 = vmatmul.bf16.vlgmr.msrb.gmra.mxu0 %v2612_v32  ;;  %v1498_v24 = vld [vmem:[%s3194_s1 + $0x148] sm:$0xf]  ;;  %v1860_v35 = vld [vmem:[%s3194_s1 + $0x430] sm:$0xf0]  ;;  %v1980_v37 = vld [vmem:[%s3194_s1 + $0x34] sm:$0xf0] }
  0x44   :  { %1128 = vmatpush.bf16.msra.mxu0 %v1831_v25  ;;  %1094 = vmatmul.bf16.vlgmr.msrb.gmra.mxu1 %v2399_v55  ;;  %v2016_v25 = vld [vmem:[%s3194_s1 + $0x154] sm:$0xf0]  ;;  %v1482_v38 = vld [vmem:[%s3194_s1 + $0x128] sm:$0xf]  ;;  %v1716_v42 = vld [vmem:[%s3194_s1 + $0x310] sm:$0xf0]  ;;  %v1355_v44 = vor.u32 %v1980_v37, %v1354_v36 }
  0x45   :  { %1142 = vmatpush.bf16.msra.mxu1 %v1959_v26  ;;  %1108 = vmatmul.bf16.vlgmr.msrb.gmra.mxu2 %v2491_v33  ;;  %v1751_v26 = vor.u32 %v2077_v15, %v1748_v17  ;;  %v1499_v34 = vor.u32 %v2016_v25, %v1498_v24  ;;  %v1844_v46 = vld [vmem:[%s3194_s1 + $0x410] sm:$0xf0]  ;;  %v1338_v47 = vld [vmem:[%s3194_s1 + $0x8] sm:$0xf]  ;;  %v1976_v49 = vld [vmem:[%s3194_s1 + $0x14] sm:$0xf0] }
  0x46   :  { %1156 = vmatpush.bf16.msra.mxu2 %v1451_v27  ;;  %1122 = vmatmul.bf16.vlgmr.msrb.gmra.mxu3 %v2453_v16  ;;  %v1879_v27 = vor.u32 %v2109_v18, %v1876_v21  ;;  %v1466_v50 = vld [vmem:[%s3194_s1 + $0x108] sm:$0xf]  ;;  %v2100_v57 = vld [vmem:[%s3194_s1 + $0x3f4] sm:$0xf0]  ;;  %v1339_v61 = vor.u32 %v1976_v49, %v1338_v47  ;;  %v2002_v62 = vld [vmem:[%s3194_s1 + $0xec] sm:$0xf] }
  0x47   :  { %1170 = vmatpush.bf16.msra.mxu3 %v1579_v31  ;;  %v2105_v31 = vld [vmem:[%s3194_s1 + $0x424] sm:$0xf]  ;;  %v1834_v54 = vld [vmem:[%s3194_s1 + $0x3e8] sm:$0xf]  ;;  %v2132_v59 = vld [vmem:[%s3194_s1 + $0x4f4] sm:$0xf0] }
  0x48   :  { %1129 = vmatpush.bf16.msra.mxu0 %v1815_v39  ;;  %v2012_v39 = vld [vmem:[%s3194_s1 + $0x134] sm:$0xf0]  ;;  %v1863_v43 = vor.u32 %v2105_v31, %v1860_v35  ;;  %v1452_v63 = vld [vmem:[%s3194_s1 + $0xf8] sm:$0xf0]  ;;  %v1690_v4 = vld [vmem:[%s3194_s1 + $0x2c8] sm:$0xf] }
  0x49   :  { %1143 = vmatpush.bf16.msra.mxu1 %v1943_v40  ;;  %v1735_v40 = vor.u32 %v2073_v29, %v1732_v30  ;;  %v1483_v48 = vor.u32 %v2012_v39, %v1482_v38  ;;  %v2064_v5 = vld [vmem:[%s3194_s1 + $0x2d4] sm:$0xf0]  ;;  %v1455_v7 = vor.u32 %v2002_v62, %v1452_v63  ;;  %v1946_v9 = vld [vmem:[%s3194_s1 + $0x4c8] sm:$0xf]  ;;  %v1998_v11 = vld [vmem:[%s3194_s1 + $0xcc] sm:$0xf] }
  0x4a   :  { %1157 = vmatpush.bf16.msra.mxu2 %v1435_v41  ;;  %v2069_v41 = vld [vmem:[%s3194_s1 + $0x304] sm:$0xf]  ;;  %v2096_v8 = vld [vmem:[%s3194_s1 + $0x3d4] sm:$0xf0]  ;;  %v1674_v17 = vld [vmem:[%s3194_s1 + $0x2a8] sm:$0xf] }
  0x4b   :  { %1171 = vmatpush.bf16.msra.mxu3 %v1563_v45  ;;  %v2101_v45 = vld [vmem:[%s3194_s1 + $0x404] sm:$0xf]  ;;  %v1719_v56 = vor.u32 %v2069_v41, %v1716_v42  ;;  %v2128_v10 = vld [vmem:[%s3194_s1 + $0x4d4] sm:$0xf0]  ;;  %v1930_v23 = vld [vmem:[%s3194_s1 + $0x4a8] sm:$0xf] }
  0x4c   :  { %1130 = vmatpush.bf16.msra.mxu0 %v1799_v51  ;;  %v2008_v51 = vld [vmem:[%s3194_s1 + $0x114] sm:$0xf0]  ;;  %v1847_v60 = vor.u32 %v2101_v45, %v1844_v46  ;;  %v1947_v15 = vor.u32 %v2128_v10, %v1946_v9  ;;  %v1994_v25 = vld [vmem:[%s3194_s1 + $0xac] sm:$0xf]  ;;  %v1658_v30 = vld [vmem:[%s3194_s1 + $0x288] sm:$0xf] }
  0x4d   :  { %1144 = vmatpush.bf16.msra.mxu1 %v1927_v52  ;;  %v1706_v52 = vld [vmem:[%s3194_s1 + $0x2e8] sm:$0xf]  ;;  %v2060_v18 = vld [vmem:[%s3194_s1 + $0x2b4] sm:$0xf0]  ;;  %v1990_v39 = vld [vmem:[%s3194_s1 + $0x8c] sm:$0xf] }
  0x4e   :  { %1158 = vmatpush.bf16.msra.mxu2 %v1419_v53  ;;  %v2068_v53 = vld [vmem:[%s3194_s1 + $0x2f4] sm:$0xf0]  ;;  %v1914_v37 = vld [vmem:[%s3194_s1 + $0x488] sm:$0xf] }
  0x4f   :  { %1172 = vmatpush.bf16.msra.mxu3 %v1547_v58  ;;  %v1962_v58 = vld [vmem:[%s3194_s1 + $0x4e8] sm:$0xf]  ;;  %v2092_v22 = vld [vmem:[%s3194_s1 + $0x3b4] sm:$0xf0] }
  0x50   :  { %1131 = vmatpush.bf16.msra.mxu0 %v1783_v0  ;;  %v1467_v0 = vor.u32 %v2008_v51, %v1466_v50  ;;  %v1963_v3 = vor.u32 %v2132_v59, %v1962_v58  ;;  %v2124_v24 = vld [vmem:[%s3194_s1 + $0x4b4] sm:$0xf0]  ;;  %v1770_v46 = vld [vmem:[%s3194_s1 + $0x368] sm:$0xf]  ;;  %v1986_v51 = vld [vmem:[%s3194_s1 + $0x6c] sm:$0xf] }
  0x51   :  { %1145 = vmatpush.bf16.msra.mxu1 %v1911_v1  ;;  %v1707_v1 = vor.u32 %v2068_v53, %v1706_v52  ;;  %v1931_v29 = vor.u32 %v2124_v24, %v1930_v23  ;;  %v2056_v31 = vld [vmem:[%s3194_s1 + $0x294] sm:$0xf0]  ;;  %v1898_v49 = vld [vmem:[%s3194_s1 + $0x468] sm:$0xf]  ;;  %v1388_v52 = vld [vmem:[%s3194_s1 + $0x78] sm:$0xf0] }
  0x52   :  { %1159 = vmatpush.bf16.msra.mxu2 %v1403_v2  ;;  %v1835_v2 = vor.u32 %v2100_v57, %v1834_v54  ;;  %v2088_v36 = vld [vmem:[%s3194_s1 + $0x394] sm:$0xf0]  ;;  %v1659_v41 = vor.u32 %v2056_v31, %v1658_v30  ;;  %v1626_v57 = vld [vmem:[%s3194_s1 + $0x248] sm:$0xf]  ;;  %v2066_v30 = vld [vmem:[%s3194_s1 + $0x2ec] sm:$0xf] }
  0x53   :  { %1173 = vmatpush.bf16.msra.mxu3 %v1531_v6  ;;  %v1818_v6 = vld [vmem:[%s3194_s1 + $0x3c8] sm:$0xf]  ;;  %v2120_v38 = vld [vmem:[%s3194_s1 + $0x494] sm:$0xf0] }
  0x54   :  { %1132 = vmatpush.bf16.msra.mxu0 %v1767_v12  ;;  %v1436_v12 = vld [vmem:[%s3194_s1 + $0xd8] sm:$0xf0]  ;;  %v2052_v45 = vld [vmem:[%s3194_s1 + $0x274] sm:$0xf0]  ;;  %v1754_v59 = vld [vmem:[%s3194_s1 + $0x348] sm:$0xf] }
  0x55   :  { %1146 = vmatpush.bf16.msra.mxu1 %v1895_v13  ;;  %v1691_v13 = vor.u32 %v2064_v5, %v1690_v4  ;;  %v1439_v21 = vor.u32 %v1998_v11, %v1436_v12  ;;  %v2116_v50 = vld [vmem:[%s3194_s1 + $0x474] sm:$0xf0]  ;;  %v1882_v62 = vld [vmem:[%s3194_s1 + $0x448] sm:$0xf]  ;;  %v1978_v12 = vld [vmem:[%s3194_s1 + $0x2c] sm:$0xf] }
  0x56   :  { %1160 = vmatpush.bf16.msra.mxu2 %v1387_v14  ;;  %v1819_v14 = vor.u32 %v2096_v8, %v1818_v6  ;;  %v2048_v58 = vld [vmem:[%s3194_s1 + $0x254] sm:$0xf0]  ;;  %v1610_v5 = vld [vmem:[%s3194_s1 + $0x228] sm:$0xf] }
  0x57   :  { %1174 = vmatpush.bf16.msra.mxu3 %v1515_v19  ;;  %v1802_v19 = vld [vmem:[%s3194_s1 + $0x3a8] sm:$0xf]  ;;  %v2112_v63 = vld [vmem:[%s3194_s1 + $0x454] sm:$0xf0] }
  0x58   :  { %1133 = vmatpush.bf16.msra.mxu0 %v1751_v26  ;;  %v1420_v26 = vld [vmem:[%s3194_s1 + $0xb8] sm:$0xf0]  ;;  %v1883_v4 = vor.u32 %v2112_v63, %v1882_v62  ;;  %v2044_v6 = vld [vmem:[%s3194_s1 + $0x234] sm:$0xf0]  ;;  %v1866_v10 = vld [vmem:[%s3194_s1 + $0x428] sm:$0xf] }
  0x59   :  { %1147 = vmatpush.bf16.msra.mxu1 %v1879_v27  ;;  %v1675_v27 = vor.u32 %v2060_v18, %v1674_v17  ;;  %v1423_v35 = vor.u32 %v1994_v25, %v1420_v26  ;;  %v2076_v9 = vld [vmem:[%s3194_s1 + $0x334] sm:$0xf0]  ;;  %v1850_v23 = vld [vmem:[%s3194_s1 + $0x408] sm:$0xf]  ;;  %v1974_v26 = vld [vmem:[%s3194_s1 + $0xc] sm:$0xf] }
  0x5a   :  { %1161 = vmatpush.bf16.msra.mxu2 %v1371_v28  ;;  %v1803_v28 = vor.u32 %v2092_v22, %v1802_v19  ;;  %v2108_v11 = vld [vmem:[%s3194_s1 + $0x434] sm:$0xf0]  ;;  %v1676_v62 = vld [vmem:[%s3194_s1 + $0x2b8] sm:$0xf0]  ;;  %v2090_v63 = vld [vmem:[%s3194_s1 + $0x3ac] sm:$0xf] }
  0x5b   :  { %1175 = vmatpush.bf16.msra.mxu3 %v1499_v34  ;;  %v1786_v34 = vld [vmem:[%s3194_s1 + $0x388] sm:$0xf]  ;;  %v2040_v17 = vld [vmem:[%s3194_s1 + $0x214] sm:$0xf0]  ;;  %v1867_v19 = vor.u32 %v2108_v11, %v1866_v10  ;;  %v2086_v10 = vld [vmem:[%s3194_s1 + $0x38c] sm:$0xf] }
  0x5c   :  { %1134 = vmatpush.bf16.msra.mxu0 %v1735_v40  ;;  %v1404_v40 = vld [vmem:[%s3194_s1 + $0x98] sm:$0xf0]  ;;  %v1787_v42 = vor.u32 %v2088_v36, %v1786_v34  ;;  %v2072_v22 = vld [vmem:[%s3194_s1 + $0x314] sm:$0xf0] }
  0x5d   :  { %1148 = vmatpush.bf16.msra.mxu1 %v1863_v43  ;;  %v1915_v43 = vor.u32 %v2120_v38, %v1914_v37  ;;  %v1407_v47 = vor.u32 %v1990_v39, %v1404_v40  ;;  %v2104_v25 = vld [vmem:[%s3194_s1 + $0x414] sm:$0xf0]  ;;  %v1708_v34 = vld [vmem:[%s3194_s1 + $0x2f8] sm:$0xf0]  ;;  %v2130_v39 = vld [vmem:[%s3194_s1 + $0x4ec] sm:$0xf] }
  0x5e   :  { %1162 = vmatpush.bf16.msra.mxu2 %v1355_v44  ;;  %v1642_v44 = vld [vmem:[%s3194_s1 + $0x268] sm:$0xf]  ;;  %v1836_v36 = vld [vmem:[%s3194_s1 + $0x3f8] sm:$0xf0]  ;;  %v1851_v38 = vor.u32 %v2104_v25, %v1850_v23 }
  0x5f   :  { %1176 = vmatpush.bf16.msra.mxu3 %v1483_v48  ;;  %v2084_v48 = vld [vmem:[%s3194_s1 + $0x374] sm:$0xf0]  ;;  %v1643_v53 = vor.u32 %v2052_v45, %v1642_v44  ;;  %v1964_v40 = vld [vmem:[%s3194_s1 + $0x4f8] sm:$0xf0]  ;;  %v2030_v45 = vld [vmem:[%s3194_s1 + $0x1cc] sm:$0xf] }
  0x60   :  { %1135 = vmatpush.bf16.msra.mxu0 %v1719_v56  ;;  %v1771_v54 = vor.u32 %v2084_v48, %v1770_v46  ;;  %v1899_v56 = vor.u32 %v2116_v50, %v1898_v49  ;;  %v1564_v46 = vld [vmem:[%s3194_s1 + $0x1d8] sm:$0xf0]  ;;  %v1967_v48 = vor.u32 %v2130_v39, %v1964_v40  ;;  %v2094_v50 = vld [vmem:[%s3194_s1 + $0x3cc] sm:$0xf] }
  0x61   :  { %1149 = vmatpush.bf16.msra.mxu1 %v1847_v60  ;;  %v1391_v60 = vor.u32 %v1986_v51, %v1388_v52  ;;  %v1692_v49 = vld [vmem:[%s3194_s1 + $0x2d8] sm:$0xf0]  ;;  %v2126_v52 = vld [vmem:[%s3194_s1 + $0x4cc] sm:$0xf] }
  0x62   :  { %1163 = vmatpush.bf16.msra.mxu2 %v1339_v61  ;;  %v2080_v61 = vld [vmem:[%s3194_s1 + $0x354] sm:$0xf0]  ;;  %v1820_v51 = vld [vmem:[%s3194_s1 + $0x3d8] sm:$0xf0]  ;;  %v2110_v40 = vld [vmem:[%s3194_s1 + $0x44c] sm:$0xf] }
  0x63   :  { %1177 = vmatpush.bf16.msra.mxu3 %v1467_v0  ;;  %1136 = vmatmul.bf16.vlgmr.msra.gmra.mxu0 %v2464_v20  ;;  %v1982_v0 = vld [vmem:[%s3194_s1 + $0x4c] sm:$0xf]  ;;  %v1788_v11 = vld [vmem:[%s3194_s1 + $0x398] sm:$0xf0] }
  0x64   :  { %1184 = vmatpush.bf16.msrb.mxu0 %v1707_v1  ;;  %1150 = vmatmul.bf16.vlgmr.msra.gmra.mxu1 %v2612_v32  ;;  %v1372_v1 = vld [vmem:[%s3194_s1 + $0x58] sm:$0xf0] }
  0x65   :  { %1198 = vmatpush.bf16.msrb.mxu1 %v1835_v2  ;;  %1164 = vmatmul.bf16.vlgmr.msra.gmra.mxu2 %v2399_v55  ;;  %v1627_v2 = vor.u32 %v2048_v58, %v1626_v57  ;;  %v1375_v8 = vor.u32 %v1982_v0, %v1372_v1  ;;  %v1823_v57 = vor.u32 %v2094_v50, %v1820_v51  ;;  %v2026_v58 = vld [vmem:[%s3194_s1 + $0x1ac] sm:$0xf]  ;;  %v1804_v0 = vld [vmem:[%s3194_s1 + $0x3b8] sm:$0xf0] }
  0x66   :  { %1212 = vmatpush.bf16.msrb.mxu2 %v1963_v3  ;;  %1178 = vmatmul.bf16.vlgmr.msra.gmra.mxu3 %v2491_v33  ;;  %v1755_v3 = vor.u32 %v2080_v61, %v1754_v59  ;;  %v1548_v59 = vld [vmem:[%s3194_s1 + $0x1b8] sm:$0xf0]  ;;  %v2122_v1 = vld [vmem:[%s3194_s1 + $0x4ac] sm:$0xf] }
  0x67   :  { %1226 = vmatpush.bf16.msrb.mxu3 %v1455_v7  ;;  %v1738_v7 = vld [vmem:[%s3194_s1 + $0x328] sm:$0xf]  ;;  %v1644_v23 = vld [vmem:[%s3194_s1 + $0x278] sm:$0xf0]  ;;  %v2074_v50 = vld [vmem:[%s3194_s1 + $0x32c] sm:$0xf] }
  0x68   :  { %1185 = vmatpush.bf16.msrb.mxu0 %v1691_v13  ;;  %v1356_v13 = vld [vmem:[%s3194_s1 + $0x38] sm:$0xf0]  ;;  %v1739_v18 = vor.u32 %v2076_v9, %v1738_v7 }
  0x69   :  { %1199 = vmatpush.bf16.msrb.mxu1 %v1819_v14  ;;  %v1611_v14 = vor.u32 %v2044_v6, %v1610_v5  ;;  %v1359_v24 = vor.u32 %v1978_v12, %v1356_v13  ;;  %v1807_v5 = vor.u32 %v2090_v63, %v1804_v0  ;;  %v2022_v6 = vld [vmem:[%s3194_s1 + $0x18c] sm:$0xf]  ;;  %v1532_v7 = vld [vmem:[%s3194_s1 + $0x198] sm:$0xf0] }
  0x6a   :  { %1213 = vmatpush.bf16.msrb.mxu2 %v1947_v15  ;;  %v1594_v15 = vld [vmem:[%s3194_s1 + $0x208] sm:$0xf]  ;;  %v2118_v12 = vld [vmem:[%s3194_s1 + $0x48c] sm:$0xf]  ;;  %v1916_v13 = vld [vmem:[%s3194_s1 + $0x498] sm:$0xf0] }
  0x6b   :  { %1227 = vmatpush.bf16.msrb.mxu3 %v1439_v21  ;;  %v1722_v21 = vld [vmem:[%s3194_s1 + $0x308] sm:$0xf]  ;;  %v1595_v31 = vor.u32 %v2040_v17, %v1594_v15  ;;  %v1791_v17 = vor.u32 %v2086_v10, %v1788_v11  ;;  %v1772_v25 = vld [vmem:[%s3194_s1 + $0x378] sm:$0xf0]  ;;  %v2070_v63 = vld [vmem:[%s3194_s1 + $0x30c] sm:$0xf] }
  0x6c   :  { %1186 = vmatpush.bf16.msrb.mxu0 %v1675_v27  ;;  %v1340_v27 = vld [vmem:[%s3194_s1 + $0x18] sm:$0xf0]  ;;  %v1723_v37 = vor.u32 %v2072_v22, %v1722_v21  ;;  %v2050_v21 = vld [vmem:[%s3194_s1 + $0x26c] sm:$0xf]  ;;  %v1919_v22 = vor.u32 %v2118_v12, %v1916_v13  ;;  %v3176_v12 = vld [vmem:[%s3196_s2] sm:$0xf] }
  0x6d   :  { %1200 = vmatpush.bf16.msrb.mxu1 %v1803_v28  ;;  %v2034_v28 = vld [vmem:[%s3194_s1 + $0x1ec] sm:$0xf]  ;;  %v1756_v39 = vld [vmem:[%s3194_s1 + $0x358] sm:$0xf0] }
  0x6e   :  { %1214 = vmatpush.bf16.msrb.mxu2 %v1931_v29  ;;  %v1580_v29 = vld [vmem:[%s3194_s1 + $0x1f8] sm:$0xf0] }
  0x6f   :  { %1228 = vmatpush.bf16.msrb.mxu3 %v1423_v35  ;;  %v2098_v35 = vld [vmem:[%s3194_s1 + $0x3ec] sm:$0xf]  ;;  %v1740_v51 = vld [vmem:[%s3194_s1 + $0x338] sm:$0xf0] }
  0x70   :  { %1187 = vmatpush.bf16.msrb.mxu0 %v1659_v41  ;;  %v1343_v41 = vor.u32 %v1974_v26, %v1340_v27  ;;  %v1839_v44 = vor.u32 %v2098_v35, %v1836_v36  ;;  %v2114_v26 = vld [vmem:[%s3194_s1 + $0x46c] sm:$0xf]  ;;  %v1900_v27 = vld [vmem:[%s3194_s1 + $0x478] sm:$0xf0] }
  0x71   :  { %1201 = vmatpush.bf16.msrb.mxu1 %v1787_v42  ;;  %v1583_v42 = vor.u32 %v2034_v28, %v1580_v29  ;;  %v1647_v29 = vor.u32 %v2050_v21, %v1644_v23  ;;  %v2046_v35 = vld [vmem:[%s3194_s1 + $0x24c] sm:$0xf]  ;;  %v1903_v36 = vor.u32 %v2114_v26, %v1900_v27  ;;  %v1724_v0 = vld [vmem:[%s3194_s1 + $0x318] sm:$0xf0] }
  0x72   :  { %1215 = vmatpush.bf16.msrb.mxu2 %v1915_v43  ;;  %v1711_v43 = vor.u32 %v2066_v30, %v1708_v34  ;;  %v1500_v34 = vld [vmem:[%s3194_s1 + $0x158] sm:$0xf0] }
  0x73   :  { %1229 = vmatpush.bf16.msrb.mxu3 %v1407_v47  ;;  %v2062_v47 = vld [vmem:[%s3194_s1 + $0x2cc] sm:$0xf] }
  0x74   :  { %1188 = vmatpush.bf16.msrb.mxu0 %v1643_v53  ;;  %v1948_v53 = vld [vmem:[%s3194_s1 + $0x4d8] sm:$0xf0] }
  0x75   :  { %1202 = vmatpush.bf16.msrb.mxu1 %v1771_v54  ;;  %v1567_v54 = vor.u32 %v2030_v45, %v1564_v46  ;;  %v1951_v61 = vor.u32 %v2126_v52, %v1948_v53  ;;  %v2010_v45 = vld [vmem:[%s3194_s1 + $0x12c] sm:$0xf]  ;;  %v1484_v46 = vld [vmem:[%s3194_s1 + $0x138] sm:$0xf0] }
  0x76   :  { %1216 = vmatpush.bf16.msrb.mxu2 %v1899_v56  ;;  %v1695_v56 = vor.u32 %v2062_v47, %v1692_v49  ;;  %v2042_v47 = vld [vmem:[%s3194_s1 + $0x22c] sm:$0xf]  ;;  %v1612_v49 = vld [vmem:[%s3194_s1 + $0x238] sm:$0xf0] }
  0x77   :  { %1230 = vmatpush.bf16.msrb.mxu3 %v1391_v60  ;;  %v2058_v60 = vld [vmem:[%s3194_s1 + $0x2ac] sm:$0xf]  ;;  %v1868_v53 = vld [vmem:[%s3194_s1 + $0x438] sm:$0xf0] }
  0x78   :  { %1189 = vmatpush.bf16.msrb.mxu0 %v1627_v2  ;;  %v1932_v2 = vld [vmem:[%s3194_s1 + $0x4b8] sm:$0xf0]  ;;  %v2106_v52 = vld [vmem:[%s3194_s1 + $0x42c] sm:$0xf] }
  0x79   :  { %1203 = vmatpush.bf16.msrb.mxu1 %v1755_v3  ;;  %v1551_v3 = vor.u32 %v2026_v58, %v1548_v59  ;;  %v1935_v9 = vor.u32 %v2122_v1, %v1932_v2  ;;  %v2006_v58 = vld [vmem:[%s3194_s1 + $0x10c] sm:$0xf]  ;;  %v1468_v59 = vld [vmem:[%s3194_s1 + $0x118] sm:$0xf0] }
  0x7a   :  { %1217 = vmatpush.bf16.msrb.mxu2 %v1883_v4  ;;  %v1679_v4 = vor.u32 %v2058_v60, %v1676_v62  ;;  %v2038_v60 = vld [vmem:[%s3194_s1 + $0x20c] sm:$0xf]  ;;  %v1596_v62 = vld [vmem:[%s3194_s1 + $0x218] sm:$0xf0] }
  0x7b   :  { %1231 = vmatpush.bf16.msrb.mxu3 %v1375_v8  ;;  %v2054_v8 = vld [vmem:[%s3194_s1 + $0x28c] sm:$0xf]  ;;  %v1852_v2 = vld [vmem:[%s3194_s1 + $0x418] sm:$0xf0] }
  0x7c   :  { %1190 = vmatpush.bf16.msrb.mxu0 %v1611_v14  ;;  %v1535_v14 = vor.u32 %v2022_v6, %v1532_v7  ;;  %v2102_v1 = vld [vmem:[%s3194_s1 + $0x40c] sm:$0xf] }
  0x7d   :  { %1204 = vmatpush.bf16.msrb.mxu1 %v1739_v18  ;;  %v2018_v18 = vld [vmem:[%s3194_s1 + $0x16c] sm:$0xf]  ;;  %v1855_v6 = vor.u32 %v2102_v1, %v1852_v2 }
  0x7e   :  { %1218 = vmatpush.bf16.msrb.mxu2 %v1867_v19  ;;  %v1516_v19 = vld [vmem:[%s3194_s1 + $0x178] sm:$0xf0] }
  0x7f   :  { %1232 = vmatpush.bf16.msrb.mxu3 %v1359_v24  ;;  %v2082_v24 = vld [vmem:[%s3194_s1 + $0x36c] sm:$0xf]  ;;  %v1519_v28 = vor.u32 %v2018_v18, %v1516_v19 }
  0x80   :  { %1191 = vmatpush.bf16.msrb.mxu0 %v1595_v31  ;;  %v1775_v30 = vor.u32 %v2082_v24, %v1772_v25  ;;  %v2014_v31 = vld [vmem:[%s3194_s1 + $0x14c] sm:$0xf] }
  0x81   :  { %1205 = vmatpush.bf16.msrb.mxu1 %v1723_v37  ;;  %v1628_v37 = vld [vmem:[%s3194_s1 + $0x258] sm:$0xf0] }
  0x82   :  { %1219 = vmatpush.bf16.msrb.mxu2 %v1851_v38  ;;  %v2078_v38 = vld [vmem:[%s3194_s1 + $0x34c] sm:$0xf] }
  0x83   :  { %1233 = vmatpush.bf16.msrb.mxu3 %v1343_v41  ;;  %1192 = vmatmul.bf16.vlgmr.msrb.gmra.mxu0 %v2453_v16  ;;  %v1884_v41 = vld [vmem:[%s3194_s1 + $0x458] sm:$0xf0] }
  0x84   :  { %1240 = vmatpush.bf16.msra.mxu0 %v1583_v42  ;;  %1206 = vmatmul.bf16.vlgmr.msrb.gmra.mxu1 %v2464_v20  ;;  %v1503_v42 = vor.u32 %v2014_v31, %v1500_v34 }
  0x85   :  { %1254 = vmatpush.bf16.msra.mxu1 %v1711_v43  ;;  %1220 = vmatmul.bf16.vlgmr.msrb.gmra.mxu2 %v2612_v32  ;;  %v1631_v43 = vor.u32 %v2046_v35, %v1628_v37 }
  0x86   :  { %1268 = vmatpush.bf16.msra.mxu2 %v1839_v44  ;;  %1234 = vmatmul.bf16.vlgmr.msrb.gmra.mxu3 %v2399_v55  ;;  %v1660_v55 = vld [vmem:[%s3194_s1 + $0x298] sm:$0xf0]  ;;  %v1759_v44 = vor.u32 %v2078_v38, %v1756_v39 }
  0x87   :  { %1282 = vmatpush.bf16.msra.mxu3 %v1967_v48  ;;  %v1663_v15 = vor.u32 %v2054_v8, %v1660_v55  ;;  %v1887_v48 = vor.u32 %v2110_v40, %v1884_v41 }
  0x88   :  { %1241 = vmatpush.bf16.msra.mxu0 %v1567_v54  ;;  %v1487_v54 = vor.u32 %v2010_v45, %v1484_v46 }
  0x89   :  { %1255 = vmatpush.bf16.msra.mxu1 %v1695_v56  ;;  %v1615_v56 = vor.u32 %v2042_v47, %v1612_v49 }
  0x8a   :  { %1269 = vmatpush.bf16.msra.mxu2 %v1823_v57  ;;  %v1743_v57 = vor.u32 %v2074_v50, %v1740_v51 }
  0x8b   :  { %1283 = vmatpush.bf16.msra.mxu3 %v1951_v61  ;;  %v1871_v61 = vor.u32 %v2106_v52, %v1868_v53 }
  0x8c   :  { %1242 = vmatpush.bf16.msra.mxu0 %v1551_v3  ;;  %v1471_v3 = vor.u32 %v2006_v58, %v1468_v59  ;;  %v184_v59 = vperm.slane %v3176_v12, 2 }
  0x8d   :  { %1256 = vmatpush.bf16.msra.mxu1 %v1679_v4  ;;  %v1599_v4 = vor.u32 %v2038_v60, %v1596_v62 }
  0x8e   :  { %1270 = vmatpush.bf16.msra.mxu2 %v1807_v5  ;;  %v1727_v5 = vor.u32 %v2070_v63, %v1724_v0  ;;  %v185_v0 = vperm.slane %v3176_v12, 3 }
  0x8f   :  { %1284 = vmatpush.bf16.msra.mxu3 %v1935_v9 }
  0x90   :  { %1243 = vmatpush.bf16.msra.mxu0 %v1535_v14 }
  0x91   :  { %1257 = vmatpush.bf16.msra.mxu1 %v1663_v15 }
  0x92   :  { %1271 = vmatpush.bf16.msra.mxu2 %v1791_v17 }
  0x93   :  { %1285 = vmatpush.bf16.msra.mxu3 %v1919_v22 }
  0x94   :  { %1244 = vmatpush.bf16.msra.mxu0 %v1519_v28 }
  0x95   :  { %1258 = vmatpush.bf16.msra.mxu1 %v1647_v29 }
  0x96   :  { %1272 = vmatpush.bf16.msra.mxu2 %v1775_v30 }
  0x97   :  { %1286 = vmatpush.bf16.msra.mxu3 %v1903_v36 }
  0x98   :  { %1245 = vmatpush.bf16.msra.mxu0 %v1503_v42 }
  0x99   :  { %1259 = vmatpush.bf16.msra.mxu1 %v1631_v43 }
  0x9a   :  { %1273 = vmatpush.bf16.msra.mxu2 %v1759_v44 }
  0x9b   :  { %1287 = vmatpush.bf16.msra.mxu3 %v1887_v48 }
  0x9c   :  { %1246 = vmatpush.bf16.msra.mxu0 %v1487_v54 }
  0x9d   :  { %1260 = vmatpush.bf16.msra.mxu1 %v1615_v56 }
  0x9e   :  { %1274 = vmatpush.bf16.msra.mxu2 %v1743_v57 }
  0x9f   :  { %1288 = vmatpush.bf16.msra.mxu3 %v1871_v61 }
  0xa0   :  { %1247 = vmatpush.bf16.msra.mxu0 %v1471_v3 }
  0xa1   :  { %1261 = vmatpush.bf16.msra.mxu1 %v1599_v4 }
  0xa2   :  { %1275 = vmatpush.bf16.msra.mxu2 %v1727_v5 }
  0xa3   :  { %1289 = vmatpush.bf16.msra.mxu3 %v1855_v6  ;;  %1248 = vmatmul.bf16.vlgmr.msra.gmra.mxu0 %v2491_v33  ;;  %v1025_v7 = vpop.f32.mrf.mxu0 }
  0xa4   :  { %1262 = vmatmul.bf16.vlgmr.msra.gmra.mxu1 %v2453_v16  ;;  %v182_v16 = vperm.slane %v3176_v12, 0 }
  0xa5   :  { %1276 = vmatmul.bf16.vlgmr.msra.gmra.mxu2 %v2464_v20  ;;  %v183_v20 = vperm.slane %v3176_v12, 1 }
  0xa6   :  { %1290 = vmatmul.bf16.vlgmr.msra.gmra.mxu3 %v2612_v32  ;;  %v1026_v32 = vadd.f32 %v1025_v7, %v182_v16 }
  0xa8   :  { %v1039_v8 = vpop.f32.mrf.mxu1  ;;  %v1053_v9 = vpop.f32.mrf.mxu2 }
  0xa9   :  { %v1040_v19 = vadd.f32 %v1039_v8, %v1026_v32 }
  0xab   :  { %v1027_v55 = vpop.f32.mrf.mxu0  ;;  %v1054_v26 = vadd.f32 %v1053_v9, %v1040_v19 }
  0xac   :  { %v1067_v11 = vpop.f32.mrf.mxu3  ;;  %v1028_v25 = vadd.f32 %v1027_v55, %v182_v16 }
  0xad   :  { %v1068_v30 = vadd.f32 %v1067_v11, %v1054_v26 }
  0xb0   :  { %v1041_v10 = vpop.f32.mrf.mxu1  ;;  %v1055_v13 = vpop.f32.mrf.mxu2 }
  0xb1   :  { %v1042_v31 = vadd.f32 %v1041_v10, %v1028_v25 }
  0xb3   :  { %v1056_v40 = vadd.f32 %v1055_v13, %v1042_v31 }
  0xb4   :  { %v1069_v15 = vpop.f32.mrf.mxu3 }
  0xb5   :  { %v1070_v44 = vadd.f32 %v1069_v15, %v1056_v40 }
  0xc0   :  { %v1081_v33 = vpop.f32.mrf.mxu0 }
  0xc1   :  { %v1095_v14 = vpop.f32.mrf.mxu1  ;;  %v1082_v39 = vadd.f32 %v1081_v33, %v1068_v30 }
  0xc2   :  { %v1096_v18 = vadd.f32 %v1095_v14, %v183_v20 }
  0xc8   :  { %v1109_v17 = vpop.f32.mrf.mxu2  ;;  %v1083_v22 = vpop.f32.mrf.mxu0 }
  0xc9   :  { %v1097_v21 = vpop.f32.mrf.mxu1  ;;  %v1123_v23 = vpop.f32.mrf.mxu3  ;;  %v1110_v24 = vadd.f32 %v1109_v17, %v1096_v18  ;;  %v1084_v48 = vadd.f32 %v1083_v22, %v1070_v44 }
  0xca   :  { %v1098_v27 = vadd.f32 %v1097_v21, %v183_v20 }
  0xcb   :  { %v1124_v28 = vadd.f32 %v1123_v23, %v1110_v24 }
  0xd0   :  { %v1111_v29 = vpop.f32.mrf.mxu2 }
  0xd1   :  { %v1112_v37 = vadd.f32 %v1111_v29, %v1098_v27  ;;  %v1125_v38 = vpop.f32.mrf.mxu3 }
  0xd3   :  { %v1126_v43 = vadd.f32 %v1125_v38, %v1112_v37 }
  0xe0   :  { %v1137_v34 = vpop.f32.mrf.mxu0 }
  0xe1   :  { %v1138_v35 = vadd.f32 %v1137_v34, %v1124_v28  ;;  %v1151_v36 = vpop.f32.mrf.mxu1 }
  0xe3   :  { %v1152_v41 = vadd.f32 %v1151_v36, %v1138_v35 }
  0xe5   :  { %v1296_v42 = vpack.c.bf16 %v1152_v41, %v1082_v39 }
  0xe7   :  { %1300 = vst [vmem:[%s3197_s3] sm:$0xff] %v1296_v42 }
  0xe8   :  { %v1139_v45 = vpop.f32.mrf.mxu0  ;;  %v1165_v51 = vpop.f32.mrf.mxu2 }
  0xe9   :  { %v1140_v46 = vadd.f32 %v1139_v45, %v1126_v43  ;;  %v1153_v47 = vpop.f32.mrf.mxu1  ;;  %v1179_v52 = vpop.f32.mrf.mxu3  ;;  %v1166_v62 = vadd.f32 %v1165_v51, %v184_v59 }
  0xeb   :  { %v1154_v49 = vadd.f32 %v1153_v47, %v1140_v46  ;;  %v1180_v1 = vadd.f32 %v1179_v52, %v1166_v62 }
  0xed   :  { %v1298_v50 = vpack.c.bf16 %v1154_v49, %v1084_v48 }
  0xef   :  { %1302 = vst [vmem:[%s3197_s3 + $0x10] sm:$0xff] %v1298_v50 }
  0xf0   :  { %v1167_v53 = vpop.f32.mrf.mxu2 }
  0xf1   :  { %v1181_v54 = vpop.f32.mrf.mxu3  ;;  %v1168_v9 = vadd.f32 %v1167_v53, %v184_v59 }
  0xf3   :  { %v1182_v13 = vadd.f32 %v1181_v54, %v1168_v9 }
 0x100   :  { %v1193_v56 = vpop.f32.mrf.mxu0 }
 0x101   :  { %v1207_v57 = vpop.f32.mrf.mxu1  ;;  %v1194_v6 = vadd.f32 %v1193_v56, %v1180_v1 }
 0x103   :  { %v1208_v55 = vadd.f32 %v1207_v57, %v1194_v6 }
 0x108   :  { %v1221_v58 = vpop.f32.mrf.mxu2  ;;  %v1195_v61 = vpop.f32.mrf.mxu0 }
 0x109   :  { %v1235_v60 = vpop.f32.mrf.mxu3  ;;  %v1209_v63 = vpop.f32.mrf.mxu1  ;;  %v1222_v20 = vadd.f32 %v1221_v58, %v1208_v55  ;;  %v1196_v17 = vadd.f32 %v1195_v61, %v1182_v13 }
 0x10a   :  { %v1236_v3 = vadd.f32 %v1235_v60, %v185_v0 }
 0x10b   :  { %v1210_v23 = vadd.f32 %v1209_v63, %v1196_v17 }
 0x110   :  { %v1223_v2 = vpop.f32.mrf.mxu2 }
 0x111   :  { %v1237_v4 = vpop.f32.mrf.mxu3  ;;  %v1224_v26 = vadd.f32 %v1223_v2, %v1210_v23 }
 0x112   :  { %v1238_v14 = vadd.f32 %v1237_v4, %v185_v0 }
 0x120   :  { %v1249_v5 = vpop.f32.mrf.mxu0 }
 0x121   :  { %v1250_v7 = vadd.f32 %v1249_v5, %v1236_v3  ;;  %v1263_v8 = vpop.f32.mrf.mxu1 }
 0x123   :  { %v1264_v10 = vadd.f32 %v1263_v8, %v1250_v7 }
 0x128   :  { %v1277_v11 = vpop.f32.mrf.mxu2  ;;  %v1251_v15 = vpop.f32.mrf.mxu0 }
 0x129   :  { %v1278_v33 = vadd.f32 %v1277_v11, %v1264_v10  ;;  %v1291_v16 = vpop.f32.mrf.mxu3  ;;  %v1252_v12 = vadd.f32 %v1251_v15, %v1238_v14  ;;  %v1265_v19 = vpop.f32.mrf.mxu1 }
 0x12b   :  { %v1292_v32 = vadd.f32 %v1291_v16, %v1278_v33  ;;  %v1266_v21 = vadd.f32 %v1265_v19, %v1252_v12 }
 0x12d   :  { %v1297_v18 = vpack.c.bf16 %v1292_v32, %v1222_v20 }
 0x12f   :  { %1301 = vst [vmem:[%s3197_s3 + $0x8] sm:$0xff] %v1297_v18 }
 0x130   :  { %v1279_v22 = vpop.f32.mrf.mxu2 }
 0x131   :  { %v1280_v24 = vadd.f32 %v1279_v22, %v1266_v21  ;;  %v1293_v25 = vpop.f32.mrf.mxu3 }
 0x133   :  { %v1294_v27 = vadd.f32 %v1293_v25, %v1280_v24 }
 0x135   :  { %v1299_v28 = vpack.c.bf16 %v1294_v27, %v1224_v26 }
 0x137   :  { %1303 = vst [vmem:[%s3197_s3 + $0x18] sm:$0xff] %v1299_v28 }

</bundles_post_ra>
